<compile_context>
chip_gen: v6e
topology: v6e:2x2x1
jax: 0.10.0
libtpu: 0.0.40
codegen_flags: <defaults>
</compile_context>

<pallas_src>
import functools

import jax
import jax.numpy as jnp
from jax.experimental import pallas as pl
from jax.experimental.pallas import tpu as pltpu

VMEM_SPEC = pl.BlockSpec(memory_space=pltpu.MemorySpace.VMEM)


# ----------------------------------------------------------------------------
# Single fused kernel: vision linear + LA tail + projector (both branches,
# shared weights) + Barlow-Twins loss.
# ----------------------------------------------------------------------------
def _fused_barlow_kernel(img_ref, la_ref, pool_ref,
                         vis_w_ref, ln_w_ref, ln_b_ref, la_w_ref,
                         w1_ref, g1_ref, b1_ref,
                         w2_ref, g2_ref, b2_ref,
                         w3_ref, o_ref,
                         *, ln_eps, bn_eps, inv_batch, lambd, batch):
    # ---- Vision branch: flattened image @ vis_w -> f1 [B, 2048] -------------
    f1 = jnp.dot(img_ref[...].astype(jnp.bfloat16), vis_w_ref[...],
                 preferred_element_type=jnp.float32)

    # ---- Language/action branch: LayerNorm -> mean-pool -> matmul -----------
    x = la_ref[...]                                              # [B*L, D] f32
    mean = jnp.mean(x, axis=-1, keepdims=True)
    var = jnp.mean((x - mean) ** 2, axis=-1, keepdims=True)
    xn = (x - mean) * jax.lax.rsqrt(var + ln_eps) * ln_w_ref[...] + ln_b_ref[...]
    # Static per-batch mean-pool expressed as a tiny matmul: [B, B*L] @ [B*L, D]
    pooled = jnp.dot(pool_ref[...], xn, preferred_element_type=jnp.float32)
    f2 = jnp.dot(pooled.astype(jnp.bfloat16), la_w_ref[...],
                 preferred_element_type=jnp.float32)             # [B, 2048]

    # ---- Shared-weight projector on BOTH branches at once -------------------
    def batch_norm(v):
        # torch BatchNorm1d training-mode statistics (biased variance), f32.
        m = jnp.mean(v, axis=0, keepdims=True)
        s = jnp.mean((v - m) ** 2, axis=0, keepdims=True)
        return (v - m) * jax.lax.rsqrt(s + bn_eps)

    def dual_bn(v):
        # Rows 0:B are branch 1, rows B:2B are branch 2 -> per-branch stats.
        return jnp.concatenate([batch_norm(v[:batch]), batch_norm(v[batch:])],
                               axis=0)

    f = jnp.concatenate([f1, f2], axis=0).astype(jnp.bfloat16)   # [2B, 2048]
    h = jnp.dot(f, w1_ref[...], preferred_element_type=jnp.float32)
    h = jnp.maximum(dual_bn(h) * g1_ref[...] + b1_ref[...], 0.0)
    h = jnp.dot(h.astype(jnp.bfloat16), w2_ref[...],
                preferred_element_type=jnp.float32)
    h = jnp.maximum(dual_bn(h) * g2_ref[...] + b2_ref[...], 0.0)
    z = jnp.dot(h.astype(jnp.bfloat16), w3_ref[...],
                preferred_element_type=jnp.float32)              # [2B, D_out]

    z1n = batch_norm(z[:batch])            # affine=False BN of z1
    z2n = batch_norm(z[batch:])            # affine=False BN of z2

    # c = bn(z1).T @ bn(z2) / batch  (contract batch dim on the MXU, f32).
    c = jax.lax.dot_general(z1n, z2n, (((0,), (0,)), ((), ())),
                            preferred_element_type=jnp.float32) * inv_batch
    # TODO(synk): torch.distributed.all_reduce(c) omitted (single-device kernel).

    # Diagonal computed directly -- no (D,D) iota/eye mask materialized.
    diag = jnp.sum(z1n * z2n, axis=0, keepdims=True) * inv_batch       # [1, D]
    on_diag = jnp.sum((diag - 1.0) ** 2, keepdims=True)                # (1, 1)
    off_diag = jnp.sum(c * c, keepdims=True) - jnp.sum(diag * diag, keepdims=True)
    o_ref[...] = on_diag + lambd * off_diag


def barlow_twins_forward(params, y1, lang_ids, act_ids, cfg):
    b = y1.shape[0]
    img = y1.reshape(b, -1).astype(jnp.float32)                  # [B, C*H*W]

    # Embedding gathers left to XLA (data-dependent gather).
    lang = jnp.take(params["lang_emb"], lang_ids, axis=0)        # [B, Ll, D]
    act = jnp.take(params["act_emb"], act_ids, axis=0)           # [B, La, D]
    la = jnp.concatenate([lang, act], axis=1)                    # cat on seq dim
    _, seq_len, d = la.shape
    la2d = la.reshape(b * seq_len, d)                            # lane-dense LN tile

    # Static pooling matrix: pool[i, j] = 1/L if row j belongs to batch i.
    pool = jnp.repeat(jnp.eye(b, dtype=jnp.float32), seq_len, axis=1) / float(seq_len)

    d1 = params["bn1_g"].shape[0]
    d2 = params["bn2_g"].shape[0]
    d_out = params["proj_w3"].shape[1]
    n_feat = params["vis_w"].shape[1]

    cost = pl.CostEstimate(
        flops=(2 * b * (img.shape[1] * n_feat + d * n_feat)
               + 2 * 2 * b * (n_feat * d1 + d1 * d2 + d2 * d_out)
               + 2 * b * d_out * d_out),
        transcendentals=0,
        bytes_accessed=(img.size * 4 + la2d.size * 4 + pool.size * 4
                        + 2 * (params["vis_w"].size + params["la_w"].size
                               + params["proj_w1"].size + params["proj_w2"].size
                               + params["proj_w3"].size) + 4),
    )

    kernel = functools.partial(
        _fused_barlow_kernel,
        ln_eps=float(cfg["layer_norm_eps"]),
        bn_eps=1e-5,
        inv_batch=1.0 / float(b),        # derived from actual row count
        lambd=float(cfg["lambd"]),
        batch=b,
    )

    out = pl.pallas_call(
        kernel,
        out_shape=jax.ShapeDtypeStruct((1, 1), jnp.float32),
        in_specs=[VMEM_SPEC] * 14,
        out_specs=VMEM_SPEC,
        compiler_params=pltpu.CompilerParams(vmem_limit_bytes=16 * 1024 * 1024),
        cost_estimate=cost,
    )(img, la2d, pool,
      params["vis_w"],
      params["ln_w"].reshape(1, d), params["ln_b"].reshape(1, d),
      params["la_w"],
      params["proj_w1"], params["bn1_g"].reshape(1, d1), params["bn1_b"].reshape(1, d1),
      params["proj_w2"], params["bn2_g"].reshape(1, d2), params["bn2_b"].reshape(1, d2),
      params["proj_w3"])
    return out[0, 0]


# ----------------------------------------------------------------------------
# Parameter init (matmul weights pre-cast to bf16; BN/LN params stay f32).
# ----------------------------------------------------------------------------
def init_params(key, cfg):
    ks = jax.random.split(key, 8)
    d_img = cfg["C"] * cfg["H"] * cfg["W"]
    d_la = cfg["language_hidden_dim"]          # == action_hidden_dim
    s = cfg["projector_sizes"]                 # [2048, 64, 64, 32]

    def w(k, fan_in, fan_out):
        return (jax.random.normal(k, (fan_in, fan_out), jnp.float32)
                / jnp.sqrt(jnp.float32(fan_in))).astype(jnp.bfloat16)

    return {
        # TODO(synk): ResNet50 replaced by flatten + linear stand-in (2048-d).
        "vis_w": w(ks[0], d_img, s[0]),
        "lang_emb": 0.02 * jax.random.normal(
            ks[1], (cfg["language_vocab_size"], d_la), jnp.float32),
        "act_emb": 0.02 * jax.random.normal(
            ks[2], (cfg["action_vocab_size"], d_la), jnp.float32),
        "ln_w": jnp.ones((d_la,), jnp.float32),
        "ln_b": jnp.zeros((d_la,), jnp.float32),
        "la_w": w(ks[3], d_la, s[0]),
        "proj_w1": w(ks[4], s[0], s[1]),
        "bn1_g": jnp.ones((s[1],), jnp.float32),
        "bn1_b": jnp.zeros((s[1],), jnp.float32),
        "proj_w2": w(ks[5], s[1], s[2]),
        "bn2_g": jnp.ones((s[2],), jnp.float32),
        "bn2_b": jnp.zeros((s[2],), jnp.float32),
        "proj_w3": w(ks[6], s[2], s[3]),
    }


# ----------------------------------------------------------------------------
if __name__ == "__main__":
    cfg = {
        "B": 2, "C": 3, "H": 16, "W": 16,
        "language_vocab_size": 100,
        "action_vocab_size": 50,
        "language_hidden_dim": 16,            # == action_hidden_dim
        "layer_norm_eps": 1e-6,
        "projector_sizes": [2048, 64, 64, 32],  # args.projector = "64-64-32"
        "batch_size": 2,
        "lambd": 0.0051,
    }

    key = jax.random.PRNGKey(0)
    k_param, k_img, k_lang, k_act = jax.random.split(key, 4)

    params = init_params(k_param, cfg)
    y1 = jax.random.normal(k_img, (cfg["B"], cfg["C"], cfg["H"], cfg["W"]),
                           jnp.float32)
    lang_ids = jax.random.randint(k_lang, (cfg["B"], 6), 0,
                                  cfg["language_vocab_size"], jnp.int32)
    act_ids = jax.random.randint(k_act, (cfg["B"], 4), 0,
                                 cfg["action_vocab_size"], jnp.int32)

    loss = jax.jit(
        functools.partial(barlow_twins_forward, cfg=cfg)
    )(params, y1, lang_ids, act_ids)
    jax.block_until_ready(loss)
    assert loss.shape == () and jnp.isfinite(loss)
    print("KERNEL_OK")
</pallas_src>

<mosaic_0001>
module attributes {stable_mosaic.version = 11 : i64} {
  func.func @_fused_barlow_kernel(%arg0: memref<2x768xf32, #tpu.memory_space<vmem>>, %arg1: memref<20x16xf32, #tpu.memory_space<vmem>>, %arg2: memref<2x20xf32, #tpu.memory_space<vmem>>, %arg3: memref<768x2048xbf16, #tpu.memory_space<vmem>>, %arg4: memref<1x16xf32, #tpu.memory_space<vmem>>, %arg5: memref<1x16xf32, #tpu.memory_space<vmem>>, %arg6: memref<16x2048xbf16, #tpu.memory_space<vmem>>, %arg7: memref<2048x64xbf16, #tpu.memory_space<vmem>>, %arg8: memref<1x64xf32, #tpu.memory_space<vmem>>, %arg9: memref<1x64xf32, #tpu.memory_space<vmem>>, %arg10: memref<64x64xbf16, #tpu.memory_space<vmem>>, %arg11: memref<1x64xf32, #tpu.memory_space<vmem>>, %arg12: memref<1x64xf32, #tpu.memory_space<vmem>>, %arg13: memref<64x32xbf16, #tpu.memory_space<vmem>>, %arg14: memref<1x1xf32, #tpu.memory_space<vmem>>) attributes {dimension_semantics = [], scalar_prefetch = 0 : i64, scratch_operands = 0 : i64, tpu.core_type = #tpu.core_type<tc>} {
    %c0 = arith.constant 0 : index
    %c0_0 = arith.constant 0 : index
    %0 = vector.load %arg0[%c0, %c0_0] : memref<2x768xf32, #tpu.memory_space<vmem>>, vector<2x768xf32>
    %1 = arith.truncf %0 : vector<2x768xf32> to vector<2x768xbf16>
    %c0_1 = arith.constant 0 : index
    %c0_2 = arith.constant 0 : index
    %2 = vector.load %arg3[%c0_1, %c0_2] : memref<768x2048xbf16, #tpu.memory_space<vmem>>, vector<768x2048xbf16>
    %cst = arith.constant dense<0.000000e+00> : vector<2x2048xf32>
    %3 = tpu.matmul %1, %2, %cst {dimension_numbers = #tpu.dot_dimension_numbers<[1], [0], [0], [1], [0, 0, 1, 1], [], []>} : vector<2x768xbf16>, vector<768x2048xbf16>, vector<2x2048xf32> -> vector<2x2048xf32>
    %c0_3 = arith.constant 0 : index
    %c0_4 = arith.constant 0 : index
    %4 = vector.load %arg1[%c0_3, %c0_4] : memref<20x16xf32, #tpu.memory_space<vmem>>, vector<20x16xf32>
    %cst_5 = arith.constant dense<0.000000e+00> : vector<20xf32>
    %5 = vector.multi_reduction <add>, %4, %cst_5 [1] : vector<20x16xf32> to vector<20xf32>
    %6 = vector.shape_cast %5 : vector<20xf32> to vector<20x1xf32>
    %cst_6 = arith.constant 1.600000e+01 : f32
    %7 = vector.broadcast %cst_6 : f32 to vector<20x1xf32>
    %8 = arith.divf %6, %7 : vector<20x1xf32>
    %9 = vector.broadcast %8 : vector<20x1xf32> to vector<20x16xf32>
    %10 = arith.subf %4, %9 : vector<20x16xf32>
    %11 = arith.mulf %10, %10 : vector<20x16xf32>
    %cst_7 = arith.constant dense<0.000000e+00> : vector<20xf32>
    %12 = vector.multi_reduction <add>, %11, %cst_7 [1] : vector<20x16xf32> to vector<20xf32>
    %13 = vector.shape_cast %12 : vector<20xf32> to vector<20x1xf32>
    %cst_8 = arith.constant 1.600000e+01 : f32
    %14 = vector.broadcast %cst_8 : f32 to vector<20x1xf32>
    %15 = arith.divf %13, %14 : vector<20x1xf32>
    %16 = vector.broadcast %8 : vector<20x1xf32> to vector<20x16xf32>
    %17 = arith.subf %4, %16 : vector<20x16xf32>
    %cst_9 = arith.constant 9.99999997E-7 : f32
    %18 = vector.broadcast %cst_9 : f32 to vector<20x1xf32>
    %19 = arith.addf %15, %18 : vector<20x1xf32>
    %20 = math.rsqrt %19 : vector<20x1xf32>
    %21 = vector.broadcast %20 : vector<20x1xf32> to vector<20x16xf32>
    %22 = arith.mulf %17, %21 : vector<20x16xf32>
    %c0_10 = arith.constant 0 : index
    %c0_11 = arith.constant 0 : index
    %23 = vector.load %arg4[%c0_10, %c0_11] : memref<1x16xf32, #tpu.memory_space<vmem>>, vector<1x16xf32>
    %24 = vector.broadcast %23 : vector<1x16xf32> to vector<20x16xf32>
    %25 = arith.mulf %22, %24 : vector<20x16xf32>
    %c0_12 = arith.constant 0 : index
    %c0_13 = arith.constant 0 : index
    %26 = vector.load %arg5[%c0_12, %c0_13] : memref<1x16xf32, #tpu.memory_space<vmem>>, vector<1x16xf32>
    %27 = vector.broadcast %26 : vector<1x16xf32> to vector<20x16xf32>
    %28 = arith.addf %25, %27 : vector<20x16xf32>
    %c0_14 = arith.constant 0 : index
    %c0_15 = arith.constant 0 : index
    %29 = vector.load %arg2[%c0_14, %c0_15] : memref<2x20xf32, #tpu.memory_space<vmem>>, vector<2x20xf32>
    %cst_16 = arith.constant dense<0.000000e+00> : vector<2x16xf32>
    %30 = tpu.matmul %29, %28, %cst_16 {dimension_numbers = #tpu.dot_dimension_numbers<[1], [0], [0], [1], [0, 0, 1, 1], [], []>} : vector<2x20xf32>, vector<20x16xf32>, vector<2x16xf32> -> vector<2x16xf32>
    %31 = arith.truncf %30 : vector<2x16xf32> to vector<2x16xbf16>
    %c0_17 = arith.constant 0 : index
    %c0_18 = arith.constant 0 : index
    %32 = vector.load %arg6[%c0_17, %c0_18] : memref<16x2048xbf16, #tpu.memory_space<vmem>>, vector<16x2048xbf16>
    %cst_19 = arith.constant dense<0.000000e+00> : vector<2x2048xf32>
    %33 = tpu.matmul %31, %32, %cst_19 {dimension_numbers = #tpu.dot_dimension_numbers<[1], [0], [0], [1], [0, 0, 1, 1], [], []>} : vector<2x16xbf16>, vector<16x2048xbf16>, vector<2x2048xf32> -> vector<2x2048xf32>
    %34 = tpu.concatenate %3, %33 in 0 : vector<2x2048xf32>, vector<2x2048xf32> -> vector<4x2048xf32>
    %35 = arith.truncf %34 : vector<4x2048xf32> to vector<4x2048xbf16>
    %c0_20 = arith.constant 0 : index
    %c0_21 = arith.constant 0 : index
    %36 = vector.load %arg7[%c0_20, %c0_21] : memref<2048x64xbf16, #tpu.memory_space<vmem>>, vector<2048x64xbf16>
    %cst_22 = arith.constant dense<0.000000e+00> : vector<4x64xf32>
    %37 = tpu.matmul %35, %36, %cst_22 {dimension_numbers = #tpu.dot_dimension_numbers<[1], [0], [0], [1], [0, 0, 1, 1], [], []>} : vector<4x2048xbf16>, vector<2048x64xbf16>, vector<4x64xf32> -> vector<4x64xf32>
    %38 = vector.extract_strided_slice %37 {offsets = [0, 0], sizes = [2, 64], strides = [1, 1]} : vector<4x64xf32> to vector<2x64xf32>
    %cst_23 = arith.constant dense<0.000000e+00> : vector<64xf32>
    %39 = vector.multi_reduction <add>, %38, %cst_23 [0] : vector<2x64xf32> to vector<64xf32>
    %40 = vector.shape_cast %39 : vector<64xf32> to vector<1x64xf32>
    %cst_24 = arith.constant 2.000000e+00 : f32
    %41 = vector.broadcast %cst_24 : f32 to vector<1x64xf32>
    %42 = arith.divf %40, %41 : vector<1x64xf32>
    %43 = vector.broadcast %42 : vector<1x64xf32> to vector<2x64xf32>
    %44 = arith.subf %38, %43 : vector<2x64xf32>
    %45 = arith.mulf %44, %44 : vector<2x64xf32>
    %cst_25 = arith.constant dense<0.000000e+00> : vector<64xf32>
    %46 = vector.multi_reduction <add>, %45, %cst_25 [0] : vector<2x64xf32> to vector<64xf32>
    %47 = vector.shape_cast %46 : vector<64xf32> to vector<1x64xf32>
    %cst_26 = arith.constant 2.000000e+00 : f32
    %48 = vector.broadcast %cst_26 : f32 to vector<1x64xf32>
    %49 = arith.divf %47, %48 : vector<1x64xf32>
    %50 = vector.broadcast %42 : vector<1x64xf32> to vector<2x64xf32>
    %51 = arith.subf %38, %50 : vector<2x64xf32>
    %cst_27 = arith.constant 9.99999974E-6 : f32
    %52 = vector.broadcast %cst_27 : f32 to vector<1x64xf32>
    %53 = arith.addf %49, %52 : vector<1x64xf32>
    %54 = math.rsqrt %53 : vector<1x64xf32>
    %55 = vector.broadcast %54 : vector<1x64xf32> to vector<2x64xf32>
    %56 = arith.mulf %51, %55 : vector<2x64xf32>
    %57 = vector.extract_strided_slice %37 {offsets = [2, 0], sizes = [2, 64], strides = [1, 1]} : vector<4x64xf32> to vector<2x64xf32>
    %cst_28 = arith.constant dense<0.000000e+00> : vector<64xf32>
    %58 = vector.multi_reduction <add>, %57, %cst_28 [0] : vector<2x64xf32> to vector<64xf32>
    %59 = vector.shape_cast %58 : vector<64xf32> to vector<1x64xf32>
    %cst_29 = arith.constant 2.000000e+00 : f32
    %60 = vector.broadcast %cst_29 : f32 to vector<1x64xf32>
    %61 = arith.divf %59, %60 : vector<1x64xf32>
    %62 = vector.broadcast %61 : vector<1x64xf32> to vector<2x64xf32>
    %63 = arith.subf %57, %62 : vector<2x64xf32>
    %64 = arith.mulf %63, %63 : vector<2x64xf32>
    %cst_30 = arith.constant dense<0.000000e+00> : vector<64xf32>
    %65 = vector.multi_reduction <add>, %64, %cst_30 [0] : vector<2x64xf32> to vector<64xf32>
    %66 = vector.shape_cast %65 : vector<64xf32> to vector<1x64xf32>
    %cst_31 = arith.constant 2.000000e+00 : f32
    %67 = vector.broadcast %cst_31 : f32 to vector<1x64xf32>
    %68 = arith.divf %66, %67 : vector<1x64xf32>
    %69 = vector.broadcast %61 : vector<1x64xf32> to vector<2x64xf32>
    %70 = arith.subf %57, %69 : vector<2x64xf32>
    %cst_32 = arith.constant 9.99999974E-6 : f32
    %71 = vector.broadcast %cst_32 : f32 to vector<1x64xf32>
    %72 = arith.addf %68, %71 : vector<1x64xf32>
    %73 = math.rsqrt %72 : vector<1x64xf32>
    %74 = vector.broadcast %73 : vector<1x64xf32> to vector<2x64xf32>
    %75 = arith.mulf %70, %74 : vector<2x64xf32>
    %76 = tpu.concatenate %56, %75 in 0 : vector<2x64xf32>, vector<2x64xf32> -> vector<4x64xf32>
    %c0_33 = arith.constant 0 : index
    %c0_34 = arith.constant 0 : index
    %77 = vector.load %arg8[%c0_33, %c0_34] : memref<1x64xf32, #tpu.memory_space<vmem>>, vector<1x64xf32>
    %78 = vector.broadcast %77 : vector<1x64xf32> to vector<4x64xf32>
    %79 = arith.mulf %76, %78 : vector<4x64xf32>
    %c0_35 = arith.constant 0 : index
    %c0_36 = arith.constant 0 : index
    %80 = vector.load %arg9[%c0_35, %c0_36] : memref<1x64xf32, #tpu.memory_space<vmem>>, vector<1x64xf32>
    %81 = vector.broadcast %80 : vector<1x64xf32> to vector<4x64xf32>
    %82 = arith.addf %79, %81 : vector<4x64xf32>
    %cst_37 = arith.constant 0.000000e+00 : f32
    %83 = vector.broadcast %cst_37 : f32 to vector<4x64xf32>
    %84 = arith.maximumf %82, %83 : vector<4x64xf32>
    %85 = arith.truncf %84 : vector<4x64xf32> to vector<4x64xbf16>
    %c0_38 = arith.constant 0 : index
    %c0_39 = arith.constant 0 : index
    %86 = vector.load %arg10[%c0_38, %c0_39] : memref<64x64xbf16, #tpu.memory_space<vmem>>, vector<64x64xbf16>
    %cst_40 = arith.constant dense<0.000000e+00> : vector<4x64xf32>
    %87 = tpu.matmul %85, %86, %cst_40 {dimension_numbers = #tpu.dot_dimension_numbers<[1], [0], [0], [1], [0, 0, 1, 1], [], []>} : vector<4x64xbf16>, vector<64x64xbf16>, vector<4x64xf32> -> vector<4x64xf32>
    %88 = vector.extract_strided_slice %87 {offsets = [0, 0], sizes = [2, 64], strides = [1, 1]} : vector<4x64xf32> to vector<2x64xf32>
    %cst_41 = arith.constant dense<0.000000e+00> : vector<64xf32>
    %89 = vector.multi_reduction <add>, %88, %cst_41 [0] : vector<2x64xf32> to vector<64xf32>
    %90 = vector.shape_cast %89 : vector<64xf32> to vector<1x64xf32>
    %cst_42 = arith.constant 2.000000e+00 : f32
    %91 = vector.broadcast %cst_42 : f32 to vector<1x64xf32>
    %92 = arith.divf %90, %91 : vector<1x64xf32>
    %93 = vector.broadcast %92 : vector<1x64xf32> to vector<2x64xf32>
    %94 = arith.subf %88, %93 : vector<2x64xf32>
    %95 = arith.mulf %94, %94 : vector<2x64xf32>
    %cst_43 = arith.constant dense<0.000000e+00> : vector<64xf32>
    %96 = vector.multi_reduction <add>, %95, %cst_43 [0] : vector<2x64xf32> to vector<64xf32>
    %97 = vector.shape_cast %96 : vector<64xf32> to vector<1x64xf32>
    %cst_44 = arith.constant 2.000000e+00 : f32
    %98 = vector.broadcast %cst_44 : f32 to vector<1x64xf32>
    %99 = arith.divf %97, %98 : vector<1x64xf32>
    %100 = vector.broadcast %92 : vector<1x64xf32> to vector<2x64xf32>
    %101 = arith.subf %88, %100 : vector<2x64xf32>
    %cst_45 = arith.constant 9.99999974E-6 : f32
    %102 = vector.broadcast %cst_45 : f32 to vector<1x64xf32>
    %103 = arith.addf %99, %102 : vector<1x64xf32>
    %104 = math.rsqrt %103 : vector<1x64xf32>
    %105 = vector.broadcast %104 : vector<1x64xf32> to vector<2x64xf32>
    %106 = arith.mulf %101, %105 : vector<2x64xf32>
    %107 = vector.extract_strided_slice %87 {offsets = [2, 0], sizes = [2, 64], strides = [1, 1]} : vector<4x64xf32> to vector<2x64xf32>
    %cst_46 = arith.constant dense<0.000000e+00> : vector<64xf32>
    %108 = vector.multi_reduction <add>, %107, %cst_46 [0] : vector<2x64xf32> to vector<64xf32>
    %109 = vector.shape_cast %108 : vector<64xf32> to vector<1x64xf32>
    %cst_47 = arith.constant 2.000000e+00 : f32
    %110 = vector.broadcast %cst_47 : f32 to vector<1x64xf32>
    %111 = arith.divf %109, %110 : vector<1x64xf32>
    %112 = vector.broadcast %111 : vector<1x64xf32> to vector<2x64xf32>
    %113 = arith.subf %107, %112 : vector<2x64xf32>
    %114 = arith.mulf %113, %113 : vector<2x64xf32>
    %cst_48 = arith.constant dense<0.000000e+00> : vector<64xf32>
    %115 = vector.multi_reduction <add>, %114, %cst_48 [0] : vector<2x64xf32> to vector<64xf32>
    %116 = vector.shape_cast %115 : vector<64xf32> to vector<1x64xf32>
    %cst_49 = arith.constant 2.000000e+00 : f32
    %117 = vector.broadcast %cst_49 : f32 to vector<1x64xf32>
    %118 = arith.divf %116, %117 : vector<1x64xf32>
    %119 = vector.broadcast %111 : vector<1x64xf32> to vector<2x64xf32>
    %120 = arith.subf %107, %119 : vector<2x64xf32>
    %cst_50 = arith.constant 9.99999974E-6 : f32
    %121 = vector.broadcast %cst_50 : f32 to vector<1x64xf32>
    %122 = arith.addf %118, %121 : vector<1x64xf32>
    %123 = math.rsqrt %122 : vector<1x64xf32>
    %124 = vector.broadcast %123 : vector<1x64xf32> to vector<2x64xf32>
    %125 = arith.mulf %120, %124 : vector<2x64xf32>
    %126 = tpu.concatenate %106, %125 in 0 : vector<2x64xf32>, vector<2x64xf32> -> vector<4x64xf32>
    %c0_51 = arith.constant 0 : index
    %c0_52 = arith.constant 0 : index
    %127 = vector.load %arg11[%c0_51, %c0_52] : memref<1x64xf32, #tpu.memory_space<vmem>>, vector<1x64xf32>
    %128 = vector.broadcast %127 : vector<1x64xf32> to vector<4x64xf32>
    %129 = arith.mulf %126, %128 : vector<4x64xf32>
    %c0_53 = arith.constant 0 : index
    %c0_54 = arith.constant 0 : index
    %130 = vector.load %arg12[%c0_53, %c0_54] : memref<1x64xf32, #tpu.memory_space<vmem>>, vector<1x64xf32>
    %131 = vector.broadcast %130 : vector<1x64xf32> to vector<4x64xf32>
    %132 = arith.addf %129, %131 : vector<4x64xf32>
    %cst_55 = arith.constant 0.000000e+00 : f32
    %133 = vector.broadcast %cst_55 : f32 to vector<4x64xf32>
    %134 = arith.maximumf %132, %133 : vector<4x64xf32>
    %135 = arith.truncf %134 : vector<4x64xf32> to vector<4x64xbf16>
    %c0_56 = arith.constant 0 : index
    %c0_57 = arith.constant 0 : index
    %136 = vector.load %arg13[%c0_56, %c0_57] : memref<64x32xbf16, #tpu.memory_space<vmem>>, vector<64x32xbf16>
    %cst_58 = arith.constant dense<0.000000e+00> : vector<4x32xf32>
    %137 = tpu.matmul %135, %136, %cst_58 {dimension_numbers = #tpu.dot_dimension_numbers<[1], [0], [0], [1], [0, 0, 1, 1], [], []>} : vector<4x64xbf16>, vector<64x32xbf16>, vector<4x32xf32> -> vector<4x32xf32>
    %138 = vector.extract_strided_slice %137 {offsets = [0, 0], sizes = [2, 32], strides = [1, 1]} : vector<4x32xf32> to vector<2x32xf32>
    %cst_59 = arith.constant dense<0.000000e+00> : vector<32xf32>
    %139 = vector.multi_reduction <add>, %138, %cst_59 [0] : vector<2x32xf32> to vector<32xf32>
    %140 = vector.shape_cast %139 : vector<32xf32> to vector<1x32xf32>
    %cst_60 = arith.constant 2.000000e+00 : f32
    %141 = vector.broadcast %cst_60 : f32 to vector<1x32xf32>
    %142 = arith.divf %140, %141 : vector<1x32xf32>
    %143 = vector.broadcast %142 : vector<1x32xf32> to vector<2x32xf32>
    %144 = arith.subf %138, %143 : vector<2x32xf32>
    %145 = arith.mulf %144, %144 : vector<2x32xf32>
    %cst_61 = arith.constant dense<0.000000e+00> : vector<32xf32>
    %146 = vector.multi_reduction <add>, %145, %cst_61 [0] : vector<2x32xf32> to vector<32xf32>
    %147 = vector.shape_cast %146 : vector<32xf32> to vector<1x32xf32>
    %cst_62 = arith.constant 2.000000e+00 : f32
    %148 = vector.broadcast %cst_62 : f32 to vector<1x32xf32>
    %149 = arith.divf %147, %148 : vector<1x32xf32>
    %150 = vector.broadcast %142 : vector<1x32xf32> to vector<2x32xf32>
    %151 = arith.subf %138, %150 : vector<2x32xf32>
    %cst_63 = arith.constant 9.99999974E-6 : f32
    %152 = vector.broadcast %cst_63 : f32 to vector<1x32xf32>
    %153 = arith.addf %149, %152 : vector<1x32xf32>
    %154 = math.rsqrt %153 : vector<1x32xf32>
    %155 = vector.broadcast %154 : vector<1x32xf32> to vector<2x32xf32>
    %156 = arith.mulf %151, %155 : vector<2x32xf32>
    %157 = vector.extract_strided_slice %137 {offsets = [2, 0], sizes = [2, 32], strides = [1, 1]} : vector<4x32xf32> to vector<2x32xf32>
    %cst_64 = arith.constant dense<0.000000e+00> : vector<32xf32>
    %158 = vector.multi_reduction <add>, %157, %cst_64 [0] : vector<2x32xf32> to vector<32xf32>
    %159 = vector.shape_cast %158 : vector<32xf32> to vector<1x32xf32>
    %cst_65 = arith.constant 2.000000e+00 : f32
    %160 = vector.broadcast %cst_65 : f32 to vector<1x32xf32>
    %161 = arith.divf %159, %160 : vector<1x32xf32>
    %162 = vector.broadcast %161 : vector<1x32xf32> to vector<2x32xf32>
    %163 = arith.subf %157, %162 : vector<2x32xf32>
    %164 = arith.mulf %163, %163 : vector<2x32xf32>
    %cst_66 = arith.constant dense<0.000000e+00> : vector<32xf32>
    %165 = vector.multi_reduction <add>, %164, %cst_66 [0] : vector<2x32xf32> to vector<32xf32>
    %166 = vector.shape_cast %165 : vector<32xf32> to vector<1x32xf32>
    %cst_67 = arith.constant 2.000000e+00 : f32
    %167 = vector.broadcast %cst_67 : f32 to vector<1x32xf32>
    %168 = arith.divf %166, %167 : vector<1x32xf32>
    %169 = vector.broadcast %161 : vector<1x32xf32> to vector<2x32xf32>
    %170 = arith.subf %157, %169 : vector<2x32xf32>
    %cst_68 = arith.constant 9.99999974E-6 : f32
    %171 = vector.broadcast %cst_68 : f32 to vector<1x32xf32>
    %172 = arith.addf %168, %171 : vector<1x32xf32>
    %173 = math.rsqrt %172 : vector<1x32xf32>
    %174 = vector.broadcast %173 : vector<1x32xf32> to vector<2x32xf32>
    %175 = arith.mulf %170, %174 : vector<2x32xf32>
    %cst_69 = arith.constant dense<0.000000e+00> : vector<32x32xf32>
    %176 = tpu.matmul %156, %175, %cst_69 {dimension_numbers = #tpu.dot_dimension_numbers<[0], [0], [1], [1], [0, 1, 1, 1], [], []>} : vector<2x32xf32>, vector<2x32xf32>, vector<32x32xf32> -> vector<32x32xf32>
    %cst_70 = arith.constant 5.000000e-01 : f32
    %177 = vector.broadcast %cst_70 : f32 to vector<32x32xf32>
    %178 = arith.mulf %176, %177 : vector<32x32xf32>
    %179 = arith.mulf %156, %175 : vector<2x32xf32>
    %cst_71 = arith.constant dense<0.000000e+00> : vector<32xf32>
    %180 = vector.multi_reduction <add>, %179, %cst_71 [0] : vector<2x32xf32> to vector<32xf32>
    %181 = vector.shape_cast %180 : vector<32xf32> to vector<1x32xf32>
    %cst_72 = arith.constant 5.000000e-01 : f32
    %182 = vector.broadcast %cst_72 : f32 to vector<1x32xf32>
    %183 = arith.mulf %181, %182 : vector<1x32xf32>
    %cst_73 = arith.constant 1.000000e+00 : f32
    %184 = vector.broadcast %cst_73 : f32 to vector<1x32xf32>
    %185 = arith.subf %183, %184 : vector<1x32xf32>
    %186 = arith.mulf %185, %185 : vector<1x32xf32>
    %187 = vector.shape_cast %186 : vector<1x32xf32> to vector<1x1x32xf32>
    %cst_74 = arith.constant dense<0.000000e+00> : vector<1xf32>
    %188 = vector.multi_reduction <add>, %187, %cst_74 [1, 2] : vector<1x1x32xf32> to vector<1xf32>
    %189 = vector.shape_cast %188 : vector<1xf32> to vector<1x1x1xf32>
    %190 = vector.extract %189[0, 0, 0] : f32 from vector<1x1x1xf32>
    %191 = vector.broadcast %190 : f32 to vector<1x1xf32>
    %192 = arith.mulf %178, %178 : vector<32x32xf32>
    %193 = vector.shape_cast %192 : vector<32x32xf32> to vector<1x32x32xf32>
    %cst_75 = arith.constant dense<0.000000e+00> : vector<1xf32>
    %194 = vector.multi_reduction <add>, %193, %cst_75 [1, 2] : vector<1x32x32xf32> to vector<1xf32>
    %195 = vector.shape_cast %194 : vector<1xf32> to vector<1x1x1xf32>
    %196 = vector.extract %195[0, 0, 0] : f32 from vector<1x1x1xf32>
    %197 = vector.broadcast %196 : f32 to vector<1x1xf32>
    %198 = arith.mulf %183, %183 : vector<1x32xf32>
    %199 = vector.shape_cast %198 : vector<1x32xf32> to vector<1x1x32xf32>
    %cst_76 = arith.constant dense<0.000000e+00> : vector<1xf32>
    %200 = vector.multi_reduction <add>, %199, %cst_76 [1, 2] : vector<1x1x32xf32> to vector<1xf32>
    %201 = vector.shape_cast %200 : vector<1xf32> to vector<1x1x1xf32>
    %202 = vector.extract %201[0, 0, 0] : f32 from vector<1x1x1xf32>
    %203 = vector.broadcast %202 : f32 to vector<1x1xf32>
    %204 = arith.subf %197, %203 : vector<1x1xf32>
    %cst_77 = arith.constant 5.100000e-03 : f32
    %205 = vector.broadcast %cst_77 : f32 to vector<1x1xf32>
    %206 = arith.mulf %205, %204 : vector<1x1xf32>
    %207 = arith.addf %191, %206 : vector<1x1xf32>
    %c0_78 = arith.constant 0 : index
    %c0_79 = arith.constant 0 : index
    %208 = vector.load %arg14[%c0_78, %c0_79] : memref<1x1xf32, #tpu.memory_space<vmem>>, vector<1x1xf32>
    tpu.vector_store %arg14[%c0_78, %c0_79], %207 {strides = array<i32>} : memref<1x1xf32, #tpu.memory_space<vmem>>, vector<1x1xf32>,
    return
  }
}

</mosaic_0001>

<bundles_post_ra>
// kernel: barlow_twins_forward.1
= control target key start
LH: loop header
LB: loop body
LE: loop exit
PB: predicated region body
PF: predicated region fallthrough
CT: control target
= control target key end

     0   :  { %19 = vsyncpa [#allocation3], 0  ;;  %s10755_s0 = inlined_call_operand.vmem [shape: f32[2,768], index: 0, kind: input, shape index: {}]   ;;  %s10756_s1 = inlined_call_operand.vmem [shape: f32[20,16], index: 1, kind: input, shape index: {}]   ;;  %s10757_s2 = inlined_call_operand.vmem [shape: f32[2,20], index: 2, kind: input, shape index: {}]   ;;  %s10758_s3 = inlined_call_operand.hbm [shape: bf16[768,2048], index: 3, kind: input, shape index: {}]   ;;  %s10759_s4 = inlined_call_operand.hbm [shape: f32[1,16], index: 4, kind: input, shape index: {}]   ;;  %s10760_s5 = inlined_call_operand.hbm [shape: f32[1,16], index: 5, kind: input, shape index: {}]   ;;  %s10761_s6 = inlined_call_operand.hbm [shape: bf16[16,2048], index: 6, kind: input, shape index: {}]   ;;  %s10762_s7 = inlined_call_operand.vmem [shape: bf16[2048,64], index: 7, kind: input, shape index: {}]   ;;  %s10763_s8 = inlined_call_operand.hbm [shape: f32[1,64], index: 8, kind: input, shape index: {}]   ;;  %s10764_s9 = inlined_call_operand.hbm [shape: f32[1,64], index: 9, kind: input, shape index: {}]   ;;  %s10765_s10 = inlined_call_operand.hbm [shape: bf16[64,64], index: 10, kind: input, shape index: {}]   ;;  %s10766_s11 = inlined_call_operand.hbm [shape: f32[1,64], index: 11, kind: input, shape index: {}]   ;;  %s10767_s12 = inlined_call_operand.hbm [shape: f32[1,64], index: 12, kind: input, shape index: {}]   ;;  %s10768_s13 = inlined_call_operand.vmem [shape: bf16[64,32], index: 13, kind: input, shape index: {}]   ;;  %s10769_s14 = inlined_call_operand.hbm [shape: f32[1,1], index: 14, kind: output, shape index: {}]  }
   0x1   :  { %20 = vsyncpa [#allocation6], 0 }
   0x2   :  { %21 = vsyncpa [#allocation9], 0 }
   0x3   :  { %22 = vsyncpa [#allocation12], 0 }
   0x4   :  { %23 = vsyncpa [#allocation15], 0 }
   0x5   :  { %24 = vsyncpa [#allocation4], 0  ;;  %s9916_s29 = smov [#allocation5]  }
   0x6   :  { %s49_s30 = sshll.u32 %s9916_s29, 4  ;;  %s50_s30 = int_to_ptr.vmem [resolvable:$true] %s49_s30 }
   0x7   :  { %s9712_s15 = scalar_lea.vmem %s50_s30, 16  ;;  %s9716_s16 = scalar_lea.vmem %s50_s30, 32 }
   0x8   :  { %p9713_p0 = scmp.ne.s32.totalorder %s50_s30, %s9712_s15  ;;  %p9717_p1 = scmp.lt.s32.totalorder %s50_s30, %s50_s30 }
   0x9   :  { %p9718_p2 = scmp.lt.s32.totalorder %s9716_s16, %s9712_s15 }
   0xb   :  { %p9719_p3 = por %p9718_p2, %p9717_p1 }
   0xd   :  { %p9720_p4 = pnand %p9719_p3, %p9713_p0 }
   0xf   :  { %9723 = shalt.err (!%p9720_p4)
}
  0x10   :  { %52 = dma.hbm_to_vmem [thread:$0]  %s10759_s4, 16, %s50_s30, [#allocation6]  }
  0x11   :  { %s9917_s19 = smov [#allocation8]   ;;  %s9918_s21 = smov [#allocation11]  }
  0x12   :  { %s68_s20 = sshll.u32 %s9917_s19, 4  ;;  %s93_s22 = sshll.u32 %s9918_s21, 4  ;;  %s69_s20 = int_to_ptr.vmem [resolvable:$true] %s68_s20  ;;  %s94_s22 = int_to_ptr.vmem [resolvable:$true] %s93_s22 }
  0x13   :  { %s9732_s23 = scalar_lea.vmem %s69_s20, 2048  ;;  %p9737_p6 = scmp.lt.s32.totalorder %s69_s20, %s69_s20 }
  0x14   :  { %p9733_p5 = scmp.ne.s32.totalorder %s69_s20, %s9732_s23  ;;  %p9738_p7 = scmp.lt.s32.totalorder %s9732_s23, %s9732_s23 }
  0x16   :  { %p9739_p8 = por %p9738_p7, %p9737_p6 }
  0x18   :  { %p9740_p9 = pnand %p9739_p8, %p9733_p5 }
  0x1a   :  { %9743 = shalt.err (!%p9740_p9)
}
  0x1b   :  { %s9919_s24 = smov 1024   ;;  %s9920_s25 = smov 64  }
  0x1c   :  { %74 = dma.hbm_to_vmem [thread:$0]  %s10761_s6, 2048, %s69_s20, [#allocation9], %s9919_s24, %s9919_s24, %s9920_s25  }
  0x1d   :  { %s9752_s4 = scalar_lea.vmem %s94_s22, 16  ;;  %s9756_s28 = scalar_lea.vmem %s94_s22, 32 }
  0x1e   :  { %p9753_p10 = scmp.ne.s32.totalorder %s94_s22, %s9752_s4  ;;  %p9757_p11 = scmp.lt.s32.totalorder %s94_s22, %s94_s22 }
  0x1f   :  { %p9758_p12 = scmp.lt.s32.totalorder %s9756_s28, %s9752_s4 }
  0x21   :  { %p9759_p13 = por %p9758_p12, %p9757_p11 }
  0x23   :  { %p9760_p0 = pnand %p9759_p13, %p9753_p10 }
  0x25   :  { %9763 = shalt.err (!%p9760_p0)
}
  0x26   :  { %96 = dma.hbm_to_vmem [thread:$0]  %s10764_s9, 16, %s94_s22, [#allocation12]  }
  0x27   :  { %s9921_s15 = smov [#allocation14]   ;;  %s9922_s17 = smov [#allocation2]  }
  0x28   :  { %s115_s16 = sshll.u32 %s9921_s15, 4  ;;  %s36_s18 = sshll.u32 %s9922_s17, 4  ;;  %s116_s16 = int_to_ptr.vmem [resolvable:$true] %s115_s16  ;;  %s37_s18 = int_to_ptr.vmem [resolvable:$true] %s36_s18 }
  0x29   :  { %s9772_s19 = scalar_lea.vmem %s116_s16, 16  ;;  %s9776_s6 = scalar_lea.vmem %s116_s16, 32 }
  0x2a   :  { %p9773_p1 = scmp.ne.s32.totalorder %s116_s16, %s9772_s19  ;;  %p9777_p2 = scmp.lt.s32.totalorder %s116_s16, %s116_s16 }
  0x2b   :  { %p9778_p3 = scmp.lt.s32.totalorder %s9776_s6, %s9772_s19 }
  0x2d   :  { %p9779_p4 = por %p9778_p3, %p9777_p2 }
  0x2f   :  { %p9780_p5 = pnand %p9779_p4, %p9773_p1 }
  0x31   :  { %9783 = shalt.err (!%p9780_p5)
}
  0x32   :  { %118 = dma.hbm_to_vmem [thread:$0]  %s10766_s11, 16, %s116_s16, [#allocation15]  }
  0x33   :  { %s9792_s23 = scalar_lea.vmem %s37_s18, 98304  ;;  %p9797_p7 = scmp.lt.s32.totalorder %s37_s18, %s37_s18 }
  0x34   :  { %p9793_p6 = scmp.ne.s32.totalorder %s37_s18, %s9792_s23  ;;  %p9798_p8 = scmp.lt.s32.totalorder %s9792_s23, %s9792_s23 }
  0x36   :  { %p9799_p9 = por %p9798_p8, %p9797_p7 }
  0x38   :  { %p9800_p10 = pnand %p9799_p9, %p9793_p6 }
  0x3a   :  { %9803 = shalt.err (!%p9800_p10)
}
  0x3b   :  { %42 = dma.hbm_to_vmem [thread:$0]  %s10758_s3, 98304, %s37_s18, [#allocation3], %s9919_s24, %s9919_s24, %s9920_s25  }
  0x3c   :  { %s9923_s26 = smov [#allocation7]   ;;  %s9924_s4 = smov [#allocation10]  }
  0x3d   :  { %s59_s27 = sshll.u32 %s9923_s26, 4  ;;  %s83_s11 = sshll.u32 %s9924_s4, 4  ;;  %s60_s27 = int_to_ptr.vmem [resolvable:$true] %s59_s27  ;;  %s84_s11 = int_to_ptr.vmem [resolvable:$true] %s83_s11 }
  0x3e   :  { %s9812_s28 = scalar_lea.vmem %s60_s27, 16  ;;  %s9816_s29 = scalar_lea.vmem %s60_s27, 32 }
  0x3f   :  { %p9813_p11 = scmp.ne.s32.totalorder %s60_s27, %s9812_s28  ;;  %p9817_p12 = scmp.lt.s32.totalorder %s60_s27, %s60_s27 }
  0x40   :  { %p9818_p13 = scmp.lt.s32.totalorder %s9816_s29, %s9812_s28 }
  0x42   :  { %p9819_p0 = por %p9818_p13, %p9817_p12 }
  0x44   :  { %p9820_p1 = pnand %p9819_p0, %p9813_p11 }
  0x46   :  { %9823 = shalt.err (!%p9820_p1)
}
  0x47   :  { %62 = dma.hbm_to_vmem [thread:$0]  %s10760_s5, 16, %s60_s27, [#allocation6]  }
  0x48   :  { %s9832_s16 = scalar_lea.vmem %s84_s11, 16  ;;  %s9836_s3 = scalar_lea.vmem %s84_s11, 32 }
  0x49   :  { %p9833_p2 = scmp.ne.s32.totalorder %s84_s11, %s9832_s16  ;;  %p9837_p3 = scmp.lt.s32.totalorder %s84_s11, %s84_s11 }
  0x4a   :  { %p9838_p4 = scmp.lt.s32.totalorder %s9836_s3, %s9832_s16 }
  0x4c   :  { %p9839_p5 = por %p9838_p4, %p9837_p3 }
  0x4e   :  { %p9840_p6 = pnand %p9839_p5, %p9833_p2 }
  0x50   :  { %9843 = shalt.err (!%p9840_p6)
}
  0x51   :  { %86 = dma.hbm_to_vmem [thread:$0]  %s10763_s8, 16, %s84_s11, [#allocation9]  }
  0x52   :  { %s9925_s18 = smov [#allocation13]  }
  0x53   :  { %s102_s19 = sshll.u32 %s9925_s18, 4  ;;  %s103_s19 = int_to_ptr.vmem [resolvable:$true] %s102_s19 }
  0x54   :  { %s9852_s6 = scalar_lea.vmem %s103_s19, 512  ;;  %p9857_p8 = scmp.lt.s32.totalorder %s103_s19, %s103_s19 }
  0x55   :  { %p9853_p7 = scmp.ne.s32.totalorder %s103_s19, %s9852_s6  ;;  %p9858_p9 = scmp.lt.s32.totalorder %s9852_s6, %s9852_s6 }
  0x57   :  { %p9859_p10 = por %p9858_p9, %p9857_p8 }
  0x59   :  { %p9860_p11 = pnand %p9859_p10, %p9853_p7 }
  0x5b   :  { %9863 = shalt.err (!%p9860_p11)
}
  0x5c   :  { %s9926_s5 = smov 4   ;;  %s9927_s23 = smov [#allocation16]  }
  0x5d   :  { %108 = dma.hbm_to_vmem [thread:$0]  %s10765_s10, 512, %s103_s19, [#allocation12], %s9920_s25, %s9920_s25, %s9926_s5  }
  0x5e   :  { %s125_s9 = sshll.u32 %s9927_s23, 4  ;;  %s126_s9 = int_to_ptr.vmem [resolvable:$true] %s125_s9 }
  0x5f   :  { %s9872_s8 = scalar_lea.vmem %s126_s9, 16  ;;  %s9876_s22 = scalar_lea.vmem %s126_s9, 32 }
  0x60   :  { %p9873_p12 = scmp.ne.s32.totalorder %s126_s9, %s9872_s8  ;;  %p9877_p13 = scmp.lt.s32.totalorder %s126_s9, %s126_s9 }
  0x61   :  { %p9878_p0 = scmp.lt.s32.totalorder %s9876_s22, %s9872_s8 }
  0x63   :  { %p9879_p1 = por %p9878_p0, %p9877_p13 }
  0x65   :  { %p9880_p2 = pnand %p9879_p1, %p9873_p12 }
  0x67   :  { %9883 = shalt.err (!%p9880_p2)
}
  0x68   :  { %128 = dma.hbm_to_vmem [thread:$0]  %s10767_s12, 16, %s126_s9, [#allocation15]  }
  0x69   :  { %9904 = dma.done.wait [#allocation3], 98304  }
  0x6a   :  { %9905 = vsyncadd [#allocation3], 4294868992 }
  0x6b   :  { %9906 = dma.done.wait [#allocation6], 32  }
  0x6c   :  { %9907 = vsyncadd [#allocation6], 4294967264 }
  0x6d   :  { %9908 = dma.done.wait [#allocation9], 2064  }
  0x6e   :  { %9909 = vsyncadd [#allocation9], 4294965232 }
  0x6f   :  { %9910 = dma.done.wait [#allocation12], 528  }
  0x70   :  { %9911 = vsyncadd [#allocation12], 4294966768 }
  0x71   :  { %9912 = dma.done.wait [#allocation15], 32  }
  0x72   :  { %9913 = vsyncadd [#allocation15], 4294967264  ;;  %v312_v0 = vld [vmem:[#allocation2 + $0x380] sm:$0xff]  ;;  %v9928_v32 = vmov 1983009808   ;;  %v167_v34 = vlaneseq  ;;  %vm5802_vm0 = vcmask 125952  }
  0x73   :  { %v320_v1 = vld [vmem:[#allocation2 + $0x3c0] sm:$0xff]  ;;  %v165_v33 = vunpack.c.l.s4 %v9928_v32  ;;  %vm5795_vm1 = vcmask 130048   ;;  %vm5862_vm2 = vcmask 1043456   ;;  %vm9930_vm3 = vmmov 0   ;;  %s9932_s22 = smov [#allocation17]  }
  0x74   :  { %v568_v2 = vld [vmem:[#allocation2 + $0xb80] sm:$0xff]  ;;  %v8459_v3 = vcombine.high %v312_v0, %v320_v1  ;;  %v8458_v5 = vcombine.low %v312_v0, %v320_v1  ;;  %v168_v44 = vshrl.u32 %v167_v34, 7  ;;  %vm5858_vm4 = vcmask 162816   ;;  %s8332_s26 = sshll.u32 %s9932_s22, 4  ;;  %s8333_s26 = int_to_ptr.vmem [resolvable:$true] %s8332_s26 }
  0x75   :  { %v576_v4 = vld [vmem:[#allocation2 + $0xbc0] sm:$0xff]  ;;  %v166_v43 = vunpack.c.0.s8 %v165_v33  ;;  %vm6412_vm5 = vcmask 1041408   ;;  %vm7789_vm6 = vcmask 517120   ;;  %vm7890_vm7 = vcmask 523264   ;;  %s9884_s27 = scalar_lea.vmem %s8333_s26, 16  ;;  %s9888_s10 = scalar_lea.vmem %s8333_s26, 32 }
  0x76   :  { %v296_v6 = vld [vmem:[#allocation2 + $0x300] sm:$0xff]  ;;  %v8715_v8 = vcombine.high %v568_v2, %v576_v4  ;;  %v8714_v9 = vcombine.low %v568_v2, %v576_v4  ;;  %4808 = vmatprep.subr.bf16.mxu0 %v8459_v3  ;;  %vm8076_vm8 = vcmask 254976   ;;  %vm8275_vm9 = vcmask 253952   ;;  %p9885_p3 = scmp.ne.s32.totalorder %s8333_s26, %s9884_s27  ;;  %p9889_p4 = scmp.lt.s32.totalorder %s8333_s26, %s8333_s26 }
  0x77   :  { %v304_v7 = vld [vmem:[#allocation2 + $0x340] sm:$0xff]  ;;  %4809 = vmatpush1.bf16.msra.mxu0 %v8458_v5  ;;  %v169_v53 = vsub.s32 %v166_v43, %v168_v44  ;;  %vm8159_vm10 = vcmask 15360   ;;  %vm8291_vm11 = vcmask 261120   ;;  %vm8324_vm12 = vcmask 0   ;;  %p9890_p5 = scmp.lt.s32.totalorder %s9888_s10, %s9884_s27 }
  0x78   :  { %v8443_v10 = vcombine.high %v296_v6, %v304_v7  ;;  %v552_v11 = vld [vmem:[#allocation2 + $0xb00] sm:$0xff]  ;;  %4849 = vmatprep.subr.bf16.mxu1 %v8715_v8  ;;  %v8442_v18 = vcombine.low %v296_v6, %v304_v7 }
  0x79   :  { %v560_v12 = vld [vmem:[#allocation2 + $0xb40] sm:$0xff]  ;;  %4850 = vmatpush1.bf16.msra.mxu1 %v8714_v9  ;;  %p9891_p6 = por %p9890_p5, %p9889_p4 }
  0x7a   :  { %v280_v13 = vld [vmem:[#allocation2 + $0x280] sm:$0xff]  ;;  %v8699_v14 = vcombine.high %v552_v11, %v560_v12  ;;  %4810 = vmatprep.subr.bf16.mxu0 %v8443_v10  ;;  %v8698_v19 = vcombine.low %v552_v11, %v560_v12 }
  0x7b   :  { %v288_v15 = vld [vmem:[#allocation2 + $0x2c0] sm:$0xff]  ;;  %4811 = vmatpush1.bf16.msra.mxu0 %v8442_v18  ;;  %p9892_p7 = pnand %p9891_p6, %p9885_p3 }
  0x7c   :  { %v536_v16 = vld [vmem:[#allocation2 + $0xa80] sm:$0xff]  ;;  %v8427_v20 = vcombine.high %v280_v13, %v288_v15  ;;  %4851 = vmatprep.subr.bf16.mxu1 %v8699_v14  ;;  %v8426_v26 = vcombine.low %v280_v13, %v288_v15 }
  0x7d   :  { %v544_v17 = vld [vmem:[#allocation2 + $0xac0] sm:$0xff]  ;;  %4852 = vmatpush1.bf16.msra.mxu1 %v8698_v19 }
  0x7e   :  { %v8683_v21 = vcombine.high %v536_v16, %v544_v17  ;;  %v264_v22 = vld [vmem:[#allocation2 + $0x200] sm:$0xff]  ;;  %4812 = vmatprep.subr.bf16.mxu0 %v8427_v20  ;;  %v8682_v27 = vcombine.low %v536_v16, %v544_v17 }
  0x7f   :  { %v272_v23 = vld [vmem:[#allocation2 + $0x240] sm:$0xff]  ;;  %4813 = vmatpush1.bf16.msra.mxu0 %v8426_v26 }
  0x80   :  { %v520_v24 = vld [vmem:[#allocation2 + $0xa00] sm:$0xff]  ;;  %v8411_v28 = vcombine.high %v264_v22, %v272_v23  ;;  %4853 = vmatprep.subr.bf16.mxu1 %v8683_v21  ;;  %v8410_v37 = vcombine.low %v264_v22, %v272_v23 }
  0x81   :  { %v528_v25 = vld [vmem:[#allocation2 + $0xa40] sm:$0xff]  ;;  %4854 = vmatpush1.bf16.msra.mxu1 %v8682_v27 }
  0x82   :  { %v8667_v29 = vcombine.high %v520_v24, %v528_v25  ;;  %v248_v30 = vld [vmem:[#allocation2 + $0x180] sm:$0xff]  ;;  %4814 = vmatprep.subr.bf16.mxu0 %v8411_v28  ;;  %v8666_v38 = vcombine.low %v520_v24, %v528_v25 }
  0x83   :  { %v256_v31 = vld [vmem:[#allocation2 + $0x1c0] sm:$0xff]  ;;  %4815 = vmatpush1.bf16.msra.mxu0 %v8410_v37 }
  0x84   :  { %v504_v35 = vld [vmem:[#allocation2 + $0x980] sm:$0xff]  ;;  %v8395_v39 = vcombine.high %v248_v30, %v256_v31  ;;  %4855 = vmatprep.subr.bf16.mxu1 %v8667_v29  ;;  %v8394_v47 = vcombine.low %v248_v30, %v256_v31 }
  0x85   :  { %v512_v36 = vld [vmem:[#allocation2 + $0x9c0] sm:$0xff]  ;;  %4856 = vmatpush1.bf16.msra.mxu1 %v8666_v38 }
  0x86   :  { %v8651_v40 = vcombine.high %v504_v35, %v512_v36  ;;  %v232_v41 = vld [vmem:[#allocation2 + $0x100] sm:$0xff]  ;;  %4816 = vmatprep.subr.bf16.mxu0 %v8395_v39  ;;  %v8650_v48 = vcombine.low %v504_v35, %v512_v36 }
  0x87   :  { %v240_v42 = vld [vmem:[#allocation2 + $0x140] sm:$0xff]  ;;  %4817 = vmatpush1.bf16.msra.mxu0 %v8394_v47 }
  0x88   :  { %v488_v45 = vld [vmem:[#allocation2 + $0x900] sm:$0xff]  ;;  %v8379_v49 = vcombine.high %v232_v41, %v240_v42  ;;  %4857 = vmatprep.subr.bf16.mxu1 %v8651_v40  ;;  %v8378_v56 = vcombine.low %v232_v41, %v240_v42 }
  0x89   :  { %v496_v46 = vld [vmem:[#allocation2 + $0x940] sm:$0xff]  ;;  %4858 = vmatpush1.bf16.msra.mxu1 %v8650_v48 }
  0x8a   :  { %v8635_v50 = vcombine.high %v488_v45, %v496_v46  ;;  %v216_v51 = vld [vmem:[#allocation2 + $0x80] sm:$0xff]  ;;  %4818 = vmatprep.subr.bf16.mxu0 %v8379_v49  ;;  %v8634_v57 = vcombine.low %v488_v45, %v496_v46 }
  0x8b   :  { %v224_v52 = vld [vmem:[#allocation2 + $0xc0] sm:$0xff]  ;;  %4819 = vmatpush1.bf16.msra.mxu0 %v8378_v56 }
  0x8c   :  { %v472_v54 = vld [vmem:[#allocation2 + $0x880] sm:$0xff]  ;;  %v8363_v58 = vcombine.high %v216_v51, %v224_v52  ;;  %4859 = vmatprep.subr.bf16.mxu1 %v8635_v50  ;;  %v8362_v3 = vcombine.low %v216_v51, %v224_v52 }
  0x8d   :  { %v480_v55 = vld [vmem:[#allocation2 + $0x8c0] sm:$0xff]  ;;  %4860 = vmatpush1.bf16.msra.mxu1 %v8634_v57 }
  0x8e   :  { %v159_v59 = vld [vmem:[%s10755_s0] sm:$0xff]  ;;  %v8619_v60 = vcombine.high %v472_v54, %v480_v55  ;;  %4820 = vmatprep.subr.bf16.mxu0 %v8363_v58  ;;  %v8618_v6 = vcombine.low %v472_v54, %v480_v55 }
  0x8f   :  { %v200_v61 = vld [vmem:[#allocation2] sm:$0xff]  ;;  %v10046_v63 = vrot.slane %v159_v59, %v169_v53  ;;  %v163_v0 = vcombine.high %v159_v59, %v159_v59  ;;  %4821 = vmatpush1.bf16.msra.mxu0 %v8362_v3 }
  0x90   :  { %v208_v62 = vld [vmem:[#allocation2 + $0x40] sm:$0xff]  ;;  %4861 = vmatprep.subr.bf16.mxu1 %v8619_v60 }
  0x91   :  { %v456_v1 = vld [vmem:[#allocation2 + $0x800] sm:$0xff]  ;;  %v178_v4 = vcombine.high %v10046_v63, %v10046_v63  ;;  %v10050_v5 = vrot.slane %v163_v0, %v169_v53  ;;  %v8347_v7 = vcombine.high %v200_v61, %v208_v62  ;;  %v8346_v15 = vcombine.low %v200_v61, %v208_v62  ;;  %4862 = vmatpush1.bf16.msra.mxu1 %v8618_v6 }
  0x92   :  { %v464_v2 = vld [vmem:[#allocation2 + $0x840] sm:$0xff] }
  0x93   :  { %v8603_v8 = vcombine.high %v456_v1, %v464_v2  ;;  %v440_v9 = vld [vmem:[#allocation2 + $0x780] sm:$0xff]  ;;  %v10052_v11 = vpack.c.bf16 %v178_v4, %v178_v4  ;;  %v179_v12 = vcombine.high %v10050_v5, %v10050_v5  ;;  %4822 = vmatprep.subr.bf16.mxu0 %v8347_v7  ;;  %v8602_v17 = vcombine.low %v456_v1, %v464_v2 }
  0x94   :  { %v448_v10 = vld [vmem:[#allocation2 + $0x7c0] sm:$0xff]  ;;  %4823 = vmatpush1.bf16.msra.mxu0 %v8346_v15 }
  0x95   :  { %v696_v13 = vld [vmem:[#allocation2 + $0xf80] sm:$0xff]  ;;  %4840 = vmatprep.mubr.bf16.mxu0 %v10052_v11  ;;  %v10057_v16 = vpack.c.bf16 %v179_v12, %v179_v12  ;;  %v8587_v18 = vcombine.high %v440_v9, %v448_v10  ;;  %4863 = vmatprep.subr.bf16.mxu1 %v8603_v8  ;;  %v8586_v24 = vcombine.low %v440_v9, %v448_v10 }
  0x96   :  { %v704_v14 = vld [vmem:[#allocation2 + $0xfc0] sm:$0xff]  ;;  %4864 = vmatpush1.bf16.msra.mxu1 %v8602_v17 }
  0x97   :  { %v8843_v19 = vcombine.high %v696_v13, %v704_v14  ;;  %v424_v20 = vld [vmem:[#allocation2 + $0x700] sm:$0xff]  ;;  %4881 = vmatprep.mubr.bf16.mxu1 %v10057_v16  ;;  %4824 = vmatprep.subr.bf16.mxu0 %v8587_v18  ;;  %v8842_v25 = vcombine.low %v696_v13, %v704_v14  ;;  %v313_v18 = vld [vmem:[#allocation2 + $0x388] sm:$0xff] }
  0x98   :  { %v432_v21 = vld [vmem:[#allocation2 + $0x740] sm:$0xff]  ;;  %4825 = vmatpush2.bf16.msra.mxu0 %v8586_v24 }
  0x99   :  { %v680_v22 = vld [vmem:[#allocation2 + $0xf00] sm:$0xff]  ;;  %v8571_v26 = vcombine.high %v424_v20, %v432_v21  ;;  %4865 = vmatprep.subr.bf16.mxu1 %v8843_v19  ;;  %v8570_v32 = vcombine.low %v424_v20, %v432_v21  ;;  %v321_v19 = vld [vmem:[#allocation2 + $0x3c8] sm:$0xff] }
  0x9a   :  { %v688_v23 = vld [vmem:[#allocation2 + $0xf40] sm:$0xff]  ;;  %4866 = vmatpush2.bf16.msra.mxu1 %v8842_v25  ;;  %v10063_v20 = vld.sshfl [vmem:[%s10755_s0 + $0x8] sm:$0x33 pattern:$0x76325410]  ;;  %v8461_v24 = vcombine.high %v313_v18, %v321_v19 }
  0x9b   :  { %v8827_v27 = vcombine.high %v680_v22, %v688_v23  ;;  %v408_v28 = vld [vmem:[#allocation2 + $0x680] sm:$0xff]  ;;  %4826 = vmatprep.subr.bf16.mxu0 %v8571_v26  ;;  %v8826_v33 = vcombine.low %v680_v22, %v688_v23 }
  0x9c   :  { %v416_v29 = vld [vmem:[#allocation2 + $0x6c0] sm:$0xff]  ;;  %4827 = vmatpush2.bf16.msra.mxu0 %v8570_v32 }
  0x9d   :  { %v664_v30 = vld [vmem:[#allocation2 + $0xe80] sm:$0xff]  ;;  %v8555_v34 = vcombine.high %v408_v28, %v416_v29  ;;  %4867 = vmatprep.subr.bf16.mxu1 %v8827_v27  ;;  %v8554_v40 = vcombine.low %v408_v28, %v416_v29  ;;  %v187_v27 = vcombine.high %v10063_v20, %v10063_v20  ;;  %v10069_v28 = vpack.c.bf16 %v10046_v63, %v10046_v63  ;;  %v297_v29 = vld [vmem:[#allocation2 + $0x308] sm:$0xff] }
  0x9e   :  { %v672_v31 = vld [vmem:[#allocation2 + $0xec0] sm:$0xff]  ;;  %4868 = vmatpush2.bf16.msra.mxu1 %v8826_v33  ;;  %v8460_v33 = vcombine.low %v313_v18, %v321_v19  ;;  %v209_v18 = vld [vmem:[#allocation2 + $0x48] sm:$0xff] }
  0x9f   :  { %v8811_v35 = vcombine.high %v664_v30, %v672_v31  ;;  %v392_v36 = vld [vmem:[#allocation2 + $0x600] sm:$0xff]  ;;  %4828 = vmatprep.subr.bf16.mxu0 %v8555_v34  ;;  %v8810_v41 = vcombine.low %v664_v30, %v672_v31  ;;  %v305_v30 = vld [vmem:[#allocation2 + $0x348] sm:$0xff]  ;;  %v10073_v31 = vpack.c.bf16 %v10050_v5, %v10050_v5  ;;  %v10075_v63 = vpack.c.bf16 %v187_v27, %v187_v27 }
  0xa0   :  { %v400_v37 = vld [vmem:[#allocation2 + $0x640] sm:$0xff]  ;;  %4829 = vmatpush2.bf16.msra.mxu0 %v8554_v40  ;;  %v8444_v40 = vcombine.low %v297_v29, %v305_v30  ;;  %v449_v27 = vld [vmem:[#allocation2 + $0x7c8] sm:$0xff] }
  0xa1   :  { %v648_v38 = vld [vmem:[#allocation2 + $0xe00] sm:$0xff]  ;;  %v8539_v42 = vcombine.high %v392_v36, %v400_v37  ;;  %4869 = vmatprep.subr.bf16.mxu1 %v8811_v35  ;;  %v8538_v48 = vcombine.low %v392_v36, %v400_v37  ;;  %v281_v37 = vld [vmem:[#allocation2 + $0x288] sm:$0xff] }
  0xa2   :  { %v656_v39 = vld [vmem:[#allocation2 + $0xe40] sm:$0xff]  ;;  %4870 = vmatpush2.bf16.msra.mxu1 %v8810_v41 }
  0xa3   :  { %v8795_v43 = vcombine.high %v648_v38, %v656_v39  ;;  %v376_v44 = vld [vmem:[#allocation2 + $0x580] sm:$0xff]  ;;  %4830 = vmatprep.subr.bf16.mxu0 %v8539_v42  ;;  %v8794_v49 = vcombine.low %v648_v38, %v656_v39  ;;  %v8445_v38 = vcombine.high %v297_v29, %v305_v30  ;;  %v289_v39 = vld [vmem:[#allocation2 + $0x2c8] sm:$0xff] }
  0xa4   :  { %v384_v45 = vld [vmem:[#allocation2 + $0x5c0] sm:$0xff]  ;;  %4831 = vmatpush2.bf16.msra.mxu0 %v8538_v48  ;;  %v8428_v48 = vcombine.low %v281_v37, %v289_v39 }
  0xa5   :  { %v632_v46 = vld [vmem:[#allocation2 + $0xd80] sm:$0xff]  ;;  %v8523_v50 = vcombine.high %v376_v44, %v384_v45  ;;  %4871 = vmatprep.subr.bf16.mxu1 %v8795_v43  ;;  %v8522_v56 = vcombine.low %v376_v44, %v384_v45  ;;  %v265_v44 = vld [vmem:[#allocation2 + $0x208] sm:$0xff]  ;;  %v8429_v45 = vcombine.high %v281_v37, %v289_v39 }
  0xa6   :  { %v640_v47 = vld [vmem:[#allocation2 + $0xdc0] sm:$0xff]  ;;  %4872 = vmatpush2.bf16.msra.mxu1 %v8794_v49  ;;  %v433_v37 = vld [vmem:[#allocation2 + $0x748] sm:$0xff] }
  0xa7   :  { %v8779_v51 = vcombine.high %v632_v46, %v640_v47  ;;  %v360_v52 = vld [vmem:[#allocation2 + $0x500] sm:$0xff]  ;;  %4832 = vmatprep.subr.bf16.mxu0 %v8523_v50  ;;  %v8778_v57 = vcombine.low %v632_v46, %v640_v47  ;;  %v273_v46 = vld [vmem:[#allocation2 + $0x248] sm:$0xff] }
  0xa8   :  { %v368_v53 = vld [vmem:[#allocation2 + $0x540] sm:$0xff]  ;;  %4833 = vmatpush2.bf16.msra.mxu0 %v8522_v56  ;;  %v8412_v56 = vcombine.low %v265_v44, %v273_v46 }
  0xa9   :  { %v616_v54 = vld [vmem:[#allocation2 + $0xd00] sm:$0xff]  ;;  %v8507_v58 = vcombine.high %v360_v52, %v368_v53  ;;  %4873 = vmatprep.subr.bf16.mxu1 %v8779_v51  ;;  %v8506_v1 = vcombine.low %v360_v52, %v368_v53  ;;  %v249_v52 = vld [vmem:[#allocation2 + $0x188] sm:$0xff]  ;;  %v8413_v53 = vcombine.high %v265_v44, %v273_v46 }
  0xaa   :  { %v624_v55 = vld [vmem:[#allocation2 + $0xd40] sm:$0xff]  ;;  %4874 = vmatpush2.bf16.msra.mxu1 %v8778_v57  ;;  %v417_v44 = vld [vmem:[#allocation2 + $0x6c8] sm:$0xff] }
  0xab   :  { %v8763_v59 = vcombine.high %v616_v54, %v624_v55  ;;  %v344_v60 = vld [vmem:[#allocation2 + $0x480] sm:$0xff]  ;;  %4834 = vmatprep.subr.bf16.mxu0 %v8507_v58  ;;  %v8762_v2 = vcombine.low %v616_v54, %v624_v55  ;;  %v257_v54 = vld [vmem:[#allocation2 + $0x1c8] sm:$0xff] }
  0xac   :  { %v352_v61 = vld [vmem:[#allocation2 + $0x4c0] sm:$0xff]  ;;  %4835 = vmatpush2.bf16.msra.mxu0 %v8506_v1  ;;  %v8396_v1 = vcombine.low %v249_v52, %v257_v54 }
  0xad   :  { %v600_v62 = vld [vmem:[#allocation2 + $0xc80] sm:$0xff]  ;;  %v8491_v3 = vcombine.high %v344_v60, %v352_v61  ;;  %4875 = vmatprep.subr.bf16.mxu1 %v8763_v59  ;;  %v8490_v10 = vcombine.low %v344_v60, %v352_v61  ;;  %v233_v60 = vld [vmem:[#allocation2 + $0x108] sm:$0xff]  ;;  %v8397_v61 = vcombine.high %v249_v52, %v257_v54 }
  0xae   :  { %v608_v0 = vld [vmem:[#allocation2 + $0xcc0] sm:$0xff]  ;;  %4876 = vmatpush2.bf16.msra.mxu1 %v8762_v2  ;;  %v401_v52 = vld [vmem:[#allocation2 + $0x648] sm:$0xff] }
  0xaf   :  { %v8747_v4 = vcombine.high %v600_v62, %v608_v0  ;;  %v328_v6 = vld [vmem:[#allocation2 + $0x400] sm:$0xff]  ;;  %4836 = vmatprep.subr.bf16.mxu0 %v8491_v3  ;;  %v8746_v12 = vcombine.low %v600_v62, %v608_v0  ;;  %v241_v62 = vld [vmem:[#allocation2 + $0x148] sm:$0xff] }
  0xb0   :  { %v336_v7 = vld [vmem:[#allocation2 + $0x440] sm:$0xff]  ;;  %4837 = vmatpush2.bf16.msra.mxu0 %v8490_v10  ;;  %v8380_v10 = vcombine.low %v233_v60, %v241_v62 }
  0xb1   :  { %v584_v8 = vld [vmem:[#allocation2 + $0xc00] sm:$0xff]  ;;  %v8475_v13 = vcombine.high %v328_v6, %v336_v7  ;;  %4877 = vmatprep.subr.bf16.mxu1 %v8747_v4  ;;  %v8474_v21 = vcombine.low %v328_v6, %v336_v7  ;;  %v217_v6 = vld [vmem:[#allocation2 + $0x88] sm:$0xff]  ;;  %v8381_v7 = vcombine.high %v233_v60, %v241_v62 }
  0xb2   :  { %v592_v9 = vld [vmem:[#allocation2 + $0xc40] sm:$0xff]  ;;  %4878 = vmatpush2.bf16.msra.mxu1 %v8746_v12  ;;  %v385_v60 = vld [vmem:[#allocation2 + $0x5c8] sm:$0xff] }
  0xb3   :  { %v8731_v14 = vcombine.high %v584_v8, %v592_v9  ;;  %v824_v15 = vld [vmem:[#allocation2 + $0x1380] sm:$0xff]  ;;  %4838 = vmatprep.subr.bf16.mxu0 %v8475_v13  ;;  %v8730_v22 = vcombine.low %v584_v8, %v592_v9  ;;  %v225_v8 = vld [vmem:[#allocation2 + $0xc8] sm:$0xff] }
  0xb4   :  { %v832_v17 = vld [vmem:[#allocation2 + $0x13c0] sm:$0xff]  ;;  %4839 = vmatpush2.bf16.msra.mxu0 %v8474_v21  ;;  %v8364_v21 = vcombine.low %v217_v6, %v225_v8 }
  0xb5   :  { %v8971_v23 = vcombine.high %v824_v15, %v832_v17  ;;  %4879 = vmatprep.subr.bf16.mxu1 %v8731_v14  ;;  %v808_v25 = vld [vmem:[#allocation2 + $0x1300] sm:$0xff]  ;;  %v8970_v32 = vcombine.low %v824_v15, %v832_v17  ;;  %v201_v15 = vld [vmem:[#allocation2 + $0x8] sm:$0xff]  ;;  %v8365_v17 = vcombine.high %v217_v6, %v225_v8 }
  0xb6   :  { %v816_v26 = vld [vmem:[#allocation2 + $0x1340] sm:$0xff]  ;;  %4880 = vmatpush2.bf16.msra.mxu1 %v8730_v22  ;;  %v8348_v30 = vcombine.low %v201_v15, %v209_v18  ;;  %v369_v6 = vld [vmem:[#allocation2 + $0x548] sm:$0xff] }
  0xb7   :  { %4890 = vmatprep.subr.bf16.mxu0 %v8971_v23  ;;  %v8955_v34 = vcombine.high %v808_v25, %v816_v26  ;;  %v792_v35 = vld [vmem:[#allocation2 + $0x1280] sm:$0xff]  ;;  %4931 = vmatprep.subr.bf16.mxu1 %v8461_v24  ;;  %v8954_v5 = vcombine.low %v808_v25, %v816_v26  ;;  %v441_v25 = vld [vmem:[#allocation2 + $0x788] sm:$0xff]  ;;  %v8349_v26 = vcombine.high %v201_v15, %v209_v18 }
  0xb8   :  { %v800_v36 = vld [vmem:[#allocation2 + $0x12c0] sm:$0xff]  ;;  %4841 = vmatmul.mubr.bf16.vlgmr.msra.gmra.mxu0 %v10069_v28  ;;  %v8588_v39 = vcombine.low %v441_v25, %v449_v27  ;;  %v353_v15 = vld [vmem:[#allocation2 + $0x4c8] sm:$0xff] }
  0xb9   :  { %4882 = vmatmul.mubr.bf16.vlgmr.msra.gmra.mxu1 %v10073_v31  ;;  %4891 = vmatpush1.bf16.msra.mxu0 %v8970_v32  ;;  %v8939_v41 = vcombine.high %v792_v35, %v800_v36  ;;  %v776_v42 = vld [vmem:[#allocation2 + $0x1200] sm:$0xff]  ;;  %v8938_v47 = vcombine.low %v792_v35, %v800_v36  ;;  %v425_v35 = vld [vmem:[#allocation2 + $0x708] sm:$0xff]  ;;  %v8589_v36 = vcombine.high %v441_v25, %v449_v27 }
  0xba   :  { %4932 = vmatpush1.bf16.msra.mxu1 %v8460_v33  ;;  %4892 = vmatprep.subr.bf16.mxu0 %v8955_v34  ;;  %v784_v43 = vld [vmem:[#allocation2 + $0x1240] sm:$0xff]  ;;  %v8572_v46 = vcombine.low %v425_v35, %v433_v37  ;;  %v337_v25 = vld [vmem:[#allocation2 + $0x448] sm:$0xff] }
  0xbb   :  { %4933 = vmatprep.subr.bf16.mxu1 %v8445_v38  ;;  %4922 = vmatprep.mubr.bf16.mxu0 %v10075_v63  ;;  %v8923_v49 = vcombine.high %v776_v42, %v784_v43  ;;  %v760_v50 = vld [vmem:[#allocation2 + $0x1180] sm:$0xff]  ;;  %v8922_v55 = vcombine.low %v776_v42, %v784_v43  ;;  %v409_v42 = vld [vmem:[#allocation2 + $0x688] sm:$0xff]  ;;  %v8573_v43 = vcombine.high %v425_v35, %v433_v37 }
  0xbc   :  { %4963 = vmatprep.mubr.bf16.mxu1 %v10052_v11  ;;  %v768_v51 = vld [vmem:[#allocation2 + $0x11c0] sm:$0xff]  ;;  %v8556_v54 = vcombine.low %v409_v42, %v417_v44  ;;  %v833_v35 = vld [vmem:[#allocation2 + $0x13c8] sm:$0xff] }
  0xbd   :  { %4893 = vmatpush1.bf16.msra.mxu0 %v8954_v5  ;;  %v8907_v57 = vcombine.high %v760_v50, %v768_v51  ;;  %v744_v58 = vld [vmem:[#allocation2 + $0x1100] sm:$0xff]  ;;  %v8906_v0 = vcombine.low %v760_v50, %v768_v51  ;;  %v393_v50 = vld [vmem:[#allocation2 + $0x608] sm:$0xff]  ;;  %v8557_v51 = vcombine.high %v409_v42, %v417_v44 }
  0xbe   :  { %4934 = vmatpush1.bf16.msra.mxu1 %v8444_v40  ;;  %4894 = vmatprep.subr.bf16.mxu0 %v8939_v41  ;;  %v752_v59 = vld [vmem:[#allocation2 + $0x1140] sm:$0xff]  ;;  %v8540_v62 = vcombine.low %v393_v50, %v401_v52  ;;  %v817_v42 = vld [vmem:[#allocation2 + $0x1348] sm:$0xff] }
  0xbf   :  { %4935 = vmatprep.subr.bf16.mxu1 %v8429_v45  ;;  %v8891_v2 = vcombine.high %v744_v58, %v752_v59  ;;  %v728_v3 = vld [vmem:[#allocation2 + $0x1080] sm:$0xff]  ;;  %v8890_v9 = vcombine.low %v744_v58, %v752_v59  ;;  %v377_v58 = vld [vmem:[#allocation2 + $0x588] sm:$0xff]  ;;  %v8541_v59 = vcombine.high %v393_v50, %v401_v52 }
  0xc0   :  { %v736_v4 = vld [vmem:[#allocation2 + $0x10c0] sm:$0xff]  ;;  %v8524_v8 = vcombine.low %v377_v58, %v385_v60 }
  0xc1   :  { %4895 = vmatpush1.bf16.msra.mxu0 %v8938_v47  ;;  %v8875_v12 = vcombine.high %v728_v3, %v736_v4  ;;  %v712_v13 = vld [vmem:[#allocation2 + $0x1000] sm:$0xff]  ;;  %v8874_v19 = vcombine.low %v728_v3, %v736_v4  ;;  %v361_v3 = vld [vmem:[#allocation2 + $0x508] sm:$0xff]  ;;  %v8525_v4 = vcombine.high %v377_v58, %v385_v60 }
  0xc2   :  { %4936 = vmatpush1.bf16.msra.mxu1 %v8428_v48  ;;  %4896 = vmatprep.subr.bf16.mxu0 %v8923_v49  ;;  %v720_v14 = vld [vmem:[#allocation2 + $0x1040] sm:$0xff]  ;;  %v8508_v18 = vcombine.low %v361_v3, %v369_v6  ;;  %v785_v58 = vld [vmem:[#allocation2 + $0x1248] sm:$0xff] }
  0xc3   :  { %4937 = vmatprep.subr.bf16.mxu1 %v8413_v53  ;;  %v8859_v22 = vcombine.high %v712_v13, %v720_v14  ;;  %v952_v23 = vld [vmem:[#allocation2 + $0x1780] sm:$0xff]  ;;  %v8858_v29 = vcombine.low %v712_v13, %v720_v14  ;;  %v345_v13 = vld [vmem:[#allocation2 + $0x488] sm:$0xff]  ;;  %v8509_v14 = vcombine.high %v361_v3, %v369_v6 }
  0xc4   :  { %v960_v24 = vld [vmem:[#allocation2 + $0x17c0] sm:$0xff]  ;;  %v8492_v27 = vcombine.low %v345_v13, %v353_v15  ;;  %v769_v3 = vld [vmem:[#allocation2 + $0x11c8] sm:$0xff] }
  0xc5   :  { %4897 = vmatpush1.bf16.msra.mxu0 %v8922_v55  ;;  %v9099_v32 = vcombine.high %v952_v23, %v960_v24  ;;  %v936_v33 = vld [vmem:[#allocation2 + $0x1700] sm:$0xff]  ;;  %v9098_v38 = vcombine.low %v952_v23, %v960_v24  ;;  %v329_v23 = vld [vmem:[#allocation2 + $0x408] sm:$0xff]  ;;  %v8493_v24 = vcombine.high %v345_v13, %v353_v15 }
  0xc6   :  { %4938 = vmatpush1.bf16.msra.mxu1 %v8412_v56  ;;  %4898 = vmatprep.subr.bf16.mxu0 %v8907_v57  ;;  %v944_v34 = vld [vmem:[#allocation2 + $0x1740] sm:$0xff]  ;;  %v8476_v37 = vcombine.low %v329_v23, %v337_v25  ;;  %v753_v13 = vld [vmem:[#allocation2 + $0x1148] sm:$0xff] }
  0xc7   :  { %4939 = vmatprep.subr.bf16.mxu1 %v8397_v61  ;;  %v9083_v5 = vcombine.high %v936_v33, %v944_v34  ;;  %v920_v40 = vld [vmem:[#allocation2 + $0x1680] sm:$0xff]  ;;  %v9082_v45 = vcombine.low %v936_v33, %v944_v34  ;;  %v825_v33 = vld [vmem:[#allocation2 + $0x1388] sm:$0xff]  ;;  %v8477_v34 = vcombine.high %v329_v23, %v337_v25 }
  0xc8   :  { %v928_v41 = vld [vmem:[#allocation2 + $0x16c0] sm:$0xff]  ;;  %v737_v23 = vld [vmem:[#allocation2 + $0x10c8] sm:$0xff] }
  0xc9   :  { %4899 = vmatpush1.bf16.msra.mxu0 %v8906_v0  ;;  %v9067_v47 = vcombine.high %v920_v40, %v928_v41  ;;  %v904_v48 = vld [vmem:[#allocation2 + $0x1600] sm:$0xff]  ;;  %v9066_v53 = vcombine.low %v920_v40, %v928_v41  ;;  %v809_v40 = vld [vmem:[#allocation2 + $0x1308] sm:$0xff]  ;;  %v8973_v41 = vcombine.high %v825_v33, %v833_v35 }
  0xca   :  { %4940 = vmatpush1.bf16.msra.mxu1 %v8396_v1  ;;  %4900 = vmatprep.subr.bf16.mxu0 %v8891_v2  ;;  %v912_v49 = vld [vmem:[#allocation2 + $0x1640] sm:$0xff]  ;;  %v8957_v50 = vcombine.high %v809_v40, %v817_v42 }
  0xcb   :  { %4941 = vmatprep.subr.bf16.mxu1 %v8381_v7  ;;  %v9051_v55 = vcombine.high %v904_v48, %v912_v49  ;;  %v888_v56 = vld [vmem:[#allocation2 + $0x1580] sm:$0xff]  ;;  %v9050_v61 = vcombine.low %v904_v48, %v912_v49  ;;  %v545_v48 = vld [vmem:[#allocation2 + $0xac8] sm:$0xff] }
  0xcc   :  { %v896_v57 = vld [vmem:[#allocation2 + $0x15c0] sm:$0xff]  ;;  %v793_v49 = vld [vmem:[#allocation2 + $0x1288] sm:$0xff] }
  0xcd   :  { %4901 = vmatpush1.bf16.msra.mxu0 %v8890_v9  ;;  %v9035_v0 = vcombine.high %v888_v56, %v896_v57  ;;  %v872_v1 = vld [vmem:[#allocation2 + $0x1500] sm:$0xff]  ;;  %v9034_v7 = vcombine.low %v888_v56, %v896_v57  ;;  %v777_v56 = vld [vmem:[#allocation2 + $0x1208] sm:$0xff] }
  0xce   :  { %4942 = vmatpush1.bf16.msra.mxu1 %v8380_v10  ;;  %4902 = vmatprep.subr.bf16.mxu0 %v8875_v12  ;;  %v880_v2 = vld [vmem:[#allocation2 + $0x1540] sm:$0xff]  ;;  %v8924_v6 = vcombine.low %v777_v56, %v785_v58 }
  0xcf   :  { %4943 = vmatprep.subr.bf16.mxu1 %v8365_v17  ;;  %v9019_v9 = vcombine.high %v872_v1, %v880_v2  ;;  %v856_v10 = vld [vmem:[#allocation2 + $0x1480] sm:$0xff]  ;;  %v9018_v17 = vcombine.low %v872_v1, %v880_v2  ;;  %v761_v1 = vld [vmem:[#allocation2 + $0x1188] sm:$0xff]  ;;  %v8925_v2 = vcombine.high %v777_v56, %v785_v58 }
  0xd0   :  { %v864_v12 = vld [vmem:[#allocation2 + $0x14c0] sm:$0xff]  ;;  %v8908_v15 = vcombine.low %v761_v1, %v769_v3  ;;  %v929_v56 = vld [vmem:[#allocation2 + $0x16c8] sm:$0xff] }
  0xd1   :  { %4903 = vmatpush1.bf16.msra.mxu0 %v8874_v19  ;;  %v9003_v19 = vcombine.high %v856_v10, %v864_v12 }
  0xd2   :  { %4944 = vmatpush1.bf16.msra.mxu1 %v8364_v21  ;;  %4904 = vmatprep.subr.bf16.mxu0 %v8859_v22  ;;  %v840_v21 = vld [vmem:[#allocation2 + $0x1400] sm:$0xff] }
  0xd3   :  { %4945 = vmatprep.subr.bf16.mxu1 %v8349_v26  ;;  %v848_v22 = vld [vmem:[#allocation2 + $0x1440] sm:$0xff]  ;;  %v9002_v26 = vcombine.low %v856_v10, %v864_v12  ;;  %v745_v10 = vld [vmem:[#allocation2 + $0x1108] sm:$0xff]  ;;  %v8909_v12 = vcombine.high %v761_v1, %v769_v3 }
  0xd4   :  { %v8892_v25 = vcombine.low %v745_v10, %v753_v13  ;;  %v913_v1 = vld [vmem:[#allocation2 + $0x1648] sm:$0xff] }
  0xd5   :  { %4905 = vmatpush1.bf16.msra.mxu0 %v8858_v29  ;;  %v8987_v29 = vcombine.high %v840_v21, %v848_v22 }
  0xd6   :  { %4946 = vmatpush1.bf16.msra.mxu1 %v8348_v30  ;;  %4906 = vmatprep.subr.bf16.mxu0 %v9099_v32  ;;  %v569_v30 = vld [vmem:[#allocation2 + $0xb88] sm:$0xff] }
  0xd7   :  { %4947 = vmatprep.subr.bf16.mxu1 %v8589_v36  ;;  %v577_v32 = vld [vmem:[#allocation2 + $0xbc8] sm:$0xff]  ;;  %v8986_v36 = vcombine.low %v840_v21, %v848_v22  ;;  %v8893_v22 = vcombine.high %v745_v10, %v753_v13 }
  0xd8   :  { %v8716_v44 = vcombine.low %v569_v30, %v577_v32  ;;  %v729_v21 = vld [vmem:[#allocation2 + $0x1088] sm:$0xff] }
  0xd9   :  { %4907 = vmatpush2.bf16.msra.mxu0 %v9098_v38  ;;  %v8717_v38 = vcombine.high %v569_v30, %v577_v32  ;;  %v713_v30 = vld [vmem:[#allocation2 + $0x1008] sm:$0xff]  ;;  %v8877_v32 = vcombine.high %v729_v21, %v737_v23 }
  0xda   :  { %4948 = vmatpush2.bf16.msra.mxu1 %v8588_v39  ;;  %4908 = vmatprep.subr.bf16.mxu0 %v9083_v5  ;;  %v553_v39 = vld [vmem:[#allocation2 + $0xb08] sm:$0xff] }
  0xdb   :  { %4949 = vmatprep.subr.bf16.mxu1 %v8573_v43  ;;  %v561_v5 = vld [vmem:[#allocation2 + $0xb48] sm:$0xff]  ;;  %v10083_v43 = vpack.c.bf16 %v10063_v20, %v10063_v20  ;;  %v8956_v20 = vcombine.low %v809_v40, %v817_v42 }
  0xdc   :  { %v8700_v52 = vcombine.low %v553_v39, %v561_v5  ;;  %v961_v40 = vld [vmem:[#allocation2 + $0x17c8] sm:$0xff] }
  0xdd   :  { %4909 = vmatpush2.bf16.msra.mxu0 %v9082_v45  ;;  %v8972_v45 = vcombine.low %v825_v33, %v833_v35  ;;  %v721_v33 = vld [vmem:[#allocation2 + $0x1048] sm:$0xff]  ;;  %v8876_v35 = vcombine.low %v729_v21, %v737_v23 }
  0xde   :  { %4950 = vmatpush2.bf16.msra.mxu1 %v8572_v46  ;;  %4910 = vmatprep.subr.bf16.mxu0 %v9067_v47  ;;  %v8701_v46 = vcombine.high %v553_v39, %v561_v5  ;;  %v537_v47 = vld [vmem:[#allocation2 + $0xa88] sm:$0xff]  ;;  %v8861_v5 = vcombine.high %v713_v30, %v721_v33  ;;  %v8860_v42 = vcombine.low %v713_v30, %v721_v33 }
  0xdf   :  { %4951 = vmatprep.subr.bf16.mxu1 %v8557_v51  ;;  %v801_v51 = vld [vmem:[#allocation2 + $0x12c8] sm:$0xff] }
  0xe0   :  { %v8941_v57 = vcombine.high %v793_v49, %v801_v51  ;;  %v8940_v60 = vcombine.low %v793_v49, %v801_v51  ;;  %v953_v39 = vld [vmem:[#allocation2 + $0x1788] sm:$0xff] }
  0xe1   :  { %4911 = vmatpush2.bf16.msra.mxu0 %v9066_v53  ;;  %v8685_v53 = vcombine.high %v537_v47, %v545_v48  ;;  %v945_v49 = vld [vmem:[#allocation2 + $0x1748] sm:$0xff]  ;;  %v9100_v51 = vcombine.low %v953_v39, %v961_v40 }
  0xe2   :  { %4952 = vmatpush2.bf16.msra.mxu1 %v8556_v54  ;;  %4912 = vmatprep.subr.bf16.mxu0 %v9051_v55  ;;  %v521_v54 = vld [vmem:[#allocation2 + $0xa08] sm:$0xff] }
  0xe3   :  { %4953 = vmatprep.subr.bf16.mxu1 %v8541_v59  ;;  %v529_v55 = vld [vmem:[#allocation2 + $0xa48] sm:$0xff]  ;;  %v8684_v59 = vcombine.low %v537_v47, %v545_v48  ;;  %v9101_v48 = vcombine.high %v953_v39, %v961_v40 }
  0xe4   :  { %v937_v47 = vld [vmem:[#allocation2 + $0x1708] sm:$0xff] }
  0xe5   :  { %4913 = vmatpush2.bf16.msra.mxu0 %v9050_v61  ;;  %v8669_v61 = vcombine.high %v521_v54, %v529_v55  ;;  %v9084_v58 = vcombine.low %v937_v47, %v945_v49  ;;  %v897_v10 = vld [vmem:[#allocation2 + $0x15c8] sm:$0xff] }
  0xe6   :  { %4954 = vmatpush2.bf16.msra.mxu1 %v8540_v62  ;;  %4914 = vmatprep.subr.bf16.mxu0 %v9035_v0  ;;  %v505_v62 = vld [vmem:[#allocation2 + $0x988] sm:$0xff] }
  0xe7   :  { %4955 = vmatprep.subr.bf16.mxu1 %v8525_v4  ;;  %v513_v0 = vld [vmem:[#allocation2 + $0x9c8] sm:$0xff]  ;;  %v8668_v4 = vcombine.low %v521_v54, %v529_v55  ;;  %v9085_v55 = vcombine.high %v937_v47, %v945_v49  ;;  %v314_v49 = vld [vmem:[#allocation2 + $0x390] sm:$0xff] }
  0xe8   :  { %v921_v54 = vld [vmem:[#allocation2 + $0x1688] sm:$0xff] }
  0xe9   :  { %4915 = vmatpush2.bf16.msra.mxu0 %v9034_v7  ;;  %v8653_v7 = vcombine.high %v505_v62, %v513_v0  ;;  %v9068_v3 = vcombine.low %v921_v54, %v929_v56  ;;  %v881_v21 = vld [vmem:[#allocation2 + $0x1548] sm:$0xff] }
  0xea   :  { %4956 = vmatpush2.bf16.msra.mxu1 %v8524_v8  ;;  %4916 = vmatprep.subr.bf16.mxu0 %v9019_v9  ;;  %v489_v8 = vld [vmem:[#allocation2 + $0x908] sm:$0xff] }
  0xeb   :  { %4957 = vmatprep.subr.bf16.mxu1 %v8509_v14  ;;  %v497_v9 = vld [vmem:[#allocation2 + $0x948] sm:$0xff]  ;;  %v8652_v14 = vcombine.low %v505_v62, %v513_v0  ;;  %v9069_v0 = vcombine.high %v921_v54, %v929_v56  ;;  %v298_v56 = vld [vmem:[#allocation2 + $0x310] sm:$0xff] }
  0xec   :  { %v905_v62 = vld [vmem:[#allocation2 + $0x1608] sm:$0xff] }
  0xed   :  { %4917 = vmatpush2.bf16.msra.mxu0 %v9018_v17  ;;  %v8637_v17 = vcombine.high %v489_v8, %v497_v9  ;;  %v9052_v13 = vcombine.low %v905_v62, %v913_v1  ;;  %v857_v30 = vld [vmem:[#allocation2 + $0x1488] sm:$0xff] }
  0xee   :  { %4958 = vmatpush2.bf16.msra.mxu1 %v8508_v18  ;;  %4918 = vmatprep.subr.bf16.mxu0 %v9003_v19  ;;  %v473_v18 = vld [vmem:[#allocation2 + $0x888] sm:$0xff] }
  0xef   :  { %4959 = vmatprep.subr.bf16.mxu1 %v8493_v24  ;;  %v481_v19 = vld [vmem:[#allocation2 + $0x8c8] sm:$0xff]  ;;  %v8636_v24 = vcombine.low %v489_v8, %v497_v9  ;;  %v9053_v9 = vcombine.high %v905_v62, %v913_v1  ;;  %v282_v1 = vld [vmem:[#allocation2 + $0x290] sm:$0xff] }
  0xf0   :  { %v889_v8 = vld [vmem:[#allocation2 + $0x1588] sm:$0xff] }
  0xf1   :  { %4919 = vmatpush2.bf16.msra.mxu0 %v9002_v26  ;;  %v8621_v26 = vcombine.high %v473_v18, %v481_v19  ;;  %v9036_v23 = vcombine.low %v889_v8, %v897_v10  ;;  %v841_v40 = vld [vmem:[#allocation2 + $0x1408] sm:$0xff] }
  0xf2   :  { %4960 = vmatpush2.bf16.msra.mxu1 %v8492_v27  ;;  %4920 = vmatprep.subr.bf16.mxu0 %v8987_v29  ;;  %v457_v27 = vld [vmem:[#allocation2 + $0x808] sm:$0xff] }
  0xf3   :  { %4961 = vmatprep.subr.bf16.mxu1 %v8477_v34  ;;  %v465_v29 = vld [vmem:[#allocation2 + $0x848] sm:$0xff]  ;;  %v8620_v34 = vcombine.low %v473_v18, %v481_v19  ;;  %v9037_v19 = vcombine.high %v889_v8, %v897_v10  ;;  %v266_v10 = vld [vmem:[#allocation2 + $0x210] sm:$0xff] }
  0xf4   :  { %v873_v18 = vld [vmem:[#allocation2 + $0x1508] sm:$0xff] }
  0xf5   :  { %4921 = vmatpush2.bf16.msra.mxu0 %v8986_v36  ;;  %v8605_v36 = vcombine.high %v457_v27, %v465_v29 }
  0xf6   :  { %4962 = vmatpush2.bf16.msra.mxu1 %v8476_v37  ;;  %4972 = vmatprep.subr.bf16.mxu0 %v8717_v38  ;;  %v697_v37 = vld [vmem:[#allocation2 + $0xf88] sm:$0xff] }
  0xf7   :  { %5013 = vmatprep.subr.bf16.mxu1 %v8973_v41  ;;  %v705_v38 = vld [vmem:[#allocation2 + $0xfc8] sm:$0xff]  ;;  %v8604_v41 = vcombine.low %v457_v27, %v465_v29  ;;  %v10092_v27 = vld [vmem:[%s10756_s1 + $0x10] sm:$0xf]  ;;  %v9021_v29 = vcombine.high %v873_v18, %v881_v21 }
  0xf8   :  { %4923 = vmatmul.mubr.bf16.vlgmr.msra.gmra.mxu0 %v10083_v43  ;;  %v5803_v33 = vsel %vm5802_vm0, %v10092_v27, 0.0 }
  0xf9   :  { %4964 = vmatmul.mubr.bf16.vlgmr.msra.gmra.mxu1 %v10069_v28  ;;  %4973 = vmatpush1.bf16.msra.mxu0 %v8716_v44  ;;  %v8845_v44 = vcombine.high %v697_v37, %v705_v38 }
  0xfa   :  { %5014 = vmatpush1.bf16.msra.mxu1 %v8972_v45  ;;  %4974 = vmatprep.subr.bf16.mxu0 %v8701_v46  ;;  %v681_v45 = vld [vmem:[#allocation2 + $0xf08] sm:$0xff] }
  0xfb   :  { %5015 = vmatprep.subr.bf16.mxu1 %v8957_v50  ;;  %5004 = vmatprep.mubr.bf16.mxu0 %v10057_v16  ;;  %v689_v46 = vld [vmem:[#allocation2 + $0xf48] sm:$0xff]  ;;  %v8844_v50 = vcombine.low %v697_v37, %v705_v38 }
  0xfc   :  { %5045 = vmatprep.mubr.bf16.mxu1 %v10075_v63  ;;  %5804 = vadd.xlane.f32.xlu0 %v5803_v33  ;;  %v585_v37 = vld [vmem:[#allocation2 + $0xc08] sm:$0xff]  ;;  %v234_v33 = vld [vmem:[#allocation2 + $0x110] sm:$0xff] }
  0xfd   :  { %4975 = vmatpush1.bf16.msra.mxu0 %v8700_v52  ;;  %v8829_v52 = vcombine.high %v681_v45, %v689_v46  ;;  %v10099_v38 = vld [vmem:[%s10756_s1 + $0x8] sm:$0xff] }
  0xfe   :  { %5016 = vmatpush1.bf16.msra.mxu1 %v8956_v20  ;;  %4976 = vmatprep.subr.bf16.mxu0 %v8685_v53  ;;  %v665_v20 = vld [vmem:[#allocation2 + $0xe88] sm:$0xff] }
  0xff   :  { %5017 = vmatprep.subr.bf16.mxu1 %v8941_v57  ;;  %v673_v53 = vld [vmem:[#allocation2 + $0xec8] sm:$0xff]  ;;  %v8828_v57 = vcombine.low %v681_v45, %v689_v46 }
 0x101   :  { %4977 = vmatpush1.bf16.msra.mxu0 %v8684_v59  ;;  %v8813_v59 = vcombine.high %v665_v20, %v673_v53 }
 0x102   :  { %5018 = vmatpush1.bf16.msra.mxu1 %v8940_v60  ;;  %4978 = vmatprep.subr.bf16.mxu0 %v8669_v61  ;;  %v649_v60 = vld [vmem:[#allocation2 + $0xe08] sm:$0xff] }
 0x103   :  { %5019 = vmatprep.subr.bf16.mxu1 %v8925_v2  ;;  %v657_v61 = vld [vmem:[#allocation2 + $0xe48] sm:$0xff]  ;;  %v8812_v2 = vcombine.low %v665_v20, %v673_v53  ;;  %v578_v20 = vld [vmem:[#allocation2 + $0xbd0] sm:$0xff] }
 0x105   :  { %4979 = vmatpush1.bf16.msra.mxu0 %v8668_v4  ;;  %v8797_v4 = vcombine.high %v649_v60, %v657_v61 }
 0x106   :  { %5020 = vmatpush1.bf16.msra.mxu1 %v8924_v6  ;;  %4980 = vmatprep.subr.bf16.mxu0 %v8653_v7  ;;  %v633_v6 = vld [vmem:[#allocation2 + $0xd88] sm:$0xff] }
 0x107   :  { %5021 = vmatprep.subr.bf16.mxu1 %v8909_v12  ;;  %v641_v7 = vld [vmem:[#allocation2 + $0xdc8] sm:$0xff]  ;;  %v8796_v12 = vcombine.low %v649_v60, %v657_v61  ;;  %v562_v60 = vld [vmem:[#allocation2 + $0xb50] sm:$0xff] }
 0x109   :  { %4981 = vmatpush1.bf16.msra.mxu0 %v8652_v14  ;;  %v8781_v14 = vcombine.high %v633_v6, %v641_v7 }
 0x10a   :  { %5022 = vmatpush1.bf16.msra.mxu1 %v8908_v15  ;;  %4982 = vmatprep.subr.bf16.mxu0 %v8637_v17  ;;  %v617_v15 = vld [vmem:[#allocation2 + $0xd08] sm:$0xff] }
 0x10b   :  { %5023 = vmatprep.subr.bf16.mxu1 %v8893_v22  ;;  %v625_v17 = vld [vmem:[#allocation2 + $0xd48] sm:$0xff]  ;;  %v8780_v22 = vcombine.low %v633_v6, %v641_v7  ;;  %v546_v6 = vld [vmem:[#allocation2 + $0xad0] sm:$0xff] }
 0x10d   :  { %4983 = vmatpush1.bf16.msra.mxu0 %v8636_v24  ;;  %v8765_v24 = vcombine.high %v617_v15, %v625_v17 }
 0x10e   :  { %5024 = vmatpush1.bf16.msra.mxu1 %v8892_v25  ;;  %4984 = vmatprep.subr.bf16.mxu0 %v8621_v26  ;;  %v601_v25 = vld [vmem:[#allocation2 + $0xc88] sm:$0xff] }
 0x10f   :  { %5025 = vmatprep.subr.bf16.mxu1 %v8877_v32  ;;  %v609_v26 = vld [vmem:[#allocation2 + $0xcc8] sm:$0xff] }
 0x110   :  { %v865_v32 = vld [vmem:[#allocation2 + $0x14c8] sm:$0xff]  ;;  %v8748_v46 = vcombine.low %v601_v25, %v609_v26 }
 0x111   :  { %4985 = vmatpush1.bf16.msra.mxu0 %v8620_v34  ;;  %v8764_v34 = vcombine.low %v617_v15, %v625_v17  ;;  %v9005_v39 = vcombine.high %v857_v30, %v865_v32  ;;  %v9004_v47 = vcombine.low %v857_v30, %v865_v32  ;;  %v530_v15 = vld [vmem:[#allocation2 + $0xa50] sm:$0xff] }
 0x112   :  { %5026 = vmatpush1.bf16.msra.mxu1 %v8876_v35  ;;  %4986 = vmatprep.subr.bf16.mxu0 %v8605_v36  ;;  %v9020_v35 = vcombine.low %v873_v18, %v881_v21  ;;  %v8749_v36 = vcombine.high %v601_v25, %v609_v26  ;;  %v250_v21 = vld [vmem:[#allocation2 + $0x190] sm:$0xff] }
 0x113   :  { %5027 = vmatprep.subr.bf16.mxu1 %v8861_v5  ;;  %v593_v5 = vld [vmem:[#allocation2 + $0xc48] sm:$0xff]  ;;  %v514_v25 = vld [vmem:[#allocation2 + $0x9d0] sm:$0xff] }
 0x114   :  { %v8732_v53 = vcombine.low %v585_v37, %v593_v5 }
 0x115   :  { %4987 = vmatpush1.bf16.msra.mxu0 %v8604_v41  ;;  %v5799_v41 = vsel %vm5795_vm1, %v10099_v38, 0.0 }
 0x116   :  { %5028 = vmatpush1.bf16.msra.mxu1 %v8860_v42  ;;  %4988 = vmatprep.subr.bf16.mxu0 %v8845_v44  ;;  %v10106_v42 = vld [vmem:[%s10756_s1] sm:$0xff]  ;;  %v849_v44 = vld [vmem:[#allocation2 + $0x1448] sm:$0xff] }
 0x117   :  { %5029 = vmatprep.subr.bf16.mxu1 %v9101_v48  ;;  %5800 = vadd.xlane.f32.xlu0 %v5799_v41  ;;  %v5796_v45 = vsel %vm5795_vm1, %v10106_v42, 0.0  ;;  %v8733_v48 = vcombine.high %v585_v37, %v593_v5  ;;  %v8988_v54 = vcombine.low %v841_v40, %v849_v44  ;;  %v218_v41 = vld [vmem:[#allocation2 + $0x90] sm:$0xff] }
 0x118   :  { %5797 = vadd.xlane.f32.xlu1 %v5796_v45  ;;  %v474_v45 = vld [vmem:[#allocation2 + $0x890] sm:$0xff] }
 0x119   :  { %4989 = vmatpush2.bf16.msra.mxu0 %v8844_v50  ;;  %v322_v50 = vld [vmem:[#allocation2 + $0x3d0] sm:$0xff] }
 0x11a   :  { %5030 = vmatpush2.bf16.msra.mxu1 %v9100_v51  ;;  %4990 = vmatprep.subr.bf16.mxu0 %v8829_v52  ;;  %v570_v51 = vld [vmem:[#allocation2 + $0xb90] sm:$0xff]  ;;  %v8989_v52 = vcombine.high %v841_v40, %v849_v44  ;;  %v8462_v61 = vcombine.low %v314_v49, %v322_v50 }
 0x11b   :  { %5031 = vmatprep.subr.bf16.mxu1 %v9085_v55  ;;  %v8463_v55 = vcombine.high %v314_v49, %v322_v50  ;;  %v8718_v62 = vcombine.low %v570_v51, %v578_v20  ;;  %v226_v44 = vld [vmem:[#allocation2 + $0xd0] sm:$0xff] }
 0x11c   :  { %v8367_v49 = vcombine.high %v218_v41, %v226_v44 }
 0x11d   :  { %4991 = vmatpush2.bf16.msra.mxu0 %v8828_v57  ;;  %v306_v57 = vld [vmem:[#allocation2 + $0x350] sm:$0xff] }
 0x11e   :  { %5032 = vmatpush2.bf16.msra.mxu1 %v9084_v58  ;;  %4992 = vmatprep.subr.bf16.mxu0 %v8813_v59  ;;  %v554_v58 = vld [vmem:[#allocation2 + $0xb10] sm:$0xff]  ;;  %v8719_v59 = vcombine.high %v570_v51, %v578_v20  ;;  %v8446_v7 = vcombine.low %v298_v56, %v306_v57 }
 0x11f   :  { %5033 = vmatprep.subr.bf16.mxu1 %v9069_v0  ;;  %v8447_v0 = vcombine.high %v298_v56, %v306_v57  ;;  %v8702_v8 = vcombine.low %v554_v58, %v562_v60  ;;  %v202_v51 = vld [vmem:[#allocation2 + $0x10] sm:$0xff] }
 0x120   :  { %v458_v20 = vld [vmem:[#allocation2 + $0x810] sm:$0xff] }
 0x121   :  { %4993 = vmatpush2.bf16.msra.mxu0 %v8812_v2  ;;  %v290_v2 = vld [vmem:[#allocation2 + $0x2d0] sm:$0xff] }
 0x122   :  { %5034 = vmatpush2.bf16.msra.mxu1 %v9068_v3  ;;  %4994 = vmatprep.subr.bf16.mxu0 %v8797_v4  ;;  %v538_v3 = vld [vmem:[#allocation2 + $0xa90] sm:$0xff]  ;;  %v8703_v4 = vcombine.high %v554_v58, %v562_v60  ;;  %v8430_v17 = vcombine.low %v282_v1, %v290_v2 }
 0x123   :  { %5035 = vmatprep.subr.bf16.mxu1 %v9053_v9  ;;  %v8431_v9 = vcombine.high %v282_v1, %v290_v2  ;;  %v8686_v18 = vcombine.low %v538_v3, %v546_v6  ;;  %v442_v58 = vld [vmem:[#allocation2 + $0x790] sm:$0xff] }
 0x124   :  { %v698_v60 = vld [vmem:[#allocation2 + $0xf90] sm:$0xff] }
 0x125   :  { %4995 = vmatpush2.bf16.msra.mxu0 %v8796_v12  ;;  %v274_v12 = vld [vmem:[#allocation2 + $0x250] sm:$0xff] }
 0x126   :  { %5036 = vmatpush2.bf16.msra.mxu1 %v9052_v13  ;;  %4996 = vmatprep.subr.bf16.mxu0 %v8781_v14  ;;  %v522_v13 = vld [vmem:[#allocation2 + $0xa10] sm:$0xff]  ;;  %v8687_v14 = vcombine.high %v538_v3, %v546_v6  ;;  %v8414_v26 = vcombine.low %v266_v10, %v274_v12 }
 0x127   :  { %5037 = vmatprep.subr.bf16.mxu1 %v9037_v19  ;;  %v8415_v19 = vcombine.high %v266_v10, %v274_v12  ;;  %v426_v3 = vld [vmem:[#allocation2 + $0x710] sm:$0xff] }
 0x128   :  { %v682_v6 = vld [vmem:[#allocation2 + $0xf10] sm:$0xff] }
 0x129   :  { %4997 = vmatpush2.bf16.msra.mxu0 %v8780_v22  ;;  %v8671_v22 = vcombine.high %v522_v13, %v530_v15 }
 0x12a   :  { %5038 = vmatpush2.bf16.msra.mxu1 %v9036_v23  ;;  %4998 = vmatprep.subr.bf16.mxu0 %v8765_v24  ;;  %v258_v23 = vld [vmem:[#allocation2 + $0x1d0] sm:$0xff] }
 0x12b   :  { %5039 = vmatprep.subr.bf16.mxu1 %v9021_v29  ;;  %v506_v24 = vld [vmem:[#allocation2 + $0x990] sm:$0xff]  ;;  %v8670_v29 = vcombine.low %v522_v13, %v530_v15  ;;  %v8399_v30 = vcombine.high %v250_v21, %v258_v23  ;;  %v8398_v37 = vcombine.low %v250_v21, %v258_v23 }
 0x12c   :  { %v8655_v32 = vcombine.high %v506_v24, %v514_v25  ;;  %v410_v13 = vld [vmem:[#allocation2 + $0x690] sm:$0xff] }
 0x12d   :  { %4999 = vmatpush2.bf16.msra.mxu0 %v8764_v34  ;;  %v242_v34 = vld [vmem:[#allocation2 + $0x150] sm:$0xff] }
 0x12e   :  { %5040 = vmatpush2.bf16.msra.mxu1 %v9020_v35  ;;  %5000 = vmatprep.subr.bf16.mxu0 %v8749_v36  ;;  %v490_v35 = vld [vmem:[#allocation2 + $0x910] sm:$0xff]  ;;  %v8383_v5 = vcombine.high %v234_v33, %v242_v34 }
 0x12f   :  { %5041 = vmatprep.subr.bf16.mxu1 %v9005_v39  ;;  %v498_v36 = vld [vmem:[#allocation2 + $0x950] sm:$0xff]  ;;  %v8654_v39 = vcombine.low %v506_v24, %v514_v25 }
 0x130   :  { %v8639_v40 = vcombine.high %v490_v35, %v498_v36  ;;  %v666_v15 = vld [vmem:[#allocation2 + $0xe90] sm:$0xff] }
 0x131   :  { %5001 = vmatpush2.bf16.msra.mxu0 %v8748_v46  ;;  %v482_v46 = vld [vmem:[#allocation2 + $0x8d0] sm:$0xff] }
 0x132   :  { %5042 = vmatpush2.bf16.msra.mxu1 %v9004_v47  ;;  %5002 = vmatprep.subr.bf16.mxu0 %v8733_v48  ;;  %v8382_v47 = vcombine.low %v234_v33, %v242_v34  ;;  %v8638_v48 = vcombine.low %v490_v35, %v498_v36  ;;  %v8623_v50 = vcombine.high %v474_v45, %v482_v46  ;;  %v394_v23 = vld [vmem:[#allocation2 + $0x610] sm:$0xff] }
 0x133   :  { %5043 = vmatprep.subr.bf16.mxu1 %v8989_v52  ;;  %v210_v52 = vld [vmem:[#allocation2 + $0x50] sm:$0xff] }
 0x134   :  { %v8351_v56 = vcombine.high %v202_v51, %v210_v52  ;;  %v402_v24 = vld [vmem:[#allocation2 + $0x650] sm:$0xff] }
 0x135   :  { %5003 = vmatpush2.bf16.msra.mxu0 %v8732_v53  ;;  %v466_v53 = vld [vmem:[#allocation2 + $0x850] sm:$0xff] }
 0x136   :  { %5044 = vmatpush2.bf16.msra.mxu1 %v8988_v54  ;;  %5054 = vmatprep.subr.bf16.mxu0 %v8463_v55  ;;  %v8366_v54 = vcombine.low %v218_v41, %v226_v44  ;;  %v8622_v55 = vcombine.low %v474_v45, %v482_v46  ;;  %v8607_v57 = vcombine.high %v458_v20, %v466_v53  ;;  %v650_v25 = vld [vmem:[#allocation2 + $0xe10] sm:$0xff] }
 0x137   :  { %5095 = vmatprep.subr.bf16.mxu1 %v8719_v59  ;;  %v450_v59 = vld [vmem:[#allocation2 + $0x7d0] sm:$0xff] }
 0x138   :  { %5005 = vmatmul.mubr.bf16.vlgmr.msra.gmra.mxu0 %v10073_v31  ;;  %v8591_v1 = vcombine.high %v442_v58, %v450_v59  ;;  %v378_v34 = vld [vmem:[#allocation2 + $0x590] sm:$0xff] }
 0x139   :  { %5046 = vmatmul.mubr.bf16.vlgmr.msra.gmra.mxu1 %v10083_v43  ;;  %5055 = vmatpush1.bf16.msra.mxu0 %v8462_v61  ;;  %v706_v61 = vld [vmem:[#allocation2 + $0xfd0] sm:$0xff] }
 0x13a   :  { %5096 = vmatpush1.bf16.msra.mxu1 %v8718_v62  ;;  %5056 = vmatprep.subr.bf16.mxu0 %v8447_v0  ;;  %v8350_v62 = vcombine.low %v202_v51, %v210_v52  ;;  %v8606_v0 = vcombine.low %v458_v20, %v466_v53  ;;  %v8847_v2 = vcombine.high %v698_v60, %v706_v61  ;;  %v386_v35 = vld [vmem:[#allocation2 + $0x5d0] sm:$0xff] }
 0x13b   :  { %5097 = vmatprep.subr.bf16.mxu1 %v8703_v4  ;;  %5086 = vmatprep.mubr.bf16.mxu0 %v10052_v11  ;;  %v434_v4 = vld [vmem:[#allocation2 + $0x750] sm:$0xff] }
 0x13c   :  { %5127 = vmatprep.mubr.bf16.mxu1 %v10057_v16  ;;  %v8575_v10 = vcombine.high %v426_v3, %v434_v4  ;;  %v634_v36 = vld [vmem:[#allocation2 + $0xd90] sm:$0xff] }
 0x13d   :  { %5057 = vmatpush1.bf16.msra.mxu0 %v8446_v7  ;;  %v690_v7 = vld [vmem:[#allocation2 + $0xf50] sm:$0xff] }
 0x13e   :  { %5098 = vmatpush1.bf16.msra.mxu1 %v8702_v8  ;;  %5058 = vmatprep.subr.bf16.mxu0 %v8431_v9  ;;  %v8590_v8 = vcombine.low %v442_v58, %v450_v59  ;;  %v8846_v9 = vcombine.low %v698_v60, %v706_v61  ;;  %v8831_v12 = vcombine.high %v682_v6, %v690_v7  ;;  %v362_v44 = vld [vmem:[#allocation2 + $0x510] sm:$0xff] }
 0x13f   :  { %5099 = vmatprep.subr.bf16.mxu1 %v8687_v14  ;;  %v418_v14 = vld [vmem:[#allocation2 + $0x6d0] sm:$0xff] }
 0x140   :  { %v8559_v21 = vcombine.high %v410_v13, %v418_v14  ;;  %v370_v45 = vld [vmem:[#allocation2 + $0x550] sm:$0xff] }
 0x141   :  { %5059 = vmatpush1.bf16.msra.mxu0 %v8430_v17  ;;  %v674_v17 = vld [vmem:[#allocation2 + $0xed0] sm:$0xff] }
 0x142   :  { %5100 = vmatpush1.bf16.msra.mxu1 %v8686_v18  ;;  %5060 = vmatprep.subr.bf16.mxu0 %v8415_v19  ;;  %v8574_v18 = vcombine.low %v426_v3, %v434_v4  ;;  %v8830_v19 = vcombine.low %v682_v6, %v690_v7  ;;  %v618_v46 = vld [vmem:[#allocation2 + $0xd10] sm:$0xff]  ;;  %v315_v7 = vld [vmem:[#allocation2 + $0x398] sm:$0xff] }
 0x143   :  { %5101 = vmatprep.subr.bf16.mxu1 %v8671_v22  ;;  %v8815_v22 = vcombine.high %v666_v15, %v674_v17  ;;  %v346_v52 = vld [vmem:[#allocation2 + $0x490] sm:$0xff] }
 0x144   :  { %v354_v20 = vld [vmem:[#allocation2 + $0x4d0] sm:$0xff] }
 0x145   :  { %5061 = vmatpush1.bf16.msra.mxu0 %v8414_v26  ;;  %v658_v26 = vld [vmem:[#allocation2 + $0xe50] sm:$0xff] }
 0x146   :  { %5102 = vmatpush1.bf16.msra.mxu1 %v8670_v29  ;;  %5062 = vmatprep.subr.bf16.mxu0 %v8399_v30  ;;  %v8558_v29 = vcombine.low %v410_v13, %v418_v14  ;;  %v8814_v30 = vcombine.low %v666_v15, %v674_v17  ;;  %v8799_v33 = vcombine.high %v650_v25, %v658_v26  ;;  %v602_v53 = vld [vmem:[#allocation2 + $0xc90] sm:$0xff]  ;;  %v299_v17 = vld [vmem:[#allocation2 + $0x318] sm:$0xff] }
 0x147   :  { %5103 = vmatprep.subr.bf16.mxu1 %v8655_v32  ;;  %v8543_v32 = vcombine.high %v394_v23, %v402_v24  ;;  %v330_v59 = vld [vmem:[#allocation2 + $0x410] sm:$0xff] }
 0x148   :  { %v338_v60 = vld [vmem:[#allocation2 + $0x450] sm:$0xff] }
 0x149   :  { %5063 = vmatpush1.bf16.msra.mxu0 %v8398_v37  ;;  %v642_v37 = vld [vmem:[#allocation2 + $0xdd0] sm:$0xff] }
 0x14a   :  { %5104 = vmatpush1.bf16.msra.mxu1 %v8654_v39  ;;  %5064 = vmatprep.subr.bf16.mxu0 %v8383_v5  ;;  %v8542_v39 = vcombine.low %v394_v23, %v402_v24  ;;  %v8798_v5 = vcombine.low %v650_v25, %v658_v26  ;;  %v8783_v41 = vcombine.high %v634_v36, %v642_v37  ;;  %v586_v61 = vld [vmem:[#allocation2 + $0xc10] sm:$0xff] }
 0x14b   :  { %5105 = vmatprep.subr.bf16.mxu1 %v8639_v40  ;;  %v8527_v40 = vcombine.high %v378_v34, %v386_v35  ;;  %v826_v4 = vld [vmem:[#allocation2 + $0x1390] sm:$0xff] }
 0x14c   :  { %v834_v6 = vld [vmem:[#allocation2 + $0x13d0] sm:$0xff] }
 0x14d   :  { %5065 = vmatpush1.bf16.msra.mxu0 %v8382_v47  ;;  %v626_v47 = vld [vmem:[#allocation2 + $0xd50] sm:$0xff] }
 0x14e   :  { %5106 = vmatpush1.bf16.msra.mxu1 %v8638_v48  ;;  %5066 = vmatprep.subr.bf16.mxu0 %v8367_v49  ;;  %v8526_v48 = vcombine.low %v378_v34, %v386_v35  ;;  %v8782_v49 = vcombine.low %v634_v36, %v642_v37  ;;  %v8767_v51 = vcombine.high %v618_v46, %v626_v47  ;;  %v810_v14 = vld [vmem:[#allocation2 + $0x1310] sm:$0xff] }
 0x14f   :  { %5107 = vmatprep.subr.bf16.mxu1 %v8623_v50  ;;  %v8511_v50 = vcombine.high %v362_v44, %v370_v45  ;;  %v818_v15 = vld [vmem:[#allocation2 + $0x1350] sm:$0xff] }
 0x150   :  { %v794_v24 = vld [vmem:[#allocation2 + $0x1290] sm:$0xff] }
 0x151   :  { %5067 = vmatpush1.bf16.msra.mxu0 %v8366_v54  ;;  %v610_v54 = vld [vmem:[#allocation2 + $0xcd0] sm:$0xff] }
 0x152   :  { %5108 = vmatpush1.bf16.msra.mxu1 %v8622_v55  ;;  %5068 = vmatprep.subr.bf16.mxu0 %v8351_v56  ;;  %v8510_v55 = vcombine.low %v362_v44, %v370_v45  ;;  %v8766_v56 = vcombine.low %v618_v46, %v626_v47  ;;  %v8751_v58 = vcombine.high %v602_v53, %v610_v54  ;;  %v802_v25 = vld [vmem:[#allocation2 + $0x12d0] sm:$0xff]  ;;  %v267_v46 = vld [vmem:[#allocation2 + $0x218] sm:$0xff] }
 0x153   :  { %5109 = vmatprep.subr.bf16.mxu1 %v8607_v57  ;;  %v8495_v57 = vcombine.high %v346_v52, %v354_v20  ;;  %v8943_v37 = vcombine.high %v794_v24, %v802_v25  ;;  %v275_v47 = vld [vmem:[#allocation2 + $0x258] sm:$0xff] }
 0x155   :  { %5069 = vmatpush1.bf16.msra.mxu0 %v8350_v62  ;;  %v594_v62 = vld [vmem:[#allocation2 + $0xc50] sm:$0xff] }
 0x156   :  { %5110 = vmatpush1.bf16.msra.mxu1 %v8606_v0  ;;  %5070 = vmatprep.subr.bf16.mxu0 %v8591_v1  ;;  %v8494_v0 = vcombine.low %v346_v52, %v354_v20  ;;  %v8750_v1 = vcombine.low %v602_v53, %v610_v54  ;;  %v8735_v3 = vcombine.high %v586_v61, %v594_v62  ;;  %v762_v53 = vld [vmem:[#allocation2 + $0x1190] sm:$0xff] }
 0x157   :  { %5111 = vmatprep.subr.bf16.mxu1 %v8847_v2  ;;  %v8479_v2 = vcombine.high %v330_v59, %v338_v60  ;;  %v8417_v20 = vcombine.high %v267_v46, %v275_v47  ;;  %v770_v54 = vld [vmem:[#allocation2 + $0x11d0] sm:$0xff] }
 0x159   :  { %5071 = vmatpush2.bf16.msra.mxu0 %v8590_v8  ;;  %v323_v8 = vld [vmem:[#allocation2 + $0x3d8] sm:$0xff] }
 0x15a   :  { %5112 = vmatpush2.bf16.msra.mxu1 %v8846_v9  ;;  %5072 = vmatprep.subr.bf16.mxu0 %v8575_v10  ;;  %v8478_v9 = vcombine.low %v330_v59, %v338_v60  ;;  %v8734_v10 = vcombine.low %v586_v61, %v594_v62  ;;  %v8465_v13 = vcombine.high %v315_v7, %v323_v8  ;;  %v746_v62 = vld [vmem:[#allocation2 + $0x1110] sm:$0xff] }
 0x15b   :  { %5113 = vmatprep.subr.bf16.mxu1 %v8831_v12  ;;  %v8975_v12 = vcombine.high %v826_v4, %v834_v6  ;;  %v8416_v59 = vcombine.low %v267_v46, %v275_v47  ;;  %v8911_v60 = vcombine.high %v762_v53, %v770_v54 }
 0x15d   :  { %5073 = vmatpush2.bf16.msra.mxu0 %v8574_v18  ;;  %v307_v18 = vld [vmem:[#allocation2 + $0x358] sm:$0xff] }
 0x15e   :  { %5114 = vmatpush2.bf16.msra.mxu1 %v8830_v19  ;;  %5074 = vmatprep.subr.bf16.mxu0 %v8559_v21  ;;  %v8974_v19 = vcombine.low %v826_v4, %v834_v6  ;;  %v8464_v21 = vcombine.low %v315_v7, %v323_v8  ;;  %v8449_v23 = vcombine.high %v299_v17, %v307_v18  ;;  %v730_v8 = vld [vmem:[#allocation2 + $0x1090] sm:$0xff] }
 0x15f   :  { %5115 = vmatprep.subr.bf16.mxu1 %v8815_v22  ;;  %v8959_v22 = vcombine.high %v810_v14, %v818_v15  ;;  %v8448_v36 = vcombine.low %v299_v17, %v307_v18  ;;  %v714_v18 = vld [vmem:[#allocation2 + $0x1010] sm:$0xff] }
 0x161   :  { %5075 = vmatpush2.bf16.msra.mxu0 %v8558_v29  ;;  %v283_v29 = vld [vmem:[#allocation2 + $0x298] sm:$0xff] }
 0x162   :  { %5116 = vmatpush2.bf16.msra.mxu1 %v8814_v30  ;;  %5076 = vmatprep.subr.bf16.mxu0 %v8543_v32  ;;  %v291_v30 = vld [vmem:[#allocation2 + $0x2d8] sm:$0xff] }
 0x163   :  { %5117 = vmatprep.subr.bf16.mxu1 %v8799_v33  ;;  %v8958_v33 = vcombine.low %v810_v14, %v818_v15 }
 0x165   :  { %5077 = vmatpush2.bf16.msra.mxu0 %v8542_v39 }
 0x166   :  { %5118 = vmatpush2.bf16.msra.mxu1 %v8798_v5  ;;  %5078 = vmatprep.subr.bf16.mxu0 %v8527_v40  ;;  %v8433_v5 = vcombine.high %v283_v29, %v291_v30  ;;  %v778_v40 = vld [vmem:[#allocation2 + $0x1210] sm:$0xff] }
 0x167   :  { %5119 = vmatprep.subr.bf16.mxu1 %v8783_v41  ;;  %v786_v41 = vld [vmem:[#allocation2 + $0x1250] sm:$0xff] }
 0x168   :  { %v8927_v52 = vcombine.high %v778_v40, %v786_v41 }
 0x169   :  { %5079 = vmatpush2.bf16.msra.mxu0 %v8526_v48  ;;  %v8942_v48 = vcombine.low %v794_v24, %v802_v25 }
 0x16a   :  { %5120 = vmatpush2.bf16.msra.mxu1 %v8782_v49  ;;  %5080 = vmatprep.subr.bf16.mxu0 %v8511_v50 }
 0x16b   :  { %5121 = vmatprep.subr.bf16.mxu1 %v8767_v51  ;;  %v8432_v51 = vcombine.low %v283_v29, %v291_v30  ;;  %v954_v29 = vld [vmem:[#allocation2 + $0x1790] sm:$0xff] }
 0x16c   :  { %v962_v30 = vld [vmem:[#allocation2 + $0x17d0] sm:$0xff] }
 0x16d   :  { %5081 = vmatpush2.bf16.msra.mxu0 %v8510_v55  ;;  %v9102_v46 = vcombine.low %v954_v29, %v962_v30 }
 0x16e   :  { %5122 = vmatpush2.bf16.msra.mxu1 %v8766_v56  ;;  %5082 = vmatprep.subr.bf16.mxu0 %v8495_v57  ;;  %v251_v56 = vld [vmem:[#allocation2 + $0x198] sm:$0xff] }
 0x16f   :  { %5123 = vmatprep.subr.bf16.mxu1 %v8751_v58  ;;  %v259_v57 = vld [vmem:[#allocation2 + $0x1d8] sm:$0xff]  ;;  %v8926_v58 = vcombine.low %v778_v40, %v786_v41  ;;  %v946_v40 = vld [vmem:[#allocation2 + $0x1750] sm:$0xff] }
 0x170   :  { %v8401_v61 = vcombine.high %v251_v56, %v259_v57  ;;  %v8400_v4 = vcombine.low %v251_v56, %v259_v57  ;;  %v427_v41 = vld [vmem:[#allocation2 + $0x718] sm:$0xff]  ;;  %v906_v57 = vld [vmem:[#allocation2 + $0x1610] sm:$0xff] }
 0x171   :  { %5083 = vmatpush2.bf16.msra.mxu0 %v8494_v0  ;;  %v754_v0 = vld [vmem:[#allocation2 + $0x1150] sm:$0xff] }
 0x172   :  { %5124 = vmatpush2.bf16.msra.mxu1 %v8750_v1  ;;  %5084 = vmatprep.subr.bf16.mxu0 %v8479_v2  ;;  %v235_v1 = vld [vmem:[#allocation2 + $0x118] sm:$0xff]  ;;  %v8895_v6 = vcombine.high %v746_v62, %v754_v0 }
 0x173   :  { %5125 = vmatprep.subr.bf16.mxu1 %v8735_v3  ;;  %v243_v2 = vld [vmem:[#allocation2 + $0x158] sm:$0xff]  ;;  %v8910_v3 = vcombine.low %v762_v53, %v770_v54 }
 0x174   :  { %v8385_v7 = vcombine.high %v235_v1, %v243_v2  ;;  %v8384_v14 = vcombine.low %v235_v1, %v243_v2  ;;  %v890_v2 = vld [vmem:[#allocation2 + $0x1590] sm:$0xff] }
 0x175   :  { %5085 = vmatpush2.bf16.msra.mxu0 %v8478_v9  ;;  %v738_v9 = vld [vmem:[#allocation2 + $0x10d0] sm:$0xff] }
 0x176   :  { %5126 = vmatpush2.bf16.msra.mxu1 %v8734_v10  ;;  %5136 = vmatprep.subr.bf16.mxu0 %v8975_v12  ;;  %v219_v10 = vld [vmem:[#allocation2 + $0x98] sm:$0xff]  ;;  %v8879_v15 = vcombine.high %v730_v8, %v738_v9 }
 0x177   :  { %5177 = vmatprep.subr.bf16.mxu1 %v8465_v13  ;;  %v227_v12 = vld [vmem:[#allocation2 + $0xd8] sm:$0xff]  ;;  %v8894_v13 = vcombine.low %v746_v62, %v754_v0 }
 0x178   :  { %v4842_v26 = vpop.f32.mrf.mxu0  ;;  %5087 = vmatmul.mubr.bf16.vlgmr.msra.gmra.mxu0 %v10069_v28  ;;  %v8369_v17 = vcombine.high %v219_v10, %v227_v12  ;;  %v8368_v24 = vcombine.low %v219_v10, %v227_v12  ;;  %v874_v12 = vld [vmem:[#allocation2 + $0x1510] sm:$0xff] }
 0x179   :  { %v4883_v32 = vpop.f32.mrf.mxu1  ;;  %5128 = vmatmul.mubr.bf16.vlgmr.msra.gmra.mxu1 %v10073_v31  ;;  %5137 = vmatpush1.bf16.msra.mxu0 %v8974_v19  ;;  %v722_v19 = vld [vmem:[#allocation2 + $0x1050] sm:$0xff] }
 0x17a   :  { %v10116_v34 = vadd.f32 %v4883_v32, %v4842_v26  ;;  %5178 = vmatpush1.bf16.msra.mxu1 %v8464_v21  ;;  %v4844_v35 = vpop.f32.mrf.mxu0  ;;  %5138 = vmatprep.subr.bf16.mxu0 %v8959_v22  ;;  %v203_v21 = vld [vmem:[#allocation2 + $0x18] sm:$0xff]  ;;  %v8863_v25 = vcombine.high %v714_v18, %v722_v19 }
 0x17b   :  { %v4885_v39 = vpop.f32.mrf.mxu1  ;;  %5179 = vmatprep.subr.bf16.mxu1 %v8449_v23  ;;  %5168 = vmatprep.mubr.bf16.mxu0 %v10075_v63  ;;  %v211_v22 = vld [vmem:[#allocation2 + $0x58] sm:$0xff]  ;;  %v8878_v23 = vcombine.low %v730_v8, %v738_v9 }
 0x17c   :  { %v10119_v44 = vadd.f32 %v4885_v39, %v4844_v35  ;;  %v4846_v45 = vpop.f32.mrf.mxu0  ;;  %5209 = vmatprep.mubr.bf16.mxu1 %v10052_v11  ;;  %v8353_v26 = vcombine.high %v203_v21, %v211_v22  ;;  %v443_v32 = vld [vmem:[#allocation2 + $0x798] sm:$0xff]  ;;  %v8862_v35 = vcombine.low %v714_v18, %v722_v19 }
 0x17d   :  { %5139 = vmatpush1.bf16.msra.mxu0 %v8958_v33  ;;  %v4887_v49 = vpop.f32.mrf.mxu1  ;;  %v451_v33 = vld [vmem:[#allocation2 + $0x7d8] sm:$0xff] }
 0x17e   :  { %5180 = vmatpush1.bf16.msra.mxu1 %v8448_v36  ;;  %v4847_v50 = vpop.f32.mrf.mxu0  ;;  %5140 = vmatprep.subr.bf16.mxu0 %v8943_v37  ;;  %v8352_v36 = vcombine.low %v203_v21, %v211_v22  ;;  %v9103_v37 = vcombine.high %v954_v29, %v962_v30  ;;  %v8593_v39 = vcombine.high %v443_v32, %v451_v33  ;;  %v435_v45 = vld [vmem:[#allocation2 + $0x758] sm:$0xff]  ;;  %v858_v22 = vld [vmem:[#allocation2 + $0x1490] sm:$0xff] }
 0x17f   :  { %5181 = vmatprep.subr.bf16.mxu1 %v8433_v5  ;;  %v4888_v55 = vpop.f32.mrf.mxu1  ;;  %v938_v5 = vld [vmem:[#allocation2 + $0x1710] sm:$0xff]  ;;  %v8592_v47 = vcombine.low %v443_v32, %v451_v33  ;;  %v8577_v49 = vcombine.high %v427_v41, %v435_v45  ;;  %v8576_v54 = vcombine.low %v427_v41, %v435_v45  ;;  %v571_v45 = vld [vmem:[#allocation2 + $0xb98] sm:$0xff] }
 0x180   :  { %v922_v50 = vld [vmem:[#allocation2 + $0x1690] sm:$0xff]  ;;  %v9086_v53 = vcombine.low %v938_v5, %v946_v40 }
 0x181   :  { %5141 = vmatpush1.bf16.msra.mxu0 %v8942_v48  ;;  %v9087_v48 = vcombine.high %v938_v5, %v946_v40  ;;  %v842_v33 = vld [vmem:[#allocation2 + $0x1410] sm:$0xff] }
 0x182   :  { %5182 = vmatpush1.bf16.msra.mxu1 %v8432_v51  ;;  %5142 = vmatprep.subr.bf16.mxu0 %v8927_v52  ;;  %v930_v51 = vld [vmem:[#allocation2 + $0x16d0] sm:$0xff]  ;;  %v411_v52 = vld [vmem:[#allocation2 + $0x698] sm:$0xff] }
 0x183   :  { %5183 = vmatprep.subr.bf16.mxu1 %v8417_v20  ;;  %v419_v20 = vld [vmem:[#allocation2 + $0x6d8] sm:$0xff]  ;;  %v9071_v55 = vcombine.high %v922_v50, %v930_v51 }
 0x184   :  { %v8561_v56 = vcombine.high %v411_v52, %v419_v20  ;;  %v8560_v62 = vcombine.low %v411_v52, %v419_v20 }
 0x185   :  { %5143 = vmatpush1.bf16.msra.mxu0 %v8926_v58  ;;  %v914_v58 = vld [vmem:[#allocation2 + $0x1650] sm:$0xff] }
 0x186   :  { %5184 = vmatpush1.bf16.msra.mxu1 %v8416_v59  ;;  %5144 = vmatprep.subr.bf16.mxu0 %v8911_v60  ;;  %v395_v59 = vld [vmem:[#allocation2 + $0x618] sm:$0xff]  ;;  %v9055_v0 = vcombine.high %v906_v57, %v914_v58 }
 0x187   :  { %5185 = vmatprep.subr.bf16.mxu1 %v8401_v61  ;;  %v403_v60 = vld [vmem:[#allocation2 + $0x658] sm:$0xff]  ;;  %v9070_v61 = vcombine.low %v922_v50, %v930_v51  ;;  %v5805_v50 = vpop.xlane.xlu0 %5804 }
 0x188   :  { %v8545_v1 = vcombine.high %v395_v59, %v403_v60  ;;  %v8544_v8 = vcombine.low %v395_v59, %v403_v60  ;;  %v5809_v20 = vmul.f32 0.0625, %v5805_v50 }
 0x189   :  { %5145 = vmatpush1.bf16.msra.mxu0 %v8910_v3  ;;  %v898_v3 = vld [vmem:[#allocation2 + $0x15d0] sm:$0xff] }
 0x18a   :  { %5186 = vmatpush1.bf16.msra.mxu1 %v8400_v4  ;;  %5146 = vmatprep.subr.bf16.mxu0 %v8895_v6  ;;  %v379_v4 = vld [vmem:[#allocation2 + $0x598] sm:$0xff]  ;;  %v9039_v9 = vcombine.high %v890_v2, %v898_v3 }
 0x18b   :  { %5187 = vmatprep.subr.bf16.mxu1 %v8385_v7  ;;  %v387_v6 = vld [vmem:[#allocation2 + $0x5d8] sm:$0xff]  ;;  %v9054_v7 = vcombine.low %v906_v57, %v914_v58  ;;  %v10123_v58 = vsub.f32 %v10092_v27, %v5809_v20 }
 0x18c   :  { %v8529_v10 = vcombine.high %v379_v4, %v387_v6  ;;  %v8528_v18 = vcombine.low %v379_v4, %v387_v6  ;;  %v819_v57 = vld [vmem:[#allocation2 + $0x1358] sm:$0xff] }
 0x18d   :  { %5147 = vmatpush1.bf16.msra.mxu0 %v8894_v13  ;;  %v882_v13 = vld [vmem:[#allocation2 + $0x1550] sm:$0xff]  ;;  %v539_v4 = vld [vmem:[#allocation2 + $0xa98] sm:$0xff] }
 0x18e   :  { %5188 = vmatpush1.bf16.msra.mxu1 %v8384_v14  ;;  %5148 = vmatprep.subr.bf16.mxu0 %v8879_v15  ;;  %v363_v14 = vld [vmem:[#allocation2 + $0x518] sm:$0xff]  ;;  %v9023_v19 = vcombine.high %v874_v12, %v882_v13 }
 0x18f   :  { %5189 = vmatprep.subr.bf16.mxu1 %v8369_v17  ;;  %v371_v15 = vld [vmem:[#allocation2 + $0x558] sm:$0xff]  ;;  %v9038_v17 = vcombine.low %v890_v2, %v898_v3  ;;  %v5815_v2 = vmul.f32 %v10123_v58, %v10123_v58 }
 0x190   :  { %v8513_v21 = vcombine.high %v363_v14, %v371_v15  ;;  %v8512_v29 = vcombine.low %v363_v14, %v371_v15  ;;  %v547_v6 = vld [vmem:[#allocation2 + $0xad8] sm:$0xff] }
 0x191   :  { %5149 = vmatpush1.bf16.msra.mxu0 %v8878_v23  ;;  %v866_v23 = vld [vmem:[#allocation2 + $0x14d0] sm:$0xff]  ;;  %v795_v27 = vld [vmem:[#allocation2 + $0x1298] sm:$0xff] }
 0x192   :  { %5190 = vmatpush1.bf16.msra.mxu1 %v8368_v24  ;;  %5150 = vmatprep.subr.bf16.mxu0 %v8863_v25  ;;  %v347_v24 = vld [vmem:[#allocation2 + $0x498] sm:$0xff]  ;;  %v9007_v30 = vcombine.high %v858_v22, %v866_v23 }
 0x193   :  { %5191 = vmatprep.subr.bf16.mxu1 %v8353_v26  ;;  %v355_v25 = vld [vmem:[#allocation2 + $0x4d8] sm:$0xff]  ;;  %v9022_v26 = vcombine.low %v874_v12, %v882_v13 }
 0x194   :  { %v8497_v32 = vcombine.high %v347_v24, %v355_v25  ;;  %v8496_v5 = vcombine.low %v347_v24, %v355_v25  ;;  %v531_v24 = vld [vmem:[#allocation2 + $0xa58] sm:$0xff] }
 0x195   :  { %5151 = vmatpush1.bf16.msra.mxu0 %v8862_v35  ;;  %v850_v35 = vld [vmem:[#allocation2 + $0x1450] sm:$0xff]  ;;  %v499_v20 = vld [vmem:[#allocation2 + $0x958] sm:$0xff] }
 0x196   :  { %5192 = vmatpush1.bf16.msra.mxu1 %v8352_v36  ;;  %5152 = vmatprep.subr.bf16.mxu0 %v9103_v37  ;;  %v331_v36 = vld [vmem:[#allocation2 + $0x418] sm:$0xff]  ;;  %v8991_v40 = vcombine.high %v842_v33, %v850_v35 }
 0x197   :  { %5193 = vmatprep.subr.bf16.mxu1 %v8593_v39  ;;  %v339_v37 = vld [vmem:[#allocation2 + $0x458] sm:$0xff]  ;;  %v9006_v39 = vcombine.low %v858_v22, %v866_v23 }
 0x198   :  { %v8481_v41 = vcombine.high %v331_v36, %v339_v37  ;;  %v8480_v51 = vcombine.low %v331_v36, %v339_v37  ;;  %v523_v23 = vld [vmem:[#allocation2 + $0xa18] sm:$0xff] }
 0x199   :  { %5153 = vmatpush2.bf16.msra.mxu0 %v9102_v46  ;;  %v579_v46 = vld [vmem:[#allocation2 + $0xbd8] sm:$0xff]  ;;  %v8673_v37 = vcombine.high %v523_v23, %v531_v24 }
 0x19a   :  { %5194 = vmatpush2.bf16.msra.mxu1 %v8592_v47  ;;  %5154 = vmatprep.subr.bf16.mxu0 %v9087_v48  ;;  %v827_v47 = vld [vmem:[#allocation2 + $0x1398] sm:$0xff]  ;;  %v8721_v52 = vcombine.high %v571_v45, %v579_v46  ;;  %v8720_v59 = vcombine.low %v571_v45, %v579_v46 }
 0x19b   :  { %5195 = vmatprep.subr.bf16.mxu1 %v8577_v49  ;;  %v835_v48 = vld [vmem:[#allocation2 + $0x13d8] sm:$0xff]  ;;  %v8990_v49 = vcombine.low %v842_v33, %v850_v35 }
 0x19c   :  { %v763_v46 = vld [vmem:[#allocation2 + $0x1198] sm:$0xff] }
 0x19d   :  { %5155 = vmatpush2.bf16.msra.mxu0 %v9086_v53  ;;  %v8977_v53 = vcombine.high %v827_v47, %v835_v48 }
 0x19e   :  { %5196 = vmatpush2.bf16.msra.mxu1 %v8576_v54  ;;  %5156 = vmatprep.subr.bf16.mxu0 %v9071_v55  ;;  %v555_v54 = vld [vmem:[#allocation2 + $0xb18] sm:$0xff] }
 0x19f   :  { %5197 = vmatprep.subr.bf16.mxu1 %v8561_v56  ;;  %v563_v55 = vld [vmem:[#allocation2 + $0xb58] sm:$0xff] }
 0x1a0   :  { %v811_v56 = vld [vmem:[#allocation2 + $0x1318] sm:$0xff]  ;;  %v5801_v60 = vpop.xlane.xlu0 %5800  ;;  %v8704_v13 = vcombine.low %v555_v54, %v563_v55 }
 0x1a1   :  { %5157 = vmatpush2.bf16.msra.mxu0 %v9070_v61  ;;  %v8976_v61 = vcombine.low %v827_v47, %v835_v48  ;;  %v8961_v3 = vcombine.high %v811_v56, %v819_v57  ;;  %v771_v47 = vld [vmem:[#allocation2 + $0x11d8] sm:$0xff]  ;;  %v8672_v48 = vcombine.low %v523_v23, %v531_v24 }
 0x1a2   :  { %5198 = vmatpush2.bf16.msra.mxu1 %v8560_v62  ;;  %5158 = vmatprep.subr.bf16.mxu0 %v9055_v0  ;;  %v8705_v62 = vcombine.high %v555_v54, %v563_v55  ;;  %v5808_v0 = vmul.f32 0.0625, %v5801_v60  ;;  %v755_v54 = vld [vmem:[#allocation2 + $0x1158] sm:$0xff] }
 0x1a3   :  { %5199 = vmatprep.subr.bf16.mxu1 %v8545_v1  ;;  %v5798_v1 = vpop.xlane.xlu1 %5797  ;;  %v475_v60 = vld [vmem:[#allocation2 + $0x898] sm:$0xff] }
 0x1a5   :  { %5159 = vmatpush2.bf16.msra.mxu0 %v9054_v7  ;;  %v5807_v7 = vmul.f32 0.0625, %v5798_v1 }
 0x1a6   :  { %5200 = vmatpush2.bf16.msra.mxu1 %v8544_v8  ;;  %5160 = vmatprep.subr.bf16.mxu0 %v9039_v9  ;;  %v803_v9 = vld [vmem:[#allocation2 + $0x12d8] sm:$0xff] }
 0x1a7   :  { %5201 = vmatprep.subr.bf16.mxu1 %v8529_v10  ;;  %v10129_v10 = vsub.f32 %v10099_v38, %v5808_v0  ;;  %v10138_v15 = vsub.f32 %v10106_v42, %v5807_v7  ;;  %v8689_v38 = vcombine.high %v539_v4, %v547_v6  ;;  %v8945_v22 = vcombine.high %v795_v27, %v803_v9  ;;  %v739_v0 = vld [vmem:[#allocation2 + $0x10d8] sm:$0xff] }
 0x1a8   :  { %v8944_v36 = vcombine.low %v795_v27, %v803_v9  ;;  %v467_v7 = vld [vmem:[#allocation2 + $0x858] sm:$0xff] }
 0x1a9   :  { %5161 = vmatpush2.bf16.msra.mxu0 %v9038_v17  ;;  %v5822_v17 = vsel %vm5802_vm0, %v5815_v2, 0.0  ;;  %v5813_v33 = vmul.f32 %v10138_v15, %v10138_v15  ;;  %v723_v27 = vld [vmem:[#allocation2 + $0x1058] sm:$0xff] }
 0x1aa   :  { %5202 = vmatpush2.bf16.msra.mxu1 %v8528_v18  ;;  %5162 = vmatprep.subr.bf16.mxu0 %v9023_v19  ;;  %v8960_v19 = vcombine.low %v811_v56, %v819_v57  ;;  %v8912_v56 = vcombine.low %v763_v46, %v771_v47 }
 0x1ab   :  { %5203 = vmatprep.subr.bf16.mxu1 %v8513_v21  ;;  %5823 = vadd.xlane.f32.xlu1 %v5822_v17  ;;  %v5816_v45 = vsel %vm5795_vm1, %v5813_v33, 0.0 }
 0x1ad   :  { %5163 = vmatpush2.bf16.msra.mxu0 %v9022_v26  ;;  %v779_v26 = vld [vmem:[#allocation2 + $0x1218] sm:$0xff] }
 0x1ae   :  { %5204 = vmatpush2.bf16.msra.mxu1 %v8512_v29  ;;  %5164 = vmatprep.subr.bf16.mxu0 %v9007_v30  ;;  %v787_v29 = vld [vmem:[#allocation2 + $0x1258] sm:$0xff] }
 0x1af   :  { %5205 = vmatprep.subr.bf16.mxu1 %v8497_v32  ;;  %v8688_v32 = vcombine.low %v539_v4, %v547_v6  ;;  %5817 = vadd.xlane.f32.xlu1 %v5816_v45  ;;  %v459_v6 = vld [vmem:[#allocation2 + $0x818] sm:$0xff] }
 0x1b0   :  { %v8609_v17 = vcombine.high %v459_v6, %v467_v7  ;;  %v8608_v23 = vcombine.low %v459_v6, %v467_v7  ;;  %v883_v6 = vld [vmem:[#allocation2 + $0x1558] sm:$0xff] }
 0x1b1   :  { %5165 = vmatpush2.bf16.msra.mxu0 %v9006_v39  ;;  %v8929_v39 = vcombine.high %v779_v26, %v787_v29 }
 0x1b2   :  { %5206 = vmatpush2.bf16.msra.mxu1 %v8496_v5  ;;  %5166 = vmatprep.subr.bf16.mxu0 %v8991_v40  ;;  %v507_v5 = vld [vmem:[#allocation2 + $0x998] sm:$0xff] }
 0x1b3   :  { %5207 = vmatprep.subr.bf16.mxu1 %v8481_v41  ;;  %v515_v40 = vld [vmem:[#allocation2 + $0x9d8] sm:$0xff] }
 0x1b4   :  { %v8657_v50 = vcombine.high %v507_v5, %v515_v40  ;;  %v8656_v55 = vcombine.low %v507_v5, %v515_v40  ;;  %v675_v5 = vld [vmem:[#allocation2 + $0xed8] sm:$0xff] }
 0x1b5   :  { %5167 = vmatpush2.bf16.msra.mxu0 %v8990_v49  ;;  %v8928_v49 = vcombine.low %v779_v26, %v787_v29  ;;  %v683_v29 = vld [vmem:[#allocation2 + $0xf18] sm:$0xff] }
 0x1b6   :  { %5208 = vmatpush2.bf16.msra.mxu1 %v8480_v51  ;;  %5218 = vmatprep.subr.bf16.mxu0 %v8721_v52  ;;  %v8913_v51 = vcombine.high %v763_v46, %v771_v47  ;;  %v491_v52 = vld [vmem:[#allocation2 + $0x918] sm:$0xff] }
 0x1b7   :  { %5259 = vmatprep.subr.bf16.mxu1 %v8977_v53  ;;  %v747_v53 = vld [vmem:[#allocation2 + $0x1118] sm:$0xff]  ;;  %v8641_v57 = vcombine.high %v491_v52, %v499_v20  ;;  %v8640_v1 = vcombine.low %v491_v52, %v499_v20 }
 0x1b8   :  { %v4924_v8 = vpop.f32.mrf.mxu0  ;;  %5169 = vmatmul.mubr.bf16.vlgmr.msra.gmra.mxu0 %v10083_v43  ;;  %v8896_v2 = vcombine.low %v747_v53, %v755_v54  ;;  %v923_v40 = vld [vmem:[#allocation2 + $0x1698] sm:$0xff] }
 0x1b9   :  { %v10132_v12 = vadd.f32 %v4924_v8, %v10116_v34  ;;  %5210 = vmatmul.mubr.bf16.vlgmr.msra.gmra.mxu1 %v10069_v28  ;;  %5219 = vmatpush1.bf16.msra.mxu0 %v8720_v59  ;;  %v10135_v14 = vpop.f32.mrf.mxu1  ;;  %v5814_v34 = vmul.f32 %v10129_v10, %v10129_v10  ;;  %v8897_v59 = vcombine.high %v747_v53, %v755_v54  ;;  %v715_v8 = vld [vmem:[#allocation2 + $0x1018] sm:$0xff] }
 0x1ba   :  { %5260 = vmatpush1.bf16.msra.mxu1 %v8976_v61  ;;  %v4926_v18 = vpop.f32.mrf.mxu0  ;;  %5220 = vmatprep.subr.bf16.mxu0 %v8705_v62  ;;  %v483_v61 = vld [vmem:[#allocation2 + $0x8d8] sm:$0xff]  ;;  %v8864_v24 = vcombine.low %v715_v8, %v723_v27 }
 0x1bb   :  { %v10144_v21 = vadd.f32 %v4926_v18, %v10119_v44  ;;  %5261 = vmatprep.subr.bf16.mxu1 %v8961_v3  ;;  %v10146_v25 = vpop.f32.mrf.mxu1  ;;  %5250 = vmatprep.mubr.bf16.mxu0 %v10057_v16  ;;  %v5819_v30 = vsel %vm5795_vm1, %v5814_v34, 0.0  ;;  %v731_v62 = vld [vmem:[#allocation2 + $0x1098] sm:$0xff]  ;;  %v8625_v3 = vcombine.high %v475_v60, %v483_v61  ;;  %v8624_v9 = vcombine.low %v475_v60, %v483_v61 }
 0x1bc   :  { %v4928_v42 = vpop.f32.mrf.mxu0  ;;  %5291 = vmatprep.mubr.bf16.mxu1 %v10075_v63  ;;  %5820 = vadd.xlane.f32.xlu0 %v5819_v30  ;;  %v8881_v4 = vcombine.high %v731_v62, %v739_v0  ;;  %v8865_v18 = vcombine.high %v715_v8, %v723_v27  ;;  %v955_v34 = vld [vmem:[#allocation2 + $0x1798] sm:$0xff] }
 0x1bd   :  { %5221 = vmatpush1.bf16.msra.mxu0 %v8704_v13  ;;  %v4969_v44 = vpop.f32.mrf.mxu1  ;;  %v8880_v13 = vcombine.low %v731_v62, %v739_v0  ;;  %v691_v30 = vld [vmem:[#allocation2 + $0xf58] sm:$0xff] }
 0x1be   :  { %5262 = vmatpush1.bf16.msra.mxu1 %v8960_v19  ;;  %v4929_v35 = vpop.f32.mrf.mxu0  ;;  %5222 = vmatprep.subr.bf16.mxu0 %v8689_v38  ;;  %v699_v19 = vld [vmem:[#allocation2 + $0xf98] sm:$0xff]  ;;  %v8832_v45 = vcombine.low %v683_v29, %v691_v30 }
 0x1bf   :  { %5263 = vmatprep.subr.bf16.mxu1 %v8945_v22  ;;  %v4970_v41 = vpop.f32.mrf.mxu1  ;;  %v707_v38 = vld [vmem:[#allocation2 + $0xfd8] sm:$0xff] }
 0x1c0   :  { %v963_v22 = vld [vmem:[#allocation2 + $0x17d8] sm:$0xff]  ;;  %v8849_v42 = vcombine.high %v699_v19, %v707_v38  ;;  %v8848_v33 = vcombine.low %v699_v19, %v707_v38 }
 0x1c1   :  { %5223 = vmatpush1.bf16.msra.mxu0 %v8688_v32  ;;  %v9105_v26 = vcombine.high %v955_v34, %v963_v22  ;;  %v939_v32 = vld [vmem:[#allocation2 + $0x1718] sm:$0xff]  ;;  %v9104_v35 = vcombine.low %v955_v34, %v963_v22 }
 0x1c2   :  { %5264 = vmatpush1.bf16.msra.mxu1 %v8944_v36  ;;  %5224 = vmatprep.subr.bf16.mxu0 %v8673_v37  ;;  %v947_v44 = vld [vmem:[#allocation2 + $0x1758] sm:$0xff]  ;;  %v8833_v36 = vcombine.high %v683_v29, %v691_v30 }
 0x1c3   :  { %5265 = vmatprep.subr.bf16.mxu1 %v8929_v39  ;;  %v9089_v37 = vcombine.high %v939_v32, %v947_v44  ;;  %v667_v39 = vld [vmem:[#allocation2 + $0xe98] sm:$0xff]  ;;  %v9088_v46 = vcombine.low %v939_v32, %v947_v44 }
 0x1c4   :  { %v931_v41 = vld [vmem:[#allocation2 + $0x16d8] sm:$0xff]  ;;  %v8817_v47 = vcombine.high %v667_v39, %v675_v5  ;;  %v8816_v20 = vcombine.low %v667_v39, %v675_v5  ;;  %v580_v39 = vld [vmem:[#allocation2 + $0xbe0] sm:$0xff] }
 0x1c5   :  { %5225 = vmatpush1.bf16.msra.mxu0 %v8672_v48  ;;  %v9073_v48 = vcombine.high %v923_v40, %v931_v41  ;;  %v915_v52 = vld [vmem:[#allocation2 + $0x1658] sm:$0xff]  ;;  %v9072_v53 = vcombine.low %v923_v40, %v931_v41 }
 0x1c6   :  { %5266 = vmatpush1.bf16.msra.mxu1 %v8928_v49  ;;  %5226 = vmatprep.subr.bf16.mxu0 %v8657_v50  ;;  %v651_v49 = vld [vmem:[#allocation2 + $0xe18] sm:$0xff] }
 0x1c7   :  { %5267 = vmatprep.subr.bf16.mxu1 %v8913_v51  ;;  %v659_v50 = vld [vmem:[#allocation2 + $0xe58] sm:$0xff] }
 0x1c8   :  { %v907_v51 = vld [vmem:[#allocation2 + $0x1618] sm:$0xff]  ;;  %v8801_v54 = vcombine.high %v651_v49, %v659_v50  ;;  %v8800_v61 = vcombine.low %v651_v49, %v659_v50  ;;  %v564_v49 = vld [vmem:[#allocation2 + $0xb60] sm:$0xff] }
 0x1c9   :  { %5227 = vmatpush1.bf16.msra.mxu0 %v8656_v55  ;;  %v9057_v55 = vcombine.high %v907_v51, %v915_v52  ;;  %v899_v60 = vld [vmem:[#allocation2 + $0x15d8] sm:$0xff]  ;;  %v9056_v62 = vcombine.low %v907_v51, %v915_v52 }
 0x1ca   :  { %5268 = vmatpush1.bf16.msra.mxu1 %v8912_v56  ;;  %5228 = vmatprep.subr.bf16.mxu0 %v8641_v57  ;;  %v635_v56 = vld [vmem:[#allocation2 + $0xd98] sm:$0xff] }
 0x1cb   :  { %5269 = vmatprep.subr.bf16.mxu1 %v8897_v59  ;;  %v643_v57 = vld [vmem:[#allocation2 + $0xdd8] sm:$0xff] }
 0x1cc   :  { %v891_v59 = vld [vmem:[#allocation2 + $0x1598] sm:$0xff]  ;;  %v8785_v0 = vcombine.high %v635_v56, %v643_v57  ;;  %v8784_v7 = vcombine.low %v635_v56, %v643_v57  ;;  %v540_v56 = vld [vmem:[#allocation2 + $0xaa0] sm:$0xff] }
 0x1cd   :  { %5229 = vmatpush1.bf16.msra.mxu0 %v8640_v1  ;;  %v9041_v1 = vcombine.high %v891_v59, %v899_v60  ;;  %v9040_v8 = vcombine.low %v891_v59, %v899_v60  ;;  %v867_v19 = vld [vmem:[#allocation2 + $0x14d8] sm:$0xff]  ;;  %v548_v57 = vld [vmem:[#allocation2 + $0xae0] sm:$0xff] }
 0x1ce   :  { %5270 = vmatpush1.bf16.msra.mxu1 %v8896_v2  ;;  %5230 = vmatprep.subr.bf16.mxu0 %v8625_v3  ;;  %v619_v2 = vld [vmem:[#allocation2 + $0xd18] sm:$0xff] }
 0x1cf   :  { %5271 = vmatprep.subr.bf16.mxu1 %v8881_v4  ;;  %v627_v3 = vld [vmem:[#allocation2 + $0xd58] sm:$0xff] }
 0x1d0   :  { %v875_v4 = vld [vmem:[#allocation2 + $0x1518] sm:$0xff]  ;;  %v8769_v27 = vcombine.high %v619_v2, %v627_v3  ;;  %v8768_v38 = vcombine.low %v619_v2, %v627_v3 }
 0x1d1   :  { %5231 = vmatpush1.bf16.msra.mxu0 %v8624_v9  ;;  %v9025_v9 = vcombine.high %v875_v4, %v883_v6  ;;  %v9024_v34 = vcombine.low %v875_v4, %v883_v6  ;;  %v851_v29 = vld [vmem:[#allocation2 + $0x1458] sm:$0xff]  ;;  %v8691_v6 = vcombine.high %v540_v56, %v548_v57 }
 0x1d2   :  { %5272 = vmatpush1.bf16.msra.mxu1 %v8880_v13  ;;  %5232 = vmatprep.subr.bf16.mxu0 %v8609_v17  ;;  %v603_v13 = vld [vmem:[#allocation2 + $0xc98] sm:$0xff] }
 0x1d3   :  { %5273 = vmatprep.subr.bf16.mxu1 %v8865_v18  ;;  %v611_v17 = vld [vmem:[#allocation2 + $0xcd8] sm:$0xff] }
 0x1d4   :  { %v859_v18 = vld [vmem:[#allocation2 + $0x1498] sm:$0xff]  ;;  %v8753_v22 = vcombine.high %v603_v13, %v611_v17  ;;  %v8752_v30 = vcombine.low %v603_v13, %v611_v17 }
 0x1d5   :  { %5233 = vmatpush1.bf16.msra.mxu0 %v8608_v23  ;;  %v9009_v23 = vcombine.high %v859_v18, %v867_v19  ;;  %v9008_v32 = vcombine.low %v859_v18, %v867_v19  ;;  %v8690_v19 = vcombine.low %v540_v56, %v548_v57 }
 0x1d6   :  { %5274 = vmatpush1.bf16.msra.mxu1 %v8864_v24  ;;  %5234 = vmatprep.subr.bf16.mxu0 %v8849_v42  ;;  %v587_v24 = vld [vmem:[#allocation2 + $0xc18] sm:$0xff] }
 0x1d7   :  { %5275 = vmatprep.subr.bf16.mxu1 %v9105_v26  ;;  %v595_v42 = vld [vmem:[#allocation2 + $0xc58] sm:$0xff] }
 0x1d8   :  { %v843_v26 = vld [vmem:[#allocation2 + $0x1418] sm:$0xff]  ;;  %v8737_v44 = vcombine.high %v587_v24, %v595_v42  ;;  %v8736_v5 = vcombine.low %v587_v24, %v595_v42  ;;  %v508_v42 = vld [vmem:[#allocation2 + $0x9a0] sm:$0xff] }
 0x1d9   :  { %5235 = vmatpush2.bf16.msra.mxu0 %v8848_v33  ;;  %v8993_v33 = vcombine.high %v843_v26, %v851_v29  ;;  %v8992_v40 = vcombine.low %v843_v26, %v851_v29  ;;  %v516_v26 = vld [vmem:[#allocation2 + $0x9e0] sm:$0xff] }
 0x1da   :  { %5276 = vmatpush2.bf16.msra.mxu1 %v9104_v35  ;;  %5236 = vmatprep.subr.bf16.mxu0 %v8833_v36  ;;  %v316_v35 = vld [vmem:[#allocation2 + $0x3a0] sm:$0xff] }
 0x1db   :  { %5277 = vmatprep.subr.bf16.mxu1 %v9089_v37  ;;  %v324_v36 = vld [vmem:[#allocation2 + $0x3e0] sm:$0xff] }
 0x1dc   :  { %v572_v37 = vld [vmem:[#allocation2 + $0xba0] sm:$0xff]  ;;  %v8467_v41 = vcombine.high %v316_v35, %v324_v36  ;;  %v8466_v50 = vcombine.low %v316_v35, %v324_v36 }
 0x1dd   :  { %5237 = vmatpush2.bf16.msra.mxu0 %v8832_v45  ;;  %v8723_v45 = vcombine.high %v572_v37, %v580_v39  ;;  %v8722_v51 = vcombine.low %v572_v37, %v580_v39  ;;  %v244_v35 = vld [vmem:[#allocation2 + $0x160] sm:$0xff] }
 0x1de   :  { %5278 = vmatpush2.bf16.msra.mxu1 %v9088_v46  ;;  %5238 = vmatprep.subr.bf16.mxu0 %v8817_v47  ;;  %v300_v46 = vld [vmem:[#allocation2 + $0x320] sm:$0xff] }
 0x1df   :  { %5279 = vmatprep.subr.bf16.mxu1 %v9073_v48  ;;  %v308_v47 = vld [vmem:[#allocation2 + $0x360] sm:$0xff] }
 0x1e0   :  { %v556_v48 = vld [vmem:[#allocation2 + $0xb20] sm:$0xff]  ;;  %v8451_v52 = vcombine.high %v300_v46, %v308_v47 }
 0x1e1   :  { %5239 = vmatpush2.bf16.msra.mxu0 %v8816_v20  ;;  %v8707_v20 = vcombine.high %v556_v48, %v564_v49  ;;  %v492_v36 = vld [vmem:[#allocation2 + $0x920] sm:$0xff] }
 0x1e2   :  { %5280 = vmatpush2.bf16.msra.mxu1 %v9072_v53  ;;  %5240 = vmatprep.subr.bf16.mxu0 %v8801_v54  ;;  %v284_v53 = vld [vmem:[#allocation2 + $0x2a0] sm:$0xff] }
 0x1e3   :  { %5281 = vmatprep.subr.bf16.mxu1 %v9057_v55  ;;  %v292_v54 = vld [vmem:[#allocation2 + $0x2e0] sm:$0xff] }
 0x1e4   :  { %v8434_v17 = vcombine.low %v284_v53, %v292_v54  ;;  %v500_v37 = vld [vmem:[#allocation2 + $0x960] sm:$0xff] }
 0x1e5   :  { %5241 = vmatpush2.bf16.msra.mxu0 %v8800_v61  ;;  %v8450_v61 = vcombine.low %v300_v46, %v308_v47  ;;  %v228_v46 = vld [vmem:[#allocation2 + $0xe0] sm:$0xff] }
 0x1e6   :  { %5282 = vmatpush2.bf16.msra.mxu1 %v9056_v62  ;;  %5242 = vmatprep.subr.bf16.mxu0 %v8785_v0  ;;  %v8706_v0 = vcombine.low %v556_v48, %v564_v49  ;;  %v476_v47 = vld [vmem:[#allocation2 + $0x8a0] sm:$0xff] }
 0x1e7   :  { %5283 = vmatprep.subr.bf16.mxu1 %v9041_v1  ;;  %v8435_v1 = vcombine.high %v284_v53, %v292_v54  ;;  %v484_v48 = vld [vmem:[#allocation2 + $0x8e0] sm:$0xff] }
 0x1e8   :  { %v212_v53 = vld [vmem:[#allocation2 + $0x60] sm:$0xff]  ;;  %v8626_v57 = vcombine.low %v476_v47, %v484_v48 }
 0x1e9   :  { %5243 = vmatpush2.bf16.msra.mxu0 %v8784_v7  ;;  %v268_v7 = vld [vmem:[#allocation2 + $0x220] sm:$0xff] }
 0x1ea   :  { %5284 = vmatpush2.bf16.msra.mxu1 %v9040_v8  ;;  %5244 = vmatprep.subr.bf16.mxu0 %v8769_v27  ;;  %v276_v8 = vld [vmem:[#allocation2 + $0x260] sm:$0xff] }
 0x1eb   :  { %5285 = vmatprep.subr.bf16.mxu1 %v9025_v9  ;;  %v524_v27 = vld [vmem:[#allocation2 + $0xa20] sm:$0xff]  ;;  %v8418_v29 = vcombine.low %v268_v7, %v276_v8 }
 0x1ec   :  { %v532_v9 = vld [vmem:[#allocation2 + $0xa60] sm:$0xff] }
 0x1ed   :  { %5245 = vmatpush2.bf16.msra.mxu0 %v8768_v38  ;;  %v8419_v38 = vcombine.high %v268_v7, %v276_v8  ;;  %v460_v54 = vld [vmem:[#allocation2 + $0x820] sm:$0xff] }
 0x1ee   :  { %5286 = vmatpush2.bf16.msra.mxu1 %v9024_v34  ;;  %5246 = vmatprep.subr.bf16.mxu0 %v8753_v22  ;;  %v8675_v34 = vcombine.high %v524_v27, %v532_v9  ;;  %v252_v22 = vld [vmem:[#allocation2 + $0x1a0] sm:$0xff] }
 0x1ef   :  { %5287 = vmatprep.subr.bf16.mxu1 %v9009_v23  ;;  %v260_v23 = vld [vmem:[#allocation2 + $0x1e0] sm:$0xff] }
 0x1f0   :  { %v8402_v39 = vcombine.low %v252_v22, %v260_v23  ;;  %v428_v8 = vld [vmem:[#allocation2 + $0x720] sm:$0xff] }
 0x1f1   :  { %5247 = vmatpush2.bf16.msra.mxu0 %v8752_v30  ;;  %v8674_v30 = vcombine.low %v524_v27, %v532_v9  ;;  %v684_v27 = vld [vmem:[#allocation2 + $0xf20] sm:$0xff] }
 0x1f2   :  { %5288 = vmatpush2.bf16.msra.mxu1 %v9008_v32  ;;  %5248 = vmatprep.subr.bf16.mxu0 %v8737_v44  ;;  %v8403_v32 = vcombine.high %v252_v22, %v260_v23  ;;  %v8659_v44 = vcombine.high %v508_v42, %v516_v26  ;;  %v692_v9 = vld [vmem:[#allocation2 + $0xf60] sm:$0xff] }
 0x1f3   :  { %5289 = vmatprep.subr.bf16.mxu1 %v8993_v33  ;;  %v236_v33 = vld [vmem:[#allocation2 + $0x120] sm:$0xff] }
 0x1f4   :  { %v8386_v49 = vcombine.low %v236_v33, %v244_v35  ;;  %v668_v22 = vld [vmem:[#allocation2 + $0xea0] sm:$0xff] }
 0x1f5   :  { %5249 = vmatpush2.bf16.msra.mxu0 %v8736_v5  ;;  %v8658_v5 = vcombine.low %v508_v42, %v516_v26  ;;  %v676_v23 = vld [vmem:[#allocation2 + $0xee0] sm:$0xff]  ;;  %v8834_v42 = vcombine.low %v684_v27, %v692_v9 }
 0x1f6   :  { %5290 = vmatpush2.bf16.msra.mxu1 %v8992_v40  ;;  %5300 = vmatprep.subr.bf16.mxu0 %v8467_v41  ;;  %v8387_v40 = vcombine.high %v236_v33, %v244_v35  ;;  %v8643_v41 = vcombine.high %v492_v36, %v500_v37  ;;  %v660_v33 = vld [vmem:[#allocation2 + $0xe60] sm:$0xff] }
 0x1f7   :  { %5341 = vmatprep.subr.bf16.mxu1 %v8723_v45  ;;  %v220_v45 = vld [vmem:[#allocation2 + $0xa0] sm:$0xff] }
 0x1f8   :  { %v5006_v55 = vpop.f32.mrf.mxu0  ;;  %5251 = vmatmul.mubr.bf16.vlgmr.msra.gmra.mxu0 %v10073_v31  ;;  %v8370_v56 = vcombine.low %v220_v45, %v228_v46 }
 0x1f9   :  { %v5007_v59 = vadd.f32 %v5006_v55, %v10135_v14  ;;  %5292 = vmatmul.mubr.bf16.vlgmr.msra.gmra.mxu1 %v10083_v43  ;;  %5301 = vmatpush1.bf16.msra.mxu0 %v8466_v50  ;;  %v5047_v60 = vpop.f32.mrf.mxu1  ;;  %v8642_v50 = vcombine.low %v492_v36, %v500_v37  ;;  %v468_v55 = vld [vmem:[#allocation2 + $0x860] sm:$0xff]  ;;  %v8818_v36 = vcombine.low %v668_v22, %v676_v23 }
 0x1fa   :  { %5342 = vmatpush1.bf16.msra.mxu1 %v8722_v51  ;;  %v5008_v62 = vpop.f32.mrf.mxu0  ;;  %5302 = vmatprep.subr.bf16.mxu0 %v8451_v52  ;;  %v8371_v51 = vcombine.high %v220_v45, %v228_v46  ;;  %v8627_v52 = vcombine.high %v476_v47, %v484_v48  ;;  %v644_v45 = vld [vmem:[#allocation2 + $0xde0] sm:$0xff] }
 0x1fb   :  { %v5009_v2 = vadd.f32 %v5008_v62, %v10146_v25  ;;  %v10158_v3 = vadd.f32 %v5047_v60, %v5007_v59  ;;  %v5049_v4 = vpop.f32.mrf.mxu1  ;;  %5343 = vmatprep.subr.bf16.mxu1 %v8707_v20  ;;  %5332 = vmatprep.mubr.bf16.mxu0 %v10052_v11  ;;  %v204_v20 = vld [vmem:[#allocation2 + $0x20] sm:$0xff]  ;;  %v8611_v60 = vcombine.high %v460_v54, %v468_v55 }
 0x1fc   :  { %v5010_v14 = vpop.f32.mrf.mxu0  ;;  %5373 = vmatprep.mubr.bf16.mxu1 %v10057_v16  ;;  %v8355_v59 = vcombine.high %v204_v20, %v212_v53  ;;  %v452_v62 = vld [vmem:[#allocation2 + $0x7e0] sm:$0xff] }
 0x1fd   :  { %v10162_v13 = vadd.f32 %v5049_v4, %v5009_v2  ;;  %5303 = vmatpush1.bf16.msra.mxu0 %v8450_v61  ;;  %v5051_v18 = vpop.f32.mrf.mxu1  ;;  %v444_v61 = vld [vmem:[#allocation2 + $0x7a0] sm:$0xff]  ;;  %v8354_v2 = vcombine.low %v204_v20, %v212_v53  ;;  %v8610_v4 = vcombine.low %v460_v54, %v468_v55 }
 0x1fe   :  { %5344 = vmatpush1.bf16.msra.mxu1 %v8706_v0  ;;  %v5011_v25 = vpop.f32.mrf.mxu0  ;;  %5304 = vmatprep.subr.bf16.mxu0 %v8435_v1  ;;  %v700_v0 = vld [vmem:[#allocation2 + $0xfa0] sm:$0xff] }
 0x1ff   :  { %5345 = vmatprep.subr.bf16.mxu1 %v8691_v6  ;;  %v5052_v24 = vpop.f32.mrf.mxu1  ;;  %v708_v1 = vld [vmem:[#allocation2 + $0xfe0] sm:$0xff]  ;;  %v8595_v6 = vcombine.high %v444_v61, %v452_v62 }
 0x200   :  { %v8851_v7 = vcombine.high %v700_v0, %v708_v1  ;;  %v436_v14 = vld [vmem:[#allocation2 + $0x760] sm:$0xff]  ;;  %v8850_v18 = vcombine.low %v700_v0, %v708_v1 }
 0x201   :  { %5305 = vmatpush1.bf16.msra.mxu0 %v8434_v17  ;;  %v8594_v17 = vcombine.low %v444_v61, %v452_v62  ;;  %v8579_v25 = vcombine.high %v428_v8, %v436_v14  ;;  %v8578_v24 = vcombine.low %v428_v8, %v436_v14  ;;  %v628_v20 = vld [vmem:[#allocation2 + $0xd60] sm:$0xff] }
 0x202   :  { %5346 = vmatpush1.bf16.msra.mxu1 %v8690_v19  ;;  %5306 = vmatprep.subr.bf16.mxu0 %v8419_v38  ;;  %v8835_v19 = vcombine.high %v684_v27, %v692_v9  ;;  %v412_v38 = vld [vmem:[#allocation2 + $0x6a0] sm:$0xff] }
 0x203   :  { %5347 = vmatprep.subr.bf16.mxu1 %v8675_v34  ;;  %v420_v34 = vld [vmem:[#allocation2 + $0x6e0] sm:$0xff] }
 0x204   :  { %v8563_v26 = vcombine.high %v412_v38, %v420_v34  ;;  %v8562_v35 = vcombine.low %v412_v38, %v420_v34  ;;  %v612_v61 = vld [vmem:[#allocation2 + $0xce0] sm:$0xff]  ;;  %v325_v38 = vld [vmem:[#allocation2 + $0x3e8] sm:$0xff] }
 0x205   :  { %5307 = vmatpush1.bf16.msra.mxu0 %v8418_v29  ;;  %v8819_v29 = vcombine.high %v668_v22, %v676_v23  ;;  %v596_v8 = vld [vmem:[#allocation2 + $0xc60] sm:$0xff] }
 0x206   :  { %5348 = vmatpush1.bf16.msra.mxu1 %v8674_v30  ;;  %5308 = vmatprep.subr.bf16.mxu0 %v8403_v32  ;;  %v396_v30 = vld [vmem:[#allocation2 + $0x620] sm:$0xff] }
 0x207   :  { %5349 = vmatprep.subr.bf16.mxu1 %v8659_v44  ;;  %v404_v32 = vld [vmem:[#allocation2 + $0x660] sm:$0xff] }
 0x208   :  { %v652_v44 = vld [vmem:[#allocation2 + $0xe20] sm:$0xff]  ;;  %v8547_v37 = vcombine.high %v396_v30, %v404_v32  ;;  %v8546_v46 = vcombine.low %v396_v30, %v404_v32  ;;  %v309_v30 = vld [vmem:[#allocation2 + $0x368] sm:$0xff] }
 0x209   :  { %5309 = vmatpush1.bf16.msra.mxu0 %v8402_v39  ;;  %v8803_v39 = vcombine.high %v652_v44, %v660_v33  ;;  %v8802_v47 = vcombine.low %v652_v44, %v660_v33 }
 0x20a   :  { %5350 = vmatpush1.bf16.msra.mxu1 %v8658_v5  ;;  %5310 = vmatprep.subr.bf16.mxu0 %v8387_v40  ;;  %v380_v5 = vld [vmem:[#allocation2 + $0x5a0] sm:$0xff] }
 0x20b   :  { %5351 = vmatprep.subr.bf16.mxu1 %v8643_v41  ;;  %v388_v40 = vld [vmem:[#allocation2 + $0x5e0] sm:$0xff] }
 0x20c   :  { %v636_v41 = vld [vmem:[#allocation2 + $0xda0] sm:$0xff]  ;;  %v8531_v48 = vcombine.high %v380_v5, %v388_v40  ;;  %v8530_v53 = vcombine.low %v380_v5, %v388_v40  ;;  %v285_v5 = vld [vmem:[#allocation2 + $0x2a8] sm:$0xff] }
 0x20d   :  { %5311 = vmatpush1.bf16.msra.mxu0 %v8386_v49  ;;  %v8787_v49 = vcombine.high %v636_v41, %v644_v45  ;;  %v8786_v54 = vcombine.low %v636_v41, %v644_v45  ;;  %v293_v40 = vld [vmem:[#allocation2 + $0x2e8] sm:$0xff] }
 0x20e   :  { %5352 = vmatpush1.bf16.msra.mxu1 %v8642_v50  ;;  %5312 = vmatprep.subr.bf16.mxu0 %v8371_v51  ;;  %v364_v50 = vld [vmem:[#allocation2 + $0x520] sm:$0xff] }
 0x20f   :  { %5353 = vmatprep.subr.bf16.mxu1 %v8627_v52  ;;  %v372_v51 = vld [vmem:[#allocation2 + $0x560] sm:$0xff] }
 0x210   :  { %v620_v52 = vld [vmem:[#allocation2 + $0xd20] sm:$0xff]  ;;  %v8515_v55 = vcombine.high %v364_v50, %v372_v51  ;;  %v8514_v62 = vcombine.low %v364_v50, %v372_v51  ;;  %v8437_v51 = vcombine.high %v285_v5, %v293_v40 }
 0x211   :  { %5313 = vmatpush1.bf16.msra.mxu0 %v8370_v56  ;;  %v8771_v56 = vcombine.high %v620_v52, %v628_v20  ;;  %v8770_v0 = vcombine.low %v620_v52, %v628_v20  ;;  %v780_v52 = vld [vmem:[#allocation2 + $0x1220] sm:$0xff] }
 0x212   :  { %5354 = vmatpush1.bf16.msra.mxu1 %v8626_v57  ;;  %5314 = vmatprep.subr.bf16.mxu0 %v8355_v59  ;;  %v348_v57 = vld [vmem:[#allocation2 + $0x4a0] sm:$0xff] }
 0x213   :  { %5355 = vmatprep.subr.bf16.mxu1 %v8611_v60  ;;  %v356_v59 = vld [vmem:[#allocation2 + $0x4e0] sm:$0xff] }
 0x214   :  { %v604_v60 = vld [vmem:[#allocation2 + $0xca0] sm:$0xff]  ;;  %v8499_v1 = vcombine.high %v348_v57, %v356_v59  ;;  %v8498_v14 = vcombine.low %v348_v57, %v356_v59 }
 0x215   :  { %5315 = vmatpush1.bf16.msra.mxu0 %v8354_v2  ;;  %v8755_v2 = vcombine.high %v604_v60, %v612_v61  ;;  %v8754_v27 = vcombine.low %v604_v60, %v612_v61  ;;  %v788_v20 = vld [vmem:[#allocation2 + $0x1260] sm:$0xff]  ;;  %v8436_v61 = vcombine.low %v285_v5, %v293_v40 }
 0x216   :  { %5356 = vmatpush1.bf16.msra.mxu1 %v8610_v4  ;;  %5316 = vmatprep.subr.bf16.mxu0 %v8595_v6  ;;  %v332_v4 = vld [vmem:[#allocation2 + $0x420] sm:$0xff] }
 0x217   :  { %5357 = vmatprep.subr.bf16.mxu1 %v8851_v7  ;;  %v340_v6 = vld [vmem:[#allocation2 + $0x460] sm:$0xff] }
 0x218   :  { %v588_v7 = vld [vmem:[#allocation2 + $0xc20] sm:$0xff]  ;;  %v8483_v9 = vcombine.high %v332_v4, %v340_v6  ;;  %v8482_v34 = vcombine.low %v332_v4, %v340_v6  ;;  %v253_v6 = vld [vmem:[#allocation2 + $0x1a8] sm:$0xff] }
 0x219   :  { %5317 = vmatpush2.bf16.msra.mxu0 %v8594_v17  ;;  %v8739_v17 = vcombine.high %v588_v7, %v596_v8  ;;  %v8738_v22 = vcombine.low %v588_v7, %v596_v8  ;;  %v261_v7 = vld [vmem:[#allocation2 + $0x1e8] sm:$0xff]  ;;  %v8930_v8 = vcombine.low %v780_v52, %v788_v20 }
 0x21a   :  { %5358 = vmatpush2.bf16.msra.mxu1 %v8850_v18  ;;  %5318 = vmatprep.subr.bf16.mxu0 %v8579_v25  ;;  %v828_v18 = vld [vmem:[#allocation2 + $0x13a0] sm:$0xff] }
 0x21b   :  { %5359 = vmatprep.subr.bf16.mxu1 %v8835_v19  ;;  %v836_v25 = vld [vmem:[#allocation2 + $0x13e0] sm:$0xff]  ;;  %v317_v19 = vld [vmem:[#allocation2 + $0x3a8] sm:$0xff] }
 0x21c   :  { %v8979_v23 = vcombine.high %v828_v18, %v836_v25  ;;  %v8978_v32 = vcombine.low %v828_v18, %v836_v25  ;;  %v8468_v44 = vcombine.low %v317_v19, %v325_v38  ;;  %v756_v18 = vld [vmem:[#allocation2 + $0x1160] sm:$0xff]  ;;  %v237_v25 = vld [vmem:[#allocation2 + $0x128] sm:$0xff] }
 0x21d   :  { %5319 = vmatpush2.bf16.msra.mxu0 %v8578_v24  ;;  %v8469_v24 = vcombine.high %v317_v19, %v325_v38  ;;  %v245_v19 = vld [vmem:[#allocation2 + $0x168] sm:$0xff] }
 0x21e   :  { %5360 = vmatpush2.bf16.msra.mxu1 %v8834_v42  ;;  %5320 = vmatprep.subr.bf16.mxu0 %v8563_v26  ;;  %v812_v42 = vld [vmem:[#allocation2 + $0x1320] sm:$0xff] }
 0x21f   :  { %5361 = vmatprep.subr.bf16.mxu1 %v8819_v29  ;;  %v820_v26 = vld [vmem:[#allocation2 + $0x1360] sm:$0xff]  ;;  %v301_v29 = vld [vmem:[#allocation2 + $0x328] sm:$0xff] }
 0x220   :  { %v8963_v33 = vcombine.high %v812_v42, %v820_v26  ;;  %v8962_v45 = vcombine.low %v812_v42, %v820_v26  ;;  %v740_v42 = vld [vmem:[#allocation2 + $0x10e0] sm:$0xff]  ;;  %v221_v26 = vld [vmem:[#allocation2 + $0xa8] sm:$0xff] }
 0x221   :  { %5321 = vmatpush2.bf16.msra.mxu0 %v8562_v35  ;;  %v8453_v35 = vcombine.high %v301_v29, %v309_v30 }
 0x222   :  { %5362 = vmatpush2.bf16.msra.mxu1 %v8818_v36  ;;  %5322 = vmatprep.subr.bf16.mxu0 %v8547_v37  ;;  %v796_v36 = vld [vmem:[#allocation2 + $0x12a0] sm:$0xff] }
 0x223   :  { %5363 = vmatprep.subr.bf16.mxu1 %v8803_v39  ;;  %v804_v37 = vld [vmem:[#allocation2 + $0x12e0] sm:$0xff] }
 0x224   :  { %v8946_v57 = vcombine.low %v796_v36, %v804_v37 }
 0x225   :  { %5323 = vmatpush2.bf16.msra.mxu0 %v8546_v46 }
 0x226   :  { %5364 = vmatpush2.bf16.msra.mxu1 %v8802_v47  ;;  %5324 = vmatprep.subr.bf16.mxu0 %v8531_v48  ;;  %v8452_v48 = vcombine.low %v301_v29, %v309_v30  ;;  %v229_v29 = vld [vmem:[#allocation2 + $0xe8] sm:$0xff] }
 0x227   :  { %5365 = vmatprep.subr.bf16.mxu1 %v8787_v49  ;;  %v8947_v49 = vcombine.high %v796_v36, %v804_v37  ;;  %v724_v36 = vld [vmem:[#allocation2 + $0x1060] sm:$0xff]  ;;  %v205_v37 = vld [vmem:[#allocation2 + $0x28] sm:$0xff]  ;;  %v8372_v40 = vcombine.low %v221_v26, %v229_v29 }
 0x229   :  { %5325 = vmatpush2.bf16.msra.mxu0 %v8530_v53 }
 0x22a   :  { %5366 = vmatpush2.bf16.msra.mxu1 %v8786_v54  ;;  %5326 = vmatprep.subr.bf16.mxu0 %v8515_v55  ;;  %v269_v55 = vld [vmem:[#allocation2 + $0x228] sm:$0xff] }
 0x22b   :  { %5367 = vmatprep.subr.bf16.mxu1 %v8771_v56  ;;  %v277_v56 = vld [vmem:[#allocation2 + $0x268] sm:$0xff] }
 0x22d   :  { %5327 = vmatpush2.bf16.msra.mxu0 %v8514_v62  ;;  %v8931_v62 = vcombine.high %v780_v52, %v788_v20 }
 0x22e   :  { %5368 = vmatpush2.bf16.msra.mxu1 %v8770_v0  ;;  %5328 = vmatprep.subr.bf16.mxu0 %v8499_v1  ;;  %v8421_v0 = vcombine.high %v269_v55, %v277_v56  ;;  %v764_v1 = vld [vmem:[#allocation2 + $0x11a0] sm:$0xff] }
 0x22f   :  { %5369 = vmatprep.subr.bf16.mxu1 %v8755_v2  ;;  %v772_v2 = vld [vmem:[#allocation2 + $0x11e0] sm:$0xff] }
 0x230   :  { %v8914_v38 = vcombine.low %v764_v1, %v772_v2 }
 0x231   :  { %5329 = vmatpush2.bf16.msra.mxu0 %v8498_v14  ;;  %v8420_v14 = vcombine.low %v269_v55, %v277_v56  ;;  %v940_v55 = vld [vmem:[#allocation2 + $0x1720] sm:$0xff] }
 0x232   :  { %5370 = vmatpush2.bf16.msra.mxu1 %v8754_v27  ;;  %5330 = vmatprep.subr.bf16.mxu0 %v8483_v9  ;;  %v8915_v27 = vcombine.high %v764_v1, %v772_v2  ;;  %v8405_v9 = vcombine.high %v253_v6, %v261_v7  ;;  %v948_v56 = vld [vmem:[#allocation2 + $0x1760] sm:$0xff] }
 0x233   :  { %5371 = vmatprep.subr.bf16.mxu1 %v8739_v17  ;;  %v748_v17 = vld [vmem:[#allocation2 + $0x1120] sm:$0xff] }
 0x234   :  { %v8898_v30 = vcombine.low %v748_v17, %v756_v18  ;;  %v924_v1 = vld [vmem:[#allocation2 + $0x16a0] sm:$0xff] }
 0x235   :  { %5331 = vmatpush2.bf16.msra.mxu0 %v8482_v34  ;;  %v8404_v34 = vcombine.low %v253_v6, %v261_v7  ;;  %v932_v2 = vld [vmem:[#allocation2 + $0x16e0] sm:$0xff]  ;;  %v421_v6 = vld [vmem:[#allocation2 + $0x6e8] sm:$0xff]  ;;  %v9090_v7 = vcombine.low %v940_v55, %v948_v56 }
 0x236   :  { %5372 = vmatpush2.bf16.msra.mxu1 %v8738_v22  ;;  %5382 = vmatprep.subr.bf16.mxu0 %v8979_v23  ;;  %v8899_v22 = vcombine.high %v748_v17, %v756_v18  ;;  %v8389_v23 = vcombine.high %v237_v25, %v245_v19  ;;  %v916_v17 = vld [vmem:[#allocation2 + $0x1660] sm:$0xff]  ;;  %v397_v18 = vld [vmem:[#allocation2 + $0x628] sm:$0xff] }
 0x237   :  { %5423 = vmatprep.subr.bf16.mxu1 %v8469_v24  ;;  %v732_v24 = vld [vmem:[#allocation2 + $0x10a0] sm:$0xff] }
 0x238   :  { %v5088_v39 = vpop.f32.mrf.mxu0  ;;  %5333 = vmatmul.mubr.bf16.vlgmr.msra.gmra.mxu0 %v10069_v28  ;;  %v8882_v5 = vcombine.low %v732_v24, %v740_v42 }
 0x239   :  { %v5129_v41 = vpop.f32.mrf.mxu1  ;;  %5374 = vmatmul.mubr.bf16.vlgmr.msra.gmra.mxu1 %v10073_v31  ;;  %5383 = vmatpush1.bf16.msra.mxu0 %v8978_v32  ;;  %v8388_v32 = vcombine.low %v237_v25, %v245_v19  ;;  %v405_v25 = vld [vmem:[#allocation2 + $0x668] sm:$0xff]  ;;  %v9074_v19 = vcombine.low %v924_v1, %v932_v2 }
 0x23a   :  { %v10166_v46 = vadd.f32 %v5129_v41, %v5088_v39  ;;  %5424 = vmatpush1.bf16.msra.mxu1 %v8468_v44  ;;  %v5090_v47 = vpop.f32.mrf.mxu0  ;;  %5384 = vmatprep.subr.bf16.mxu0 %v8963_v33  ;;  %v8883_v44 = vcombine.high %v732_v24, %v740_v42  ;;  %v8373_v33 = vcombine.high %v221_v26, %v229_v29  ;;  %v213_v39 = vld [vmem:[#allocation2 + $0x68] sm:$0xff]  ;;  %v900_v24 = vld [vmem:[#allocation2 + $0x15e0] sm:$0xff] }
 0x23b   :  { %v5131_v50 = vpop.f32.mrf.mxu1  ;;  %5425 = vmatprep.subr.bf16.mxu1 %v8453_v35  ;;  %5414 = vmatprep.mubr.bf16.mxu0 %v10075_v63  ;;  %v716_v35 = vld [vmem:[#allocation2 + $0x1020] sm:$0xff]  ;;  %v8356_v52 = vcombine.low %v205_v37, %v213_v39  ;;  %v381_v42 = vld [vmem:[#allocation2 + $0x5a8] sm:$0xff] }
 0x23c   :  { %v10169_v53 = vadd.f32 %v5131_v50, %v5090_v47  ;;  %v5092_v54 = vpop.f32.mrf.mxu0  ;;  %5455 = vmatprep.mubr.bf16.mxu1 %v10052_v11  ;;  %v8867_v41 = vcombine.high %v716_v35, %v724_v36  ;;  %v956_v47 = vld [vmem:[#allocation2 + $0x17a0] sm:$0xff]  ;;  %v453_v50 = vld [vmem:[#allocation2 + $0x7e8] sm:$0xff] }
 0x23d   :  { %5385 = vmatpush1.bf16.msra.mxu0 %v8962_v45  ;;  %v5133_v59 = vpop.f32.mrf.mxu1  ;;  %v8357_v45 = vcombine.high %v205_v37, %v213_v39  ;;  %v389_v26 = vld [vmem:[#allocation2 + $0x5e8] sm:$0xff] }
 0x23e   :  { %5426 = vmatpush1.bf16.msra.mxu1 %v8452_v48  ;;  %v5093_v60 = vpop.f32.mrf.mxu0  ;;  %5386 = vmatprep.subr.bf16.mxu0 %v8947_v49  ;;  %v964_v48 = vld [vmem:[#allocation2 + $0x17e0] sm:$0xff]  ;;  %v445_v49 = vld [vmem:[#allocation2 + $0x7a8] sm:$0xff] }
 0x23f   :  { %5427 = vmatprep.subr.bf16.mxu1 %v8437_v51  ;;  %v5134_v4 = vpop.f32.mrf.mxu1  ;;  %v8866_v51 = vcombine.low %v716_v35, %v724_v36  ;;  %v9107_v20 = vcombine.high %v956_v47, %v964_v48  ;;  %v8597_v54 = vcombine.high %v445_v49, %v453_v50  ;;  %v437_v59 = vld [vmem:[#allocation2 + $0x768] sm:$0xff]  ;;  %v9106_v60 = vcombine.low %v956_v47, %v964_v48  ;;  %v884_v35 = vld [vmem:[#allocation2 + $0x1560] sm:$0xff] }
 0x240   :  { %v413_v4 = vld [vmem:[#allocation2 + $0x6a8] sm:$0xff]  ;;  %v868_v47 = vld [vmem:[#allocation2 + $0x14e0] sm:$0xff] }
 0x241   :  { %5387 = vmatpush1.bf16.msra.mxu0 %v8946_v57  ;;  %v429_v57 = vld [vmem:[#allocation2 + $0x728] sm:$0xff] }
 0x242   :  { %5428 = vmatpush1.bf16.msra.mxu1 %v8436_v61  ;;  %5388 = vmatprep.subr.bf16.mxu0 %v8931_v62  ;;  %v8596_v61 = vcombine.low %v445_v49, %v453_v50  ;;  %v9091_v62 = vcombine.high %v940_v55, %v948_v56  ;;  %v365_v36 = vld [vmem:[#allocation2 + $0x528] sm:$0xff]  ;;  %v852_v55 = vld [vmem:[#allocation2 + $0x1460] sm:$0xff] }
 0x243   :  { %5429 = vmatprep.subr.bf16.mxu1 %v8421_v0  ;;  %v8581_v0 = vcombine.high %v429_v57, %v437_v59  ;;  %v373_v37 = vld [vmem:[#allocation2 + $0x568] sm:$0xff] }
 0x244   :  { %v349_v48 = vld [vmem:[#allocation2 + $0x4a8] sm:$0xff] }
 0x245   :  { %5389 = vmatpush1.bf16.msra.mxu0 %v8930_v8  ;;  %v8580_v8 = vcombine.low %v429_v57, %v437_v59  ;;  %v357_v49 = vld [vmem:[#allocation2 + $0x4e8] sm:$0xff] }
 0x246   :  { %5430 = vmatpush1.bf16.msra.mxu1 %v8420_v14  ;;  %5390 = vmatprep.subr.bf16.mxu0 %v8915_v27  ;;  %v9075_v14 = vcombine.high %v924_v1, %v932_v2  ;;  %v8565_v27 = vcombine.high %v413_v4, %v421_v6  ;;  %v333_v56 = vld [vmem:[#allocation2 + $0x428] sm:$0xff] }
 0x247   :  { %5431 = vmatprep.subr.bf16.mxu1 %v8405_v9  ;;  %v908_v9 = vld [vmem:[#allocation2 + $0x1620] sm:$0xff]  ;;  %v341_v57 = vld [vmem:[#allocation2 + $0x468] sm:$0xff] }
 0x248   :  { %v9058_v29 = vcombine.low %v908_v9, %v916_v17  ;;  %v581_v1 = vld [vmem:[#allocation2 + $0xbe8] sm:$0xff] }
 0x249   :  { %5391 = vmatpush1.bf16.msra.mxu0 %v8914_v38  ;;  %v8564_v38 = vcombine.low %v413_v4, %v421_v6  ;;  %v829_v2 = vld [vmem:[#allocation2 + $0x13a8] sm:$0xff] }
 0x24a   :  { %5432 = vmatpush1.bf16.msra.mxu1 %v8404_v34  ;;  %5392 = vmatprep.subr.bf16.mxu0 %v8899_v22  ;;  %v9059_v34 = vcombine.high %v908_v9, %v916_v17  ;;  %v8549_v22 = vcombine.high %v397_v18, %v405_v25  ;;  %v837_v4 = vld [vmem:[#allocation2 + $0x13e8] sm:$0xff] }
 0x24b   :  { %5433 = vmatprep.subr.bf16.mxu1 %v8389_v23  ;;  %v892_v23 = vld [vmem:[#allocation2 + $0x15a0] sm:$0xff]  ;;  %v565_v9 = vld [vmem:[#allocation2 + $0xb68] sm:$0xff] }
 0x24c   :  { %v9042_v39 = vcombine.low %v892_v23, %v900_v24  ;;  %v813_v17 = vld [vmem:[#allocation2 + $0x1328] sm:$0xff] }
 0x24d   :  { %5393 = vmatpush1.bf16.msra.mxu0 %v8898_v30  ;;  %v8548_v30 = vcombine.low %v397_v18, %v405_v25  ;;  %v821_v18 = vld [vmem:[#allocation2 + $0x1368] sm:$0xff] }
 0x24e   :  { %5434 = vmatpush1.bf16.msra.mxu1 %v8388_v32  ;;  %5394 = vmatprep.subr.bf16.mxu0 %v8883_v44  ;;  %v9043_v32 = vcombine.high %v892_v23, %v900_v24  ;;  %v8533_v44 = vcombine.high %v381_v42, %v389_v26  ;;  %v549_v23 = vld [vmem:[#allocation2 + $0xae8] sm:$0xff] }
 0x24f   :  { %5435 = vmatprep.subr.bf16.mxu1 %v8373_v33  ;;  %v876_v33 = vld [vmem:[#allocation2 + $0x1520] sm:$0xff] }
 0x250   :  { %v9026_v50 = vcombine.low %v876_v33, %v884_v35 }
 0x251   :  { %5395 = vmatpush1.bf16.msra.mxu0 %v8882_v5  ;;  %v8532_v5 = vcombine.low %v381_v42, %v389_v26  ;;  %v797_v42 = vld [vmem:[#allocation2 + $0x12a8] sm:$0xff] }
 0x252   :  { %5436 = vmatpush1.bf16.msra.mxu1 %v8372_v40  ;;  %5396 = vmatprep.subr.bf16.mxu0 %v8867_v41  ;;  %v9027_v40 = vcombine.high %v876_v33, %v884_v35  ;;  %v8517_v41 = vcombine.high %v365_v36, %v373_v37  ;;  %v805_v26 = vld [vmem:[#allocation2 + $0x12e8] sm:$0xff]  ;;  %v8964_v33 = vcombine.low %v813_v17, %v821_v18 }
 0x253   :  { %5437 = vmatprep.subr.bf16.mxu1 %v8357_v45  ;;  %v860_v45 = vld [vmem:[#allocation2 + $0x14a0] sm:$0xff] }
 0x254   :  { %v9010_v59 = vcombine.low %v860_v45, %v868_v47 }
 0x255   :  { %5397 = vmatpush1.bf16.msra.mxu0 %v8866_v51  ;;  %v8516_v51 = vcombine.low %v365_v36, %v373_v37  ;;  %v8949_v37 = vcombine.high %v797_v42, %v805_v26 }
 0x256   :  { %5438 = vmatpush1.bf16.msra.mxu1 %v8356_v52  ;;  %5398 = vmatprep.subr.bf16.mxu0 %v9107_v20  ;;  %v9011_v52 = vcombine.high %v860_v45, %v868_v47  ;;  %v8501_v20 = vcombine.high %v349_v48, %v357_v49  ;;  %v789_v45 = vld [vmem:[#allocation2 + $0x1268] sm:$0xff] }
 0x257   :  { %5439 = vmatprep.subr.bf16.mxu1 %v8597_v54  ;;  %v844_v54 = vld [vmem:[#allocation2 + $0x1420] sm:$0xff] }
 0x258   :  { %v8994_v6 = vcombine.low %v844_v54, %v852_v55 }
 0x259   :  { %5399 = vmatpush2.bf16.msra.mxu0 %v9106_v60  ;;  %v8500_v60 = vcombine.low %v349_v48, %v357_v49 }
 0x25a   :  { %5440 = vmatpush2.bf16.msra.mxu1 %v8596_v61  ;;  %5400 = vmatprep.subr.bf16.mxu0 %v9091_v62  ;;  %v8995_v61 = vcombine.high %v844_v54, %v852_v55  ;;  %v8485_v62 = vcombine.high %v333_v56, %v341_v57  ;;  %v765_v55 = vld [vmem:[#allocation2 + $0x11a8] sm:$0xff] }
 0x25b   :  { %5441 = vmatprep.subr.bf16.mxu1 %v8581_v0  ;;  %v573_v0 = vld [vmem:[#allocation2 + $0xba8] sm:$0xff] }
 0x25c   :  { %v8724_v25 = vcombine.low %v573_v0, %v581_v1 }
 0x25d   :  { %5401 = vmatpush2.bf16.msra.mxu0 %v9090_v7  ;;  %v8484_v7 = vcombine.low %v333_v56, %v341_v57  ;;  %v773_v56 = vld [vmem:[#allocation2 + $0x11e8] sm:$0xff] }
 0x25e   :  { %5442 = vmatpush2.bf16.msra.mxu1 %v8580_v8  ;;  %5402 = vmatprep.subr.bf16.mxu0 %v9075_v14  ;;  %v8725_v8 = vcombine.high %v573_v0, %v581_v1  ;;  %v8981_v14 = vcombine.high %v829_v2, %v837_v4  ;;  %v501_v0 = vld [vmem:[#allocation2 + $0x968] sm:$0xff] }
 0x25f   :  { %5443 = vmatprep.subr.bf16.mxu1 %v8565_v27  ;;  %v557_v27 = vld [vmem:[#allocation2 + $0xb28] sm:$0xff] }
 0x260   :  { %v749_v1 = vld [vmem:[#allocation2 + $0x1128] sm:$0xff] }
 0x261   :  { %5403 = vmatpush2.bf16.msra.mxu0 %v9074_v19  ;;  %v8980_v19 = vcombine.low %v829_v2, %v837_v4  ;;  %v757_v2 = vld [vmem:[#allocation2 + $0x1168] sm:$0xff] }
 0x262   :  { %5444 = vmatpush2.bf16.msra.mxu1 %v8564_v38  ;;  %5404 = vmatprep.subr.bf16.mxu0 %v9059_v34  ;;  %v8709_v38 = vcombine.high %v557_v27, %v565_v9  ;;  %v8965_v34 = vcombine.high %v813_v17, %v821_v18  ;;  %v741_v17 = vld [vmem:[#allocation2 + $0x10e8] sm:$0xff] }
 0x263   :  { %5445 = vmatprep.subr.bf16.mxu1 %v8549_v22  ;;  %v541_v22 = vld [vmem:[#allocation2 + $0xaa8] sm:$0xff] }
 0x264   :  { %v8693_v35 = vcombine.high %v541_v22, %v549_v23  ;;  %v8692_v47 = vcombine.low %v541_v22, %v549_v23  ;;  %v469_v22 = vld [vmem:[#allocation2 + $0x868] sm:$0xff] }
 0x265   :  { %5405 = vmatpush2.bf16.msra.mxu0 %v9058_v29  ;;  %v717_v23 = vld [vmem:[#allocation2 + $0x1028] sm:$0xff] }
 0x266   :  { %5446 = vmatpush2.bf16.msra.mxu1 %v8548_v30  ;;  %5406 = vmatprep.subr.bf16.mxu0 %v9043_v32  ;;  %v8708_v30 = vcombine.low %v557_v27, %v565_v9  ;;  %v485_v27 = vld [vmem:[#allocation2 + $0x8e8] sm:$0xff] }
 0x267   :  { %5447 = vmatprep.subr.bf16.mxu1 %v8533_v44  ;;  %v733_v9 = vld [vmem:[#allocation2 + $0x10a8] sm:$0xff] }
 0x269   :  { %5407 = vmatpush2.bf16.msra.mxu0 %v9042_v39  ;;  %v525_v39 = vld [vmem:[#allocation2 + $0xa28] sm:$0xff] }
 0x26a   :  { %5448 = vmatpush2.bf16.msra.mxu1 %v8532_v5  ;;  %5408 = vmatprep.subr.bf16.mxu0 %v9027_v40  ;;  %v533_v5 = vld [vmem:[#allocation2 + $0xa68] sm:$0xff] }
 0x26b   :  { %5449 = vmatprep.subr.bf16.mxu1 %v8517_v41  ;;  %v781_v41 = vld [vmem:[#allocation2 + $0x1228] sm:$0xff]  ;;  %v8676_v57 = vcombine.low %v525_v39, %v533_v5 }
 0x26d   :  { %5409 = vmatpush2.bf16.msra.mxu0 %v9026_v50  ;;  %v8677_v50 = vcombine.high %v525_v39, %v533_v5  ;;  %v965_v39 = vld [vmem:[#allocation2 + $0x17e8] sm:$0xff] }
 0x26e   :  { %5450 = vmatpush2.bf16.msra.mxu1 %v8516_v51  ;;  %5410 = vmatprep.subr.bf16.mxu0 %v9011_v52  ;;  %v8933_v51 = vcombine.high %v781_v41, %v789_v45  ;;  %v509_v52 = vld [vmem:[#allocation2 + $0x9a8] sm:$0xff] }
 0x26f   :  { %5451 = vmatprep.subr.bf16.mxu1 %v8501_v20  ;;  %v517_v20 = vld [vmem:[#allocation2 + $0x9e8] sm:$0xff] }
 0x270   :  { %v8660_v4 = vcombine.low %v509_v52, %v517_v20 }
 0x271   :  { %5411 = vmatpush2.bf16.msra.mxu0 %v9010_v59  ;;  %v8932_v59 = vcombine.low %v781_v41, %v789_v45 }
 0x272   :  { %5452 = vmatpush2.bf16.msra.mxu1 %v8500_v60  ;;  %5412 = vmatprep.subr.bf16.mxu0 %v8995_v61  ;;  %v8661_v60 = vcombine.high %v509_v52, %v517_v20  ;;  %v8917_v61 = vcombine.high %v765_v55, %v773_v56 }
 0x273   :  { %5453 = vmatprep.subr.bf16.mxu1 %v8485_v62  ;;  %v493_v62 = vld [vmem:[#allocation2 + $0x928] sm:$0xff] }
 0x274   :  { %v8644_v18 = vcombine.low %v493_v62, %v501_v0 }
 0x275   :  { %5413 = vmatpush2.bf16.msra.mxu0 %v8994_v6  ;;  %v8916_v6 = vcombine.low %v765_v55, %v773_v56  ;;  %v677_v55 = vld [vmem:[#allocation2 + $0xee8] sm:$0xff] }
 0x276   :  { %5454 = vmatpush2.bf16.msra.mxu1 %v8484_v7  ;;  %5464 = vmatprep.subr.bf16.mxu0 %v8725_v8  ;;  %v8645_v7 = vcombine.high %v493_v62, %v501_v0  ;;  %v8901_v8 = vcombine.high %v749_v1, %v757_v2  ;;  %v925_v56 = vld [vmem:[#allocation2 + $0x16a8] sm:$0xff] }
 0x277   :  { %5505 = vmatprep.subr.bf16.mxu1 %v8981_v14  ;;  %v477_v14 = vld [vmem:[#allocation2 + $0x8a8] sm:$0xff] }
 0x278   :  { %v5170_v24 = vpop.f32.mrf.mxu0  ;;  %5415 = vmatmul.mubr.bf16.vlgmr.msra.gmra.mxu0 %v10083_v43  ;;  %v653_v0 = vld [vmem:[#allocation2 + $0xe28] sm:$0xff] }
 0x279   :  { %v10174_v29 = vadd.f32 %v5170_v24, %v10166_v46  ;;  %5456 = vmatmul.mubr.bf16.vlgmr.msra.gmra.mxu1 %v10069_v28  ;;  %5465 = vmatpush1.bf16.msra.mxu0 %v8724_v25  ;;  %v10177_v32 = vpop.f32.mrf.mxu1  ;;  %v8900_v25 = vcombine.low %v749_v1, %v757_v2  ;;  %v725_v24 = vld [vmem:[#allocation2 + $0x1068] sm:$0xff] }
 0x27a   :  { %5506 = vmatpush1.bf16.msra.mxu1 %v8980_v19  ;;  %v5172_v44 = vpop.f32.mrf.mxu0  ;;  %5466 = vmatprep.subr.bf16.mxu0 %v8709_v38  ;;  %v8629_v19 = vcombine.high %v477_v14, %v485_v27  ;;  %v8885_v38 = vcombine.high %v733_v9, %v741_v17  ;;  %v661_v1 = vld [vmem:[#allocation2 + $0xe68] sm:$0xff] }
 0x27b   :  { %v10180_v36 = vadd.f32 %v5172_v44, %v10169_v53  ;;  %5507 = vmatprep.subr.bf16.mxu1 %v8965_v34  ;;  %v10182_v46 = vpop.f32.mrf.mxu1  ;;  %5496 = vmatprep.mubr.bf16.mxu0 %v10057_v16  ;;  %v8948_v53 = vcombine.low %v797_v42, %v805_v26  ;;  %v461_v34 = vld [vmem:[#allocation2 + $0x828] sm:$0xff]  ;;  %v8628_v42 = vcombine.low %v477_v14, %v485_v27 }
 0x27c   :  { %v5174_v40 = vpop.f32.mrf.mxu0  ;;  %5537 = vmatprep.mubr.bf16.mxu1 %v10075_v63  ;;  %v8884_v26 = vcombine.low %v733_v9, %v741_v17  ;;  %v8869_v44 = vcombine.high %v717_v23, %v725_v24  ;;  %v8612_v5 = vcombine.low %v461_v34, %v469_v22  ;;  %v909_v2 = vld [vmem:[#allocation2 + $0x1628] sm:$0xff] }
 0x27d   :  { %5467 = vmatpush1.bf16.msra.mxu0 %v8708_v30  ;;  %v5215_v48 = vpop.f32.mrf.mxu1  ;;  %v8613_v30 = vcombine.high %v461_v34, %v469_v22  ;;  %v8868_v40 = vcombine.low %v717_v23, %v725_v24  ;;  %v637_v27 = vld [vmem:[#allocation2 + $0xda8] sm:$0xff] }
 0x27e   :  { %5508 = vmatpush1.bf16.msra.mxu1 %v8964_v33  ;;  %v5175_v49 = vpop.f32.mrf.mxu0  ;;  %5468 = vmatprep.subr.bf16.mxu0 %v8693_v35  ;;  %v701_v33 = vld [vmem:[#allocation2 + $0xfa8] sm:$0xff] }
 0x27f   :  { %5509 = vmatprep.subr.bf16.mxu1 %v8949_v37  ;;  %v5216_v54 = vpop.f32.mrf.mxu1  ;;  %v709_v35 = vld [vmem:[#allocation2 + $0xfe8] sm:$0xff] }
 0x280   :  { %v957_v37 = vld [vmem:[#allocation2 + $0x17a8] sm:$0xff]  ;;  %v8853_v41 = vcombine.high %v701_v33, %v709_v35 }
 0x281   :  { %5469 = vmatpush1.bf16.msra.mxu0 %v8692_v47  ;;  %v9109_v45 = vcombine.high %v957_v37, %v965_v39  ;;  %v685_v47 = vld [vmem:[#allocation2 + $0xf28] sm:$0xff] }
 0x282   :  { %5510 = vmatpush1.bf16.msra.mxu1 %v8948_v53  ;;  %5470 = vmatprep.subr.bf16.mxu0 %v8677_v50  ;;  %v693_v48 = vld [vmem:[#allocation2 + $0xf68] sm:$0xff]  ;;  %v8852_v50 = vcombine.low %v701_v33, %v709_v35 }
 0x283   :  { %5511 = vmatprep.subr.bf16.mxu1 %v8933_v51  ;;  %v941_v49 = vld [vmem:[#allocation2 + $0x1728] sm:$0xff]  ;;  %v9108_v51 = vcombine.low %v957_v37, %v965_v39  ;;  %v8837_v52 = vcombine.high %v685_v47, %v693_v48 }
 0x284   :  { %v949_v53 = vld [vmem:[#allocation2 + $0x1768] sm:$0xff] }
 0x285   :  { %5471 = vmatpush1.bf16.msra.mxu0 %v8676_v57  ;;  %v9093_v20 = vcombine.high %v941_v49, %v949_v53  ;;  %v669_v54 = vld [vmem:[#allocation2 + $0xea8] sm:$0xff] }
 0x286   :  { %5512 = vmatpush1.bf16.msra.mxu1 %v8932_v59  ;;  %5472 = vmatprep.subr.bf16.mxu0 %v8661_v60  ;;  %v933_v57 = vld [vmem:[#allocation2 + $0x16e8] sm:$0xff]  ;;  %v8836_v59 = vcombine.low %v685_v47, %v693_v48  ;;  %v9092_v60 = vcombine.low %v941_v49, %v949_v53 }
 0x287   :  { %5513 = vmatprep.subr.bf16.mxu1 %v8917_v61  ;;  %v8821_v61 = vcombine.high %v669_v54, %v677_v55  ;;  %v9077_v62 = vcombine.high %v925_v56, %v933_v57  ;;  %v645_v9 = vld [vmem:[#allocation2 + $0xde8] sm:$0xff] }
 0x288   :  { %v893_v17 = vld [vmem:[#allocation2 + $0x15a8] sm:$0xff] }
 0x289   :  { %5473 = vmatpush1.bf16.msra.mxu0 %v8660_v4  ;;  %v917_v4 = vld [vmem:[#allocation2 + $0x1668] sm:$0xff] }
 0x28a   :  { %5514 = vmatpush1.bf16.msra.mxu1 %v8916_v6  ;;  %5474 = vmatprep.subr.bf16.mxu0 %v8645_v7  ;;  %v8820_v6 = vcombine.low %v669_v54, %v677_v55  ;;  %v9076_v7 = vcombine.low %v925_v56, %v933_v57  ;;  %v9061_v14 = vcombine.high %v909_v2, %v917_v4  ;;  %v621_v22 = vld [vmem:[#allocation2 + $0xd28] sm:$0xff]  ;;  %v318_v55 = vld [vmem:[#allocation2 + $0x3b0] sm:$0xff] }
 0x28b   :  { %5515 = vmatprep.subr.bf16.mxu1 %v8901_v8  ;;  %v8805_v8 = vcombine.high %v653_v0, %v661_v1  ;;  %v629_v23 = vld [vmem:[#allocation2 + $0xd68] sm:$0xff]  ;;  %v326_v56 = vld [vmem:[#allocation2 + $0x3f0] sm:$0xff] }
 0x28c   :  { %v877_v24 = vld [vmem:[#allocation2 + $0x1528] sm:$0xff]  ;;  %v574_v57 = vld [vmem:[#allocation2 + $0xbb0] sm:$0xff] }
 0x28d   :  { %5475 = vmatpush1.bf16.msra.mxu0 %v8644_v18  ;;  %v901_v18 = vld [vmem:[#allocation2 + $0x15e8] sm:$0xff] }
 0x28e   :  { %5516 = vmatpush1.bf16.msra.mxu1 %v8900_v25  ;;  %5476 = vmatprep.subr.bf16.mxu0 %v8629_v19  ;;  %v8804_v25 = vcombine.low %v653_v0, %v661_v1  ;;  %v9060_v19 = vcombine.low %v909_v2, %v917_v4  ;;  %v9045_v34 = vcombine.high %v893_v17, %v901_v18  ;;  %v605_v35 = vld [vmem:[#allocation2 + $0xca8] sm:$0xff]  ;;  %v302_v1 = vld [vmem:[#allocation2 + $0x330] sm:$0xff] }
 0x28f   :  { %5517 = vmatprep.subr.bf16.mxu1 %v8885_v38  ;;  %v8789_v38 = vcombine.high %v637_v27, %v645_v9  ;;  %v613_v37 = vld [vmem:[#allocation2 + $0xce8] sm:$0xff]  ;;  %v310_v2 = vld [vmem:[#allocation2 + $0x370] sm:$0xff] }
 0x290   :  { %v861_v39 = vld [vmem:[#allocation2 + $0x14a8] sm:$0xff]  ;;  %v558_v4 = vld [vmem:[#allocation2 + $0xb30] sm:$0xff] }
 0x291   :  { %5477 = vmatpush1.bf16.msra.mxu0 %v8628_v42  ;;  %v885_v42 = vld [vmem:[#allocation2 + $0x1568] sm:$0xff] }
 0x292   :  { %5518 = vmatpush1.bf16.msra.mxu1 %v8884_v26  ;;  %5478 = vmatprep.subr.bf16.mxu0 %v8613_v30  ;;  %v8788_v26 = vcombine.low %v637_v27, %v645_v9  ;;  %v9044_v30 = vcombine.low %v893_v17, %v901_v18  ;;  %v9029_v33 = vcombine.high %v877_v24, %v885_v42  ;;  %v589_v48 = vld [vmem:[#allocation2 + $0xc28] sm:$0xff]  ;;  %v286_v9 = vld [vmem:[#allocation2 + $0x2b0] sm:$0xff] }
 0x293   :  { %5519 = vmatprep.subr.bf16.mxu1 %v8869_v44  ;;  %v8773_v44 = vcombine.high %v621_v22, %v629_v23  ;;  %v597_v49 = vld [vmem:[#allocation2 + $0xc68] sm:$0xff]  ;;  %v294_v17 = vld [vmem:[#allocation2 + $0x2f0] sm:$0xff] }
 0x294   :  { %v845_v53 = vld [vmem:[#allocation2 + $0x1428] sm:$0xff] }
 0x295   :  { %5479 = vmatpush1.bf16.msra.mxu0 %v8612_v5  ;;  %v869_v5 = vld [vmem:[#allocation2 + $0x14e8] sm:$0xff] }
 0x296   :  { %5520 = vmatpush1.bf16.msra.mxu1 %v8868_v40  ;;  %5480 = vmatprep.subr.bf16.mxu0 %v8853_v41  ;;  %v8772_v40 = vcombine.low %v621_v22, %v629_v23  ;;  %v9028_v41 = vcombine.low %v877_v24, %v885_v42  ;;  %v9013_v47 = vcombine.high %v861_v39, %v869_v5 }
 0x297   :  { %5521 = vmatprep.subr.bf16.mxu1 %v9109_v45  ;;  %v8757_v45 = vcombine.high %v605_v35, %v613_v37  ;;  %v8454_v22 = vcombine.low %v302_v1, %v310_v2  ;;  %v8439_v42 = vcombine.high %v286_v9, %v294_v17 }
 0x299   :  { %5481 = vmatpush2.bf16.msra.mxu0 %v8852_v50  ;;  %v853_v50 = vld [vmem:[#allocation2 + $0x1468] sm:$0xff] }
 0x29a   :  { %5522 = vmatpush2.bf16.msra.mxu1 %v9108_v51  ;;  %5482 = vmatprep.subr.bf16.mxu0 %v8837_v52  ;;  %v8756_v51 = vcombine.low %v605_v35, %v613_v37  ;;  %v9012_v52 = vcombine.low %v861_v39, %v869_v5  ;;  %v8997_v54 = vcombine.high %v845_v53, %v853_v50  ;;  %v270_v35 = vld [vmem:[#allocation2 + $0x230] sm:$0xff] }
 0x29b   :  { %5523 = vmatprep.subr.bf16.mxu1 %v9093_v20  ;;  %v8741_v20 = vcombine.high %v589_v48, %v597_v49  ;;  %v278_v37 = vld [vmem:[#allocation2 + $0x270] sm:$0xff] }
 0x29c   :  { %v526_v39 = vld [vmem:[#allocation2 + $0xa30] sm:$0xff] }
 0x29d   :  { %5483 = vmatpush2.bf16.msra.mxu0 %v8836_v59  ;;  %v582_v59 = vld [vmem:[#allocation2 + $0xbf0] sm:$0xff] }
 0x29e   :  { %5524 = vmatpush2.bf16.msra.mxu1 %v9092_v60  ;;  %5484 = vmatprep.subr.bf16.mxu0 %v8821_v61  ;;  %v8740_v60 = vcombine.low %v589_v48, %v597_v49  ;;  %v8996_v61 = vcombine.low %v845_v53, %v853_v50  ;;  %v8727_v0 = vcombine.high %v574_v57, %v582_v59  ;;  %v534_v5 = vld [vmem:[#allocation2 + $0xa70] sm:$0xff] }
 0x29f   :  { %5525 = vmatprep.subr.bf16.mxu1 %v9077_v62  ;;  %v8471_v62 = vcombine.high %v318_v55, %v326_v56  ;;  %v8423_v48 = vcombine.high %v270_v35, %v278_v37  ;;  %v8679_v49 = vcombine.high %v526_v39, %v534_v5  ;;  %v254_v53 = vld [vmem:[#allocation2 + $0x1b0] sm:$0xff] }
 0x2a0   :  { %v262_v50 = vld [vmem:[#allocation2 + $0x1f0] sm:$0xff] }
 0x2a1   :  { %5485 = vmatpush2.bf16.msra.mxu0 %v8820_v6  ;;  %v566_v6 = vld [vmem:[#allocation2 + $0xb70] sm:$0xff] }
 0x2a2   :  { %5526 = vmatpush2.bf16.msra.mxu1 %v9076_v7  ;;  %5486 = vmatprep.subr.bf16.mxu0 %v8805_v8  ;;  %v8470_v7 = vcombine.low %v318_v55, %v326_v56  ;;  %v8726_v8 = vcombine.low %v574_v57, %v582_v59  ;;  %v8711_v27 = vcombine.high %v558_v4, %v566_v6  ;;  %v238_v59 = vld [vmem:[#allocation2 + $0x130] sm:$0xff] }
 0x2a3   :  { %5527 = vmatprep.subr.bf16.mxu1 %v9061_v14  ;;  %v8455_v14 = vcombine.high %v302_v1, %v310_v2  ;;  %v8710_v24 = vcombine.low %v558_v4, %v566_v6  ;;  %v8678_v55 = vcombine.low %v526_v39, %v534_v5  ;;  %v8407_v56 = vcombine.high %v254_v53, %v262_v50  ;;  %v222_v6 = vld [vmem:[#allocation2 + $0xb0] sm:$0xff] }
 0x2a5   :  { %5487 = vmatpush2.bf16.msra.mxu0 %v8804_v25  ;;  %v542_v25 = vld [vmem:[#allocation2 + $0xab0] sm:$0xff] }
 0x2a6   :  { %5528 = vmatpush2.bf16.msra.mxu1 %v9060_v19  ;;  %5488 = vmatprep.subr.bf16.mxu0 %v8789_v38  ;;  %v550_v19 = vld [vmem:[#allocation2 + $0xaf0] sm:$0xff] }
 0x2a7   :  { %5529 = vmatprep.subr.bf16.mxu1 %v9045_v34 }
 0x2a9   :  { %5489 = vmatpush2.bf16.msra.mxu0 %v8788_v26 }
 0x2aa   :  { %5530 = vmatpush2.bf16.msra.mxu1 %v9044_v30  ;;  %5490 = vmatprep.subr.bf16.mxu0 %v8773_v44 }
 0x2ab   :  { %5531 = vmatprep.subr.bf16.mxu1 %v9029_v33  ;;  %v8695_v33 = vcombine.high %v542_v25, %v550_v19 }
 0x2ad   :  { %5491 = vmatpush2.bf16.msra.mxu0 %v8772_v40 }
 0x2ae   :  { %5532 = vmatpush2.bf16.msra.mxu1 %v9028_v41  ;;  %5492 = vmatprep.subr.bf16.mxu0 %v8757_v45  ;;  %v8438_v41 = vcombine.low %v286_v9, %v294_v17 }
 0x2af   :  { %5533 = vmatprep.subr.bf16.mxu1 %v9013_v47  ;;  %v8694_v47 = vcombine.low %v542_v25, %v550_v19  ;;  %v206_v25 = vld [vmem:[#allocation2 + $0x30] sm:$0xff] }
 0x2b0   :  { %v214_v19 = vld [vmem:[#allocation2 + $0x70] sm:$0xff] }
 0x2b1   :  { %5493 = vmatpush2.bf16.msra.mxu0 %v8756_v51 }
 0x2b2   :  { %5534 = vmatpush2.bf16.msra.mxu1 %v9012_v52  ;;  %5494 = vmatprep.subr.bf16.mxu0 %v8741_v20  ;;  %v510_v52 = vld [vmem:[#allocation2 + $0x9b0] sm:$0xff] }
 0x2b3   :  { %5535 = vmatprep.subr.bf16.mxu1 %v8997_v54  ;;  %v518_v20 = vld [vmem:[#allocation2 + $0x9f0] sm:$0xff]  ;;  %v8422_v54 = vcombine.low %v270_v35, %v278_v37  ;;  %v8358_v37 = vcombine.low %v206_v25, %v214_v19 }
 0x2b4   :  { %v8663_v57 = vcombine.high %v510_v52, %v518_v20  ;;  %v8662_v1 = vcombine.low %v510_v52, %v518_v20  ;;  %v710_v35 = vld [vmem:[#allocation2 + $0xff0] sm:$0xff] }
 0x2b5   :  { %5495 = vmatpush2.bf16.msra.mxu0 %v8740_v60  ;;  %v246_v60 = vld [vmem:[#allocation2 + $0x170] sm:$0xff] }
 0x2b6   :  { %5536 = vmatpush2.bf16.msra.mxu1 %v8996_v61  ;;  %5546 = vmatprep.subr.bf16.mxu0 %v8471_v62  ;;  %v494_v61 = vld [vmem:[#allocation2 + $0x930] sm:$0xff]  ;;  %v8391_v2 = vcombine.high %v238_v59, %v246_v60 }
 0x2b7   :  { %5587 = vmatprep.subr.bf16.mxu1 %v8727_v0  ;;  %v502_v62 = vld [vmem:[#allocation2 + $0x970] sm:$0xff]  ;;  %v8406_v0 = vcombine.low %v254_v53, %v262_v50 }
 0x2b8   :  { %v5252_v18 = vpop.f32.mrf.mxu0  ;;  %5497 = vmatmul.mubr.bf16.vlgmr.msra.gmra.mxu0 %v10073_v31  ;;  %v8647_v4 = vcombine.high %v494_v61, %v502_v62  ;;  %v8646_v9 = vcombine.low %v494_v61, %v502_v62  ;;  %v422_v52 = vld [vmem:[#allocation2 + $0x6f0] sm:$0xff] }
 0x2b9   :  { %v5253_v38 = vadd.f32 %v5252_v18, %v10177_v32  ;;  %5538 = vmatmul.mubr.bf16.vlgmr.msra.gmra.mxu1 %v10083_v43  ;;  %5547 = vmatpush1.bf16.msra.mxu0 %v8470_v7  ;;  %v5293_v34 = vpop.f32.mrf.mxu1  ;;  %v230_v7 = vld [vmem:[#allocation2 + $0xf0] sm:$0xff] }
 0x2ba   :  { %5588 = vmatpush1.bf16.msra.mxu1 %v8726_v8  ;;  %v5254_v23 = vpop.f32.mrf.mxu0  ;;  %5548 = vmatprep.subr.bf16.mxu0 %v8455_v14  ;;  %v478_v8 = vld [vmem:[#allocation2 + $0x8b0] sm:$0xff]  ;;  %v8375_v17 = vcombine.high %v222_v6, %v230_v7 }
 0x2bb   :  { %v5255_v26 = vadd.f32 %v5254_v23, %v10182_v46  ;;  %v10190_v30 = vadd.f32 %v5293_v34, %v5253_v38  ;;  %v5295_v44 = vpop.f32.mrf.mxu1  ;;  %5589 = vmatprep.subr.bf16.mxu1 %v8711_v27  ;;  %5578 = vmatprep.mubr.bf16.mxu0 %v10052_v11  ;;  %v486_v14 = vld [vmem:[#allocation2 + $0x8f0] sm:$0xff]  ;;  %v8390_v27 = vcombine.low %v238_v59, %v246_v60 }
 0x2bc   :  { %v5256_v32 = vpop.f32.mrf.mxu0  ;;  %5619 = vmatprep.mubr.bf16.mxu1 %v10057_v16  ;;  %v8631_v18 = vcombine.high %v478_v8, %v486_v14  ;;  %v462_v38 = vld [vmem:[#allocation2 + $0x830] sm:$0xff]  ;;  %v8630_v23 = vcombine.low %v478_v8, %v486_v14 }
 0x2bd   :  { %v10194_v40 = vadd.f32 %v5295_v44, %v5255_v26  ;;  %5549 = vmatpush1.bf16.msra.mxu0 %v8454_v22  ;;  %v5297_v45 = vpop.f32.mrf.mxu1  ;;  %v470_v34 = vld [vmem:[#allocation2 + $0x870] sm:$0xff]  ;;  %v8374_v22 = vcombine.low %v222_v6, %v230_v7 }
 0x2be   :  { %5590 = vmatpush1.bf16.msra.mxu1 %v8710_v24  ;;  %v5257_v46 = vpop.f32.mrf.mxu0  ;;  %5550 = vmatprep.subr.bf16.mxu0 %v8439_v42  ;;  %v8359_v24 = vcombine.high %v206_v25, %v214_v19  ;;  %v8615_v42 = vcombine.high %v462_v38, %v470_v34  ;;  %v446_v26 = vld [vmem:[#allocation2 + $0x7b0] sm:$0xff]  ;;  %v8614_v32 = vcombine.low %v462_v38, %v470_v34 }
 0x2bf   :  { %5591 = vmatprep.subr.bf16.mxu1 %v8695_v33  ;;  %v5298_v51 = vpop.f32.mrf.mxu1  ;;  %v454_v44 = vld [vmem:[#allocation2 + $0x7f0] sm:$0xff] }
 0x2c0   :  { %v702_v33 = vld [vmem:[#allocation2 + $0xfb0] sm:$0xff]  ;;  %v8599_v39 = vcombine.high %v446_v26, %v454_v44 }
 0x2c1   :  { %5551 = vmatpush1.bf16.msra.mxu0 %v8438_v41  ;;  %v8855_v5 = vcombine.high %v702_v33, %v710_v35  ;;  %v430_v41 = vld [vmem:[#allocation2 + $0x730] sm:$0xff] }
 0x2c2   :  { %5592 = vmatpush1.bf16.msra.mxu1 %v8694_v47  ;;  %5552 = vmatprep.subr.bf16.mxu0 %v8423_v48  ;;  %v438_v45 = vld [vmem:[#allocation2 + $0x770] sm:$0xff]  ;;  %v8598_v48 = vcombine.low %v446_v26, %v454_v44 }
 0x2c3   :  { %5593 = vmatprep.subr.bf16.mxu1 %v8679_v49  ;;  %v686_v46 = vld [vmem:[#allocation2 + $0xf30] sm:$0xff]  ;;  %v8854_v49 = vcombine.low %v702_v33, %v710_v35  ;;  %v8583_v53 = vcombine.high %v430_v41, %v438_v45 }
 0x2c4   :  { %v694_v47 = vld [vmem:[#allocation2 + $0xf70] sm:$0xff] }
 0x2c5   :  { %5553 = vmatpush1.bf16.msra.mxu0 %v8422_v54  ;;  %v8839_v50 = vcombine.high %v686_v46, %v694_v47  ;;  %v414_v51 = vld [vmem:[#allocation2 + $0x6b0] sm:$0xff] }
 0x2c6   :  { %5594 = vmatpush1.bf16.msra.mxu1 %v8678_v55  ;;  %5554 = vmatprep.subr.bf16.mxu0 %v8407_v56  ;;  %v670_v20 = vld [vmem:[#allocation2 + $0xeb0] sm:$0xff]  ;;  %v8582_v55 = vcombine.low %v430_v41, %v438_v45  ;;  %v8838_v56 = vcombine.low %v686_v46, %v694_v47 }
 0x2c7   :  { %5595 = vmatprep.subr.bf16.mxu1 %v8663_v57  ;;  %v678_v54 = vld [vmem:[#allocation2 + $0xef0] sm:$0xff]  ;;  %v8567_v57 = vcombine.high %v414_v51, %v422_v52 }
 0x2c8   :  { %v8823_v59 = vcombine.high %v670_v20, %v678_v54  ;;  %v398_v60 = vld [vmem:[#allocation2 + $0x630] sm:$0xff] }
 0x2c9   :  { %5555 = vmatpush1.bf16.msra.mxu0 %v8406_v0  ;;  %v406_v61 = vld [vmem:[#allocation2 + $0x670] sm:$0xff] }
 0x2ca   :  { %5596 = vmatpush1.bf16.msra.mxu1 %v8662_v1  ;;  %5556 = vmatprep.subr.bf16.mxu0 %v8391_v2  ;;  %v654_v62 = vld [vmem:[#allocation2 + $0xe30] sm:$0xff]  ;;  %v8566_v1 = vcombine.low %v414_v51, %v422_v52  ;;  %v8822_v2 = vcombine.low %v670_v20, %v678_v54  ;;  %v319_v54 = vld [vmem:[#allocation2 + $0x3b8] sm:$0xff] }
 0x2cb   :  { %5597 = vmatprep.subr.bf16.mxu1 %v8647_v4  ;;  %v662_v0 = vld [vmem:[#allocation2 + $0xe70] sm:$0xff]  ;;  %v8551_v4 = vcombine.high %v398_v60, %v406_v61 }
 0x2cc   :  { %v8807_v6 = vcombine.high %v654_v62, %v662_v0  ;;  %v382_v7 = vld [vmem:[#allocation2 + $0x5b0] sm:$0xff] }
 0x2cd   :  { %5557 = vmatpush1.bf16.msra.mxu0 %v8390_v27  ;;  %v390_v8 = vld [vmem:[#allocation2 + $0x5f0] sm:$0xff] }
 0x2ce   :  { %5598 = vmatpush1.bf16.msra.mxu1 %v8646_v9  ;;  %5558 = vmatprep.subr.bf16.mxu0 %v8375_v17  ;;  %v638_v14 = vld [vmem:[#allocation2 + $0xdb0] sm:$0xff]  ;;  %v8550_v9 = vcombine.low %v398_v60, %v406_v61  ;;  %v8806_v17 = vcombine.low %v654_v62, %v662_v0  ;;  %v303_v0 = vld [vmem:[#allocation2 + $0x338] sm:$0xff] }
 0x2cf   :  { %5599 = vmatprep.subr.bf16.mxu1 %v8631_v18  ;;  %v646_v27 = vld [vmem:[#allocation2 + $0xdf0] sm:$0xff]  ;;  %v8535_v18 = vcombine.high %v382_v7, %v390_v8 }
 0x2d0   :  { %v8791_v25 = vcombine.high %v638_v14, %v646_v27  ;;  %v366_v19 = vld [vmem:[#allocation2 + $0x530] sm:$0xff] }
 0x2d1   :  { %5559 = vmatpush1.bf16.msra.mxu0 %v8374_v22  ;;  %v374_v38 = vld [vmem:[#allocation2 + $0x570] sm:$0xff] }
 0x2d2   :  { %5600 = vmatpush1.bf16.msra.mxu1 %v8630_v23  ;;  %5560 = vmatprep.subr.bf16.mxu0 %v8359_v24  ;;  %v622_v34 = vld [vmem:[#allocation2 + $0xd30] sm:$0xff]  ;;  %v8534_v23 = vcombine.low %v382_v7, %v390_v8  ;;  %v8790_v24 = vcombine.low %v638_v14, %v646_v27 }
 0x2d3   :  { %5601 = vmatprep.subr.bf16.mxu1 %v8615_v42  ;;  %v630_v22 = vld [vmem:[#allocation2 + $0xd70] sm:$0xff]  ;;  %v8519_v42 = vcombine.high %v366_v19, %v374_v38 }
 0x2d4   :  { %v8775_v26 = vcombine.high %v622_v34, %v630_v22  ;;  %v350_v44 = vld [vmem:[#allocation2 + $0x4b0] sm:$0xff] }
 0x2d5   :  { %5561 = vmatpush1.bf16.msra.mxu0 %v8358_v37  ;;  %v358_v33 = vld [vmem:[#allocation2 + $0x4f0] sm:$0xff] }
 0x2d6   :  { %5602 = vmatpush1.bf16.msra.mxu1 %v8614_v32  ;;  %5562 = vmatprep.subr.bf16.mxu0 %v8599_v39  ;;  %v606_v35 = vld [vmem:[#allocation2 + $0xcb0] sm:$0xff]  ;;  %v8518_v32 = vcombine.low %v366_v19, %v374_v38  ;;  %v8774_v39 = vcombine.low %v622_v34, %v630_v22 }
 0x2d7   :  { %5603 = vmatprep.subr.bf16.mxu1 %v8855_v5  ;;  %v614_v37 = vld [vmem:[#allocation2 + $0xcf0] sm:$0xff]  ;;  %v8503_v5 = vcombine.high %v350_v44, %v358_v33 }
 0x2d8   :  { %v8759_v41 = vcombine.high %v606_v35, %v614_v37  ;;  %v334_v45 = vld [vmem:[#allocation2 + $0x430] sm:$0xff] }
 0x2d9   :  { %5563 = vmatpush2.bf16.msra.mxu0 %v8598_v48  ;;  %v342_v46 = vld [vmem:[#allocation2 + $0x470] sm:$0xff] }
 0x2da   :  { %5604 = vmatpush2.bf16.msra.mxu1 %v8854_v49  ;;  %5564 = vmatprep.subr.bf16.mxu0 %v8583_v53  ;;  %v590_v47 = vld [vmem:[#allocation2 + $0xc30] sm:$0xff]  ;;  %v8502_v49 = vcombine.low %v350_v44, %v358_v33  ;;  %v8758_v53 = vcombine.low %v606_v35, %v614_v37  ;;  %v271_v35 = vld [vmem:[#allocation2 + $0x238] sm:$0xff] }
 0x2db   :  { %5605 = vmatprep.subr.bf16.mxu1 %v8839_v50  ;;  %v598_v48 = vld [vmem:[#allocation2 + $0xc70] sm:$0xff]  ;;  %v8487_v50 = vcombine.high %v334_v45, %v342_v46  ;;  %v279_v37 = vld [vmem:[#allocation2 + $0x278] sm:$0xff] }
 0x2dc   :  { %v8743_v51 = vcombine.high %v590_v47, %v598_v48  ;;  %v830_v52 = vld [vmem:[#allocation2 + $0x13b0] sm:$0xff] }
 0x2dd   :  { %5565 = vmatpush2.bf16.msra.mxu0 %v8582_v55  ;;  %v838_v20 = vld [vmem:[#allocation2 + $0x13f0] sm:$0xff]  ;;  %v327_v55 = vld [vmem:[#allocation2 + $0x3f8] sm:$0xff] }
 0x2de   :  { %5606 = vmatpush2.bf16.msra.mxu1 %v8838_v56  ;;  %5566 = vmatprep.subr.bf16.mxu0 %v8567_v57  ;;  %v8486_v56 = vcombine.low %v334_v45, %v342_v46  ;;  %v8742_v57 = vcombine.low %v590_v47, %v598_v48  ;;  %v8473_v60 = vcombine.high %v319_v54, %v327_v55  ;;  %v814_v61 = vld [vmem:[#allocation2 + $0x1330] sm:$0xff] }
 0x2df   :  { %5607 = vmatprep.subr.bf16.mxu1 %v8823_v59  ;;  %v8983_v59 = vcombine.high %v830_v52, %v838_v20  ;;  %v822_v62 = vld [vmem:[#allocation2 + $0x1370] sm:$0xff]  ;;  %v8425_v46 = vcombine.high %v271_v35, %v279_v37 }
 0x2e0   :  { %v798_v8 = vld [vmem:[#allocation2 + $0x12b0] sm:$0xff] }
 0x2e1   :  { %5567 = vmatpush2.bf16.msra.mxu0 %v8566_v1  ;;  %v311_v1 = vld [vmem:[#allocation2 + $0x378] sm:$0xff]  ;;  %v806_v14 = vld [vmem:[#allocation2 + $0x12f0] sm:$0xff] }
 0x2e2   :  { %5608 = vmatpush2.bf16.msra.mxu1 %v8822_v2  ;;  %5568 = vmatprep.subr.bf16.mxu0 %v8551_v4  ;;  %v8982_v2 = vcombine.low %v830_v52, %v838_v20  ;;  %v8472_v4 = vcombine.low %v319_v54, %v327_v55  ;;  %v8457_v7 = vcombine.high %v303_v0, %v311_v1  ;;  %v766_v47 = vld [vmem:[#allocation2 + $0x11b0] sm:$0xff] }
 0x2e3   :  { %5609 = vmatprep.subr.bf16.mxu1 %v8807_v6  ;;  %v8967_v6 = vcombine.high %v814_v61, %v822_v62  ;;  %v8456_v34 = vcombine.low %v303_v0, %v311_v1  ;;  %v8951_v22 = vcombine.high %v798_v8, %v806_v14  ;;  %v774_v48 = vld [vmem:[#allocation2 + $0x11f0] sm:$0xff] }
 0x2e4   :  { %v8919_v52 = vcombine.high %v766_v47, %v774_v48  ;;  %v750_v54 = vld [vmem:[#allocation2 + $0x1130] sm:$0xff] }
 0x2e5   :  { %5569 = vmatpush2.bf16.msra.mxu0 %v8550_v9  ;;  %v287_v9 = vld [vmem:[#allocation2 + $0x2b8] sm:$0xff]  ;;  %v758_v55 = vld [vmem:[#allocation2 + $0x1170] sm:$0xff] }
 0x2e6   :  { %5610 = vmatpush2.bf16.msra.mxu1 %v8806_v17  ;;  %5570 = vmatprep.subr.bf16.mxu0 %v8535_v18  ;;  %v295_v17 = vld [vmem:[#allocation2 + $0x2f8] sm:$0xff]  ;;  %v734_v0 = vld [vmem:[#allocation2 + $0x10b0] sm:$0xff] }
 0x2e7   :  { %5611 = vmatprep.subr.bf16.mxu1 %v8791_v25  ;;  %v8966_v25 = vcombine.low %v814_v61, %v822_v62  ;;  %v8903_v61 = vcombine.high %v750_v54, %v758_v55  ;;  %v742_v1 = vld [vmem:[#allocation2 + $0x10f0] sm:$0xff] }
 0x2e9   :  { %5571 = vmatpush2.bf16.msra.mxu0 %v8534_v23 }
 0x2ea   :  { %5612 = vmatpush2.bf16.msra.mxu1 %v8790_v24  ;;  %5572 = vmatprep.subr.bf16.mxu0 %v8519_v42  ;;  %v8441_v24 = vcombine.high %v287_v9, %v295_v17  ;;  %v782_v42 = vld [vmem:[#allocation2 + $0x1230] sm:$0xff] }
 0x2eb   :  { %5613 = vmatprep.subr.bf16.mxu1 %v8775_v26  ;;  %v790_v26 = vld [vmem:[#allocation2 + $0x1270] sm:$0xff] }
 0x2ec   :  { %v8935_v45 = vcombine.high %v782_v42, %v790_v26 }
 0x2ed   :  { %5573 = vmatpush2.bf16.msra.mxu0 %v8518_v32  ;;  %v8950_v32 = vcombine.low %v798_v8, %v806_v14  ;;  %v8887_v8 = vcombine.high %v734_v0, %v742_v1 }
 0x2ee   :  { %5614 = vmatpush2.bf16.msra.mxu1 %v8774_v39  ;;  %5574 = vmatprep.subr.bf16.mxu0 %v8503_v5 }
 0x2ef   :  { %5615 = vmatprep.subr.bf16.mxu1 %v8759_v41  ;;  %v8440_v41 = vcombine.low %v287_v9, %v295_v17  ;;  %v726_v9 = vld [vmem:[#allocation2 + $0x1070] sm:$0xff]  ;;  %v207_v17 = vld [vmem:[#allocation2 + $0x38] sm:$0xff] }
 0x2f1   :  { %5575 = vmatpush2.bf16.msra.mxu0 %v8502_v49 }
 0x2f2   :  { %5616 = vmatpush2.bf16.msra.mxu1 %v8758_v53  ;;  %5576 = vmatprep.subr.bf16.mxu0 %v8487_v50  ;;  %v255_v53 = vld [vmem:[#allocation2 + $0x1b8] sm:$0xff] }
 0x2f3   :  { %5617 = vmatprep.subr.bf16.mxu1 %v8743_v51  ;;  %v263_v50 = vld [vmem:[#allocation2 + $0x1f8] sm:$0xff]  ;;  %v8934_v51 = vcombine.low %v782_v42, %v790_v26 }
 0x2f4   :  { %v8409_v20 = vcombine.high %v255_v53, %v263_v50  ;;  %v447_v42 = vld [vmem:[#allocation2 + $0x7b8] sm:$0xff] }
 0x2f5   :  { %5577 = vmatpush2.bf16.msra.mxu0 %v8486_v56  ;;  %v239_v56 = vld [vmem:[#allocation2 + $0x138] sm:$0xff] }
 0x2f6   :  { %5618 = vmatpush2.bf16.msra.mxu1 %v8742_v57  ;;  %5628 = vmatprep.subr.bf16.mxu0 %v8983_v59  ;;  %v247_v57 = vld [vmem:[#allocation2 + $0x178] sm:$0xff]  ;;  %v8918_v59 = vcombine.low %v766_v47, %v774_v48 }
 0x2f7   :  { %5669 = vmatprep.subr.bf16.mxu1 %v8473_v60  ;;  %v8408_v60 = vcombine.low %v255_v53, %v263_v50  ;;  %v8393_v62 = vcombine.high %v239_v56, %v247_v57  ;;  %v455_v26 = vld [vmem:[#allocation2 + $0x7f8] sm:$0xff]  ;;  %v926_v53 = vld [vmem:[#allocation2 + $0x16b0] sm:$0xff] }
 0x2f8   :  { %v5334_v27 = vpop.f32.mrf.mxu0  ;;  %5579 = vmatmul.mubr.bf16.vlgmr.msra.gmra.mxu0 %v10069_v28  ;;  %v8600_v47 = vcombine.low %v447_v42, %v455_v26  ;;  %v934_v50 = vld [vmem:[#allocation2 + $0x16f0] sm:$0xff] }
 0x2f9   :  { %v5375_v18 = vpop.f32.mrf.mxu1  ;;  %5620 = vmatmul.mubr.bf16.vlgmr.msra.gmra.mxu1 %v10073_v31  ;;  %5629 = vmatpush1.bf16.msra.mxu0 %v8982_v2  ;;  %v223_v2 = vld [vmem:[#allocation2 + $0xb8] sm:$0xff] }
 0x2fa   :  { %v10198_v19 = vadd.f32 %v5375_v18, %v5334_v27  ;;  %v5336_v38 = vpop.f32.mrf.mxu0  ;;  %5670 = vmatpush1.bf16.msra.mxu1 %v8472_v4  ;;  %5630 = vmatprep.subr.bf16.mxu0 %v8967_v6  ;;  %v231_v4 = vld [vmem:[#allocation2 + $0xf8] sm:$0xff]  ;;  %v8902_v6 = vcombine.low %v750_v54, %v758_v55  ;;  %v718_v27 = vld [vmem:[#allocation2 + $0x1030] sm:$0xff]  ;;  %v9079_v54 = vcombine.high %v926_v53, %v934_v50 }
 0x2fb   :  { %v5377_v23 = vpop.f32.mrf.mxu1  ;;  %5671 = vmatprep.subr.bf16.mxu1 %v8457_v7  ;;  %5660 = vmatprep.mubr.bf16.mxu0 %v10075_v63  ;;  %v8392_v7 = vcombine.low %v239_v56, %v247_v57  ;;  %v8377_v14 = vcombine.high %v223_v2, %v231_v4  ;;  %v215_v18 = vld [vmem:[#allocation2 + $0x78] sm:$0xff]  ;;  %v910_v56 = vld [vmem:[#allocation2 + $0x1630] sm:$0xff] }
 0x2fc   :  { %v10201_v44 = vadd.f32 %v5377_v23, %v5336_v38  ;;  %v5338_v33 = vpop.f32.mrf.mxu0  ;;  %5701 = vmatprep.mubr.bf16.mxu1 %v10052_v11  ;;  %v8424_v11 = vcombine.low %v271_v35, %v279_v37  ;;  %v8376_v38 = vcombine.low %v223_v2, %v231_v4  ;;  %v958_v23 = vld [vmem:[#allocation2 + $0x17b0] sm:$0xff]  ;;  %v8360_v35 = vcombine.low %v207_v17, %v215_v18 }
 0x2fd   :  { %5631 = vmatpush1.bf16.msra.mxu0 %v8966_v25  ;;  %v5379_v39 = vpop.f32.mrf.mxu1  ;;  %v8886_v25 = vcombine.low %v734_v0, %v742_v1  ;;  %v8870_v33 = vcombine.low %v718_v27, %v726_v9  ;;  %v918_v57 = vld [vmem:[#allocation2 + $0x1670] sm:$0xff] }
 0x2fe   :  { %v5339_v5 = vpop.f32.mrf.mxu0  ;;  %5672 = vmatpush1.bf16.msra.mxu1 %v8456_v34  ;;  %5632 = vmatprep.subr.bf16.mxu0 %v8951_v22  ;;  %v8871_v34 = vcombine.high %v718_v27, %v726_v9  ;;  %v8361_v22 = vcombine.high %v207_v17, %v215_v18  ;;  %v942_v39 = vld [vmem:[#allocation2 + $0x1730] sm:$0xff]  ;;  %v9063_v0 = vcombine.high %v910_v56, %v918_v57 }
 0x2ff   :  { %5673 = vmatprep.subr.bf16.mxu1 %v8441_v24  ;;  %v5380_v49 = vpop.f32.mrf.mxu1  ;;  %v966_v24 = vld [vmem:[#allocation2 + $0x17f0] sm:$0xff] }
 0x300   :  { %v9111_v37 = vcombine.high %v958_v23, %v966_v24  ;;  %v950_v5 = vld [vmem:[#allocation2 + $0x1770] sm:$0xff] }
 0x301   :  { %5633 = vmatpush1.bf16.msra.mxu0 %v8950_v32  ;;  %v8601_v32 = vcombine.high %v447_v42, %v455_v26  ;;  %v9095_v48 = vcombine.high %v942_v39, %v950_v5  ;;  %v894_v2 = vld [vmem:[#allocation2 + $0x15b0] sm:$0xff] }
 0x302   :  { %5674 = vmatpush1.bf16.msra.mxu1 %v8440_v41  ;;  %5634 = vmatprep.subr.bf16.mxu0 %v8935_v45  ;;  %v431_v41 = vld [vmem:[#allocation2 + $0x738] sm:$0xff]  ;;  %v902_v4 = vld [vmem:[#allocation2 + $0x15f0] sm:$0xff] }
 0x303   :  { %5675 = vmatprep.subr.bf16.mxu1 %v8425_v46  ;;  %v439_v45 = vld [vmem:[#allocation2 + $0x778] sm:$0xff]  ;;  %v9110_v46 = vcombine.low %v958_v23, %v966_v24  ;;  %v9047_v27 = vcombine.high %v894_v2, %v902_v4  ;;  %v878_v17 = vld [vmem:[#allocation2 + $0x1530] sm:$0xff] }
 0x304   :  { %v8585_v49 = vcombine.high %v431_v41, %v439_v45  ;;  %v886_v18 = vld [vmem:[#allocation2 + $0x1570] sm:$0xff] }
 0x305   :  { %5635 = vmatpush1.bf16.msra.mxu0 %v8934_v51  ;;  %v415_v51 = vld [vmem:[#allocation2 + $0x6b8] sm:$0xff]  ;;  %v9031_v23 = vcombine.high %v878_v17, %v886_v18  ;;  %v862_v42 = vld [vmem:[#allocation2 + $0x14b0] sm:$0xff] }
 0x306   :  { %5676 = vmatpush1.bf16.msra.mxu1 %v8424_v11  ;;  %5636 = vmatprep.subr.bf16.mxu0 %v8919_v52  ;;  %v423_v11 = vld [vmem:[#allocation2 + $0x6f8] sm:$0xff]  ;;  %v9094_v52 = vcombine.low %v942_v39, %v950_v5  ;;  %v870_v26 = vld [vmem:[#allocation2 + $0x14f0] sm:$0xff] }
 0x307   :  { %5677 = vmatprep.subr.bf16.mxu1 %v8409_v20  ;;  %v8584_v20 = vcombine.low %v431_v41, %v439_v45  ;;  %v8569_v55 = vcombine.high %v415_v51, %v423_v11  ;;  %v9015_v39 = vcombine.high %v862_v42, %v870_v26  ;;  %v846_v41 = vld [vmem:[#allocation2 + $0x1430] sm:$0xff] }
 0x308   :  { %v854_v45 = vld [vmem:[#allocation2 + $0x1470] sm:$0xff] }
 0x309   :  { %5637 = vmatpush1.bf16.msra.mxu0 %v8918_v59  ;;  %v399_v59 = vld [vmem:[#allocation2 + $0x638] sm:$0xff] }
 0x30a   :  { %5678 = vmatpush1.bf16.msra.mxu1 %v8408_v60  ;;  %5638 = vmatprep.subr.bf16.mxu0 %v8903_v61  ;;  %v407_v60 = vld [vmem:[#allocation2 + $0x678] sm:$0xff]  ;;  %v9078_v61 = vcombine.low %v926_v53, %v934_v50  ;;  %v8999_v53 = vcombine.high %v846_v41, %v854_v45 }
 0x30b   :  { %5679 = vmatprep.subr.bf16.mxu1 %v8393_v62  ;;  %v8568_v62 = vcombine.low %v415_v51, %v423_v11  ;;  %v8553_v1 = vcombine.high %v399_v59, %v407_v60  ;;  %v575_v51 = vld [vmem:[#allocation2 + $0xbb8] sm:$0xff] }
 0x30c   :  { %v583_v11 = vld [vmem:[#allocation2 + $0xbf8] sm:$0xff] }
 0x30d   :  { %5639 = vmatpush1.bf16.msra.mxu0 %v8902_v6  ;;  %v383_v6 = vld [vmem:[#allocation2 + $0x5b8] sm:$0xff] }
 0x30e   :  { %5680 = vmatpush1.bf16.msra.mxu1 %v8392_v7  ;;  %5640 = vmatprep.subr.bf16.mxu0 %v8887_v8  ;;  %v391_v7 = vld [vmem:[#allocation2 + $0x5f8] sm:$0xff]  ;;  %v9062_v8 = vcombine.low %v910_v56, %v918_v57  ;;  %v8729_v56 = vcombine.high %v575_v51, %v583_v11 }
 0x30f   :  { %5681 = vmatprep.subr.bf16.mxu1 %v8377_v14  ;;  %v8552_v14 = vcombine.low %v399_v59, %v407_v60  ;;  %v8537_v9 = vcombine.high %v383_v6, %v391_v7  ;;  %v559_v59 = vld [vmem:[#allocation2 + $0xb38] sm:$0xff] }
 0x310   :  { %v567_v60 = vld [vmem:[#allocation2 + $0xb78] sm:$0xff] }
 0x311   :  { %5641 = vmatpush1.bf16.msra.mxu0 %v8886_v25  ;;  %v367_v25 = vld [vmem:[#allocation2 + $0x538] sm:$0xff] }
 0x312   :  { %5682 = vmatpush1.bf16.msra.mxu1 %v8376_v38  ;;  %5642 = vmatprep.subr.bf16.mxu0 %v8871_v34  ;;  %v375_v38 = vld [vmem:[#allocation2 + $0x578] sm:$0xff]  ;;  %v9046_v34 = vcombine.low %v894_v2, %v902_v4  ;;  %v8713_v2 = vcombine.high %v559_v59, %v567_v60 }
 0x313   :  { %5683 = vmatprep.subr.bf16.mxu1 %v8361_v22  ;;  %v8536_v22 = vcombine.low %v383_v6, %v391_v7  ;;  %v8521_v24 = vcombine.high %v367_v25, %v375_v38  ;;  %v543_v6 = vld [vmem:[#allocation2 + $0xab8] sm:$0xff] }
 0x314   :  { %v551_v7 = vld [vmem:[#allocation2 + $0xaf8] sm:$0xff] }
 0x315   :  { %5643 = vmatpush1.bf16.msra.mxu0 %v8870_v33  ;;  %v351_v33 = vld [vmem:[#allocation2 + $0x4b8] sm:$0xff] }
 0x316   :  { %5684 = vmatpush1.bf16.msra.mxu1 %v8360_v35  ;;  %5644 = vmatprep.subr.bf16.mxu0 %v9111_v37  ;;  %v359_v35 = vld [vmem:[#allocation2 + $0x4f8] sm:$0xff]  ;;  %v9030_v37 = vcombine.low %v878_v17, %v886_v18  ;;  %v8712_v17 = vcombine.low %v559_v59, %v567_v60 }
 0x317   :  { %5685 = vmatprep.subr.bf16.mxu1 %v8601_v32  ;;  %v8520_v32 = vcombine.low %v367_v25, %v375_v38  ;;  %v8505_v5 = vcombine.high %v351_v33, %v359_v35  ;;  %v487_v59 = vld [vmem:[#allocation2 + $0x8f8] sm:$0xff] }
 0x318   :  { %v735_v60 = vld [vmem:[#allocation2 + $0x10b8] sm:$0xff] }
 0x319   :  { %5645 = vmatpush2.bf16.msra.mxu0 %v9110_v46  ;;  %v335_v46 = vld [vmem:[#allocation2 + $0x438] sm:$0xff] }
 0x31a   :  { %5686 = vmatpush2.bf16.msra.mxu1 %v8600_v47  ;;  %5646 = vmatprep.subr.bf16.mxu0 %v9095_v48  ;;  %v343_v47 = vld [vmem:[#allocation2 + $0x478] sm:$0xff]  ;;  %v9014_v48 = vcombine.low %v862_v42, %v870_v26 }
 0x31b   :  { %5687 = vmatprep.subr.bf16.mxu1 %v8585_v49  ;;  %v8504_v49 = vcombine.low %v351_v33, %v359_v35  ;;  %v8489_v50 = vcombine.high %v335_v46, %v343_v47  ;;  %v535_v42 = vld [vmem:[#allocation2 + $0xa78] sm:$0xff]  ;;  %v8696_v35 = vcombine.low %v543_v6, %v551_v7 }
 0x31c   :  { %v783_v26 = vld [vmem:[#allocation2 + $0x1238] sm:$0xff] }
 0x31d   :  { %5647 = vmatpush2.bf16.msra.mxu0 %v9094_v52  ;;  %v831_v52 = vld [vmem:[#allocation2 + $0x13b8] sm:$0xff] }
 0x31e   :  { %5688 = vmatpush2.bf16.msra.mxu1 %v8584_v20  ;;  %5648 = vmatprep.subr.bf16.mxu0 %v9079_v54  ;;  %v839_v20 = vld [vmem:[#allocation2 + $0x13f8] sm:$0xff]  ;;  %v8998_v54 = vcombine.low %v846_v41, %v854_v45 }
 0x31f   :  { %5689 = vmatprep.subr.bf16.mxu1 %v8569_v55  ;;  %v8488_v55 = vcombine.low %v335_v46, %v343_v47  ;;  %v8985_v57 = vcombine.high %v831_v52, %v839_v20  ;;  %v791_v33 = vld [vmem:[#allocation2 + $0x1278] sm:$0xff] }
 0x320   :  { %v511_v41 = vld [vmem:[#allocation2 + $0x9b8] sm:$0xff] }
 0x321   :  { %5649 = vmatpush2.bf16.msra.mxu0 %v9078_v61  ;;  %v815_v61 = vld [vmem:[#allocation2 + $0x1338] sm:$0xff] }
 0x322   :  { %5690 = vmatpush2.bf16.msra.mxu1 %v8568_v62  ;;  %5650 = vmatprep.subr.bf16.mxu0 %v9063_v0  ;;  %v823_v62 = vld [vmem:[#allocation2 + $0x1378] sm:$0xff]  ;;  %v8728_v0 = vcombine.low %v575_v51, %v583_v11 }
 0x323   :  { %5691 = vmatprep.subr.bf16.mxu1 %v8553_v1  ;;  %v8984_v1 = vcombine.low %v831_v52, %v839_v20  ;;  %v8969_v4 = vcombine.high %v815_v61, %v823_v62  ;;  %v8968_v38 = vcombine.low %v815_v61, %v823_v62  ;;  %v519_v45 = vld [vmem:[#allocation2 + $0x9f8] sm:$0xff] }
 0x324   :  { %v767_v47 = vld [vmem:[#allocation2 + $0x11b8] sm:$0xff]  ;;  %v8664_v20 = vcombine.low %v511_v41, %v519_v45 }
 0x325   :  { %5651 = vmatpush2.bf16.msra.mxu0 %v9062_v8  ;;  %v503_v51 = vld [vmem:[#allocation2 + $0x978] sm:$0xff] }
 0x326   :  { %5692 = vmatpush2.bf16.msra.mxu1 %v8552_v14  ;;  %5652 = vmatprep.subr.bf16.mxu0 %v9047_v27  ;;  %v799_v14 = vld [vmem:[#allocation2 + $0x12b8] sm:$0xff] }
 0x327   :  { %5693 = vmatprep.subr.bf16.mxu1 %v8537_v9  ;;  %v807_v27 = vld [vmem:[#allocation2 + $0x12f8] sm:$0xff] }
 0x328   :  { %v751_v11 = vld [vmem:[#allocation2 + $0x1138] sm:$0xff] }
 0x329   :  { %5653 = vmatpush2.bf16.msra.mxu0 %v9046_v34  ;;  %v8697_v34 = vcombine.high %v543_v6, %v551_v7  ;;  %v759_v52 = vld [vmem:[#allocation2 + $0x1178] sm:$0xff] }
 0x32a   :  { %5694 = vmatpush2.bf16.msra.mxu1 %v8536_v22  ;;  %5654 = vmatprep.subr.bf16.mxu0 %v9031_v23  ;;  %v8953_v23 = vcombine.high %v799_v14, %v807_v27  ;;  %v743_v61 = vld [vmem:[#allocation2 + $0x10f8] sm:$0xff] }
 0x32b   :  { %5695 = vmatprep.subr.bf16.mxu1 %v8521_v24  ;;  %v527_v24 = vld [vmem:[#allocation2 + $0xa38] sm:$0xff] }
 0x32c   :  { %v471_v6 = vld [vmem:[#allocation2 + $0x878] sm:$0xff] }
 0x32d   :  { %5655 = vmatpush2.bf16.msra.mxu0 %v9030_v37  ;;  %v719_v7 = vld [vmem:[#allocation2 + $0x1038] sm:$0xff] }
 0x32e   :  { %5696 = vmatpush2.bf16.msra.mxu1 %v8520_v32  ;;  %5656 = vmatprep.subr.bf16.mxu0 %v9015_v39  ;;  %v8681_v39 = vcombine.high %v527_v24, %v535_v42 }
 0x32f   :  { %5697 = vmatprep.subr.bf16.mxu1 %v8505_v5  ;;  %v8937_v5 = vcombine.high %v783_v26, %v791_v33 }
 0x331   :  { %5657 = vmatpush2.bf16.msra.mxu0 %v9014_v48  ;;  %v8680_v48 = vcombine.low %v527_v24, %v535_v42  ;;  %v967_v24 = vld [vmem:[#allocation2 + $0x17f8] sm:$0xff] }
 0x332   :  { %5698 = vmatpush2.bf16.msra.mxu1 %v8504_v49  ;;  %5658 = vmatprep.subr.bf16.mxu0 %v8999_v53  ;;  %v8665_v49 = vcombine.high %v511_v41, %v519_v45  ;;  %v5821_v41 = vpop.xlane.xlu0 %5820 }
 0x333   :  { %5699 = vmatprep.subr.bf16.mxu1 %v8489_v50  ;;  %v495_v50 = vld [vmem:[#allocation2 + $0x938] sm:$0xff] }
 0x334   :  { %v8648_v62 = vcombine.low %v495_v50, %v503_v51 }
 0x335   :  { %5659 = vmatpush2.bf16.msra.mxu0 %v8998_v54 }
 0x336   :  { %5700 = vmatpush2.bf16.msra.mxu1 %v8488_v55  ;;  %5710 = vmatprep.subr.bf16.mxu0 %v8729_v56  ;;  %v8649_v55 = vcombine.high %v495_v50, %v503_v51  ;;  %v8905_v56 = vcombine.high %v751_v11, %v759_v52  ;;  %v935_v50 = vld [vmem:[#allocation2 + $0x16f8] sm:$0xff]  ;;  %v5826_v51 = vmul.f32 0.0625, %v5821_v41 }
 0x337   :  { %5751 = vmatprep.subr.bf16.mxu1 %v8985_v57  ;;  %v479_v57 = vld [vmem:[#allocation2 + $0x8b8] sm:$0xff] }
 0x338   :  { %v5416_v8 = vpop.f32.mrf.mxu0  ;;  %5661 = vmatmul.mubr.bf16.vlgmr.msra.gmra.mxu0 %v10083_v43 }
 0x339   :  { %v10206_v9 = vadd.f32 %v5416_v8, %v10198_v19  ;;  %5711 = vmatpush1.bf16.msra.mxu0 %v8728_v0  ;;  %5702 = vmatmul.mubr.bf16.vlgmr.msra.gmra.mxu1 %v10069_v28  ;;  %v10209_v18 = vpop.f32.mrf.mxu1  ;;  %v8904_v0 = vcombine.low %v751_v11, %v759_v52  ;;  %v727_v8 = vld [vmem:[#allocation2 + $0x1078] sm:$0xff] }
 0x33a   :  { %v5418_v25 = vpop.f32.mrf.mxu0  ;;  %5752 = vmatpush1.bf16.msra.mxu1 %v8984_v1  ;;  %5712 = vmatprep.subr.bf16.mxu0 %v8713_v2  ;;  %v8633_v1 = vcombine.high %v479_v57, %v487_v59  ;;  %v8889_v2 = vcombine.high %v735_v60, %v743_v61 }
 0x33b   :  { %v10212_v22 = vadd.f32 %v5418_v25, %v10201_v44  ;;  %5753 = vmatprep.subr.bf16.mxu1 %v8969_v4  ;;  %v10214_v19 = vpop.f32.mrf.mxu1  ;;  %5742 = vmatprep.mubr.bf16.mxu0 %v10057_v16  ;;  %v8952_v44 = vcombine.low %v799_v14, %v807_v27  ;;  %v775_v16 = vld [vmem:[#allocation2 + $0x11f8] sm:$0xff]  ;;  %v8632_v14 = vcombine.low %v479_v57, %v487_v59 }
 0x33c   :  { %v5420_v28 = vpop.f32.mrf.mxu0  ;;  %5783 = vmatprep.mubr.bf16.mxu1 %v10075_v63  ;;  %v8936_v63 = vcombine.low %v783_v26, %v791_v33  ;;  %v8921_v53 = vcombine.high %v767_v47, %v775_v16  ;;  %v8920_v54 = vcombine.low %v767_v47, %v775_v16  ;;  %v463_v4 = vld [vmem:[#allocation2 + $0x838] sm:$0xff]  ;;  %v8888_v27 = vcombine.low %v735_v60, %v743_v61 }
 0x33d   :  { %5713 = vmatpush1.bf16.msra.mxu0 %v8712_v17  ;;  %v5461_v37 = vpop.f32.mrf.mxu1  ;;  %v8617_v17 = vcombine.high %v463_v4, %v471_v6  ;;  %v8873_v25 = vcombine.high %v719_v7, %v727_v8  ;;  %v8616_v42 = vcombine.low %v463_v4, %v471_v6  ;;  %v8872_v28 = vcombine.low %v719_v7, %v727_v8  ;;  %v655_v57 = vld [vmem:[#allocation2 + $0xe38] sm:$0xff] }
 0x33e   :  { %v5421_v32 = vpop.f32.mrf.mxu0  ;;  %5754 = vmatpush1.bf16.msra.mxu1 %v8968_v38  ;;  %5714 = vmatprep.subr.bf16.mxu0 %v8697_v34  ;;  %v703_v38 = vld [vmem:[#allocation2 + $0xfb8] sm:$0xff] }
 0x33f   :  { %5755 = vmatprep.subr.bf16.mxu1 %v8953_v23  ;;  %v5462_v46 = vpop.f32.mrf.mxu1  ;;  %v711_v34 = vld [vmem:[#allocation2 + $0xff8] sm:$0xff]  ;;  %v5824_v32 = vpop.xlane.xlu1 %5823 }
 0x340   :  { %v959_v23 = vld [vmem:[#allocation2 + $0x17b8] sm:$0xff]  ;;  %v8857_v26 = vcombine.high %v703_v38, %v711_v34  ;;  %v5827_v47 = vmul.f32 0.0625, %v5824_v32 }
 0x341   :  { %5715 = vmatpush1.bf16.msra.mxu0 %v8696_v35  ;;  %v9113_v33 = vcombine.high %v959_v23, %v967_v24  ;;  %v687_v35 = vld [vmem:[#allocation2 + $0xf38] sm:$0xff]  ;;  %v9112_v45 = vcombine.low %v959_v23, %v967_v24 }
 0x342   :  { %5756 = vmatpush1.bf16.msra.mxu1 %v8952_v44  ;;  %5716 = vmatprep.subr.bf16.mxu0 %v8681_v39  ;;  %v695_v37 = vld [vmem:[#allocation2 + $0xf78] sm:$0xff] }
 0x343   :  { %5757 = vmatprep.subr.bf16.mxu1 %v8937_v5  ;;  %v943_v44 = vld [vmem:[#allocation2 + $0x1738] sm:$0xff]  ;;  %v8856_v5 = vcombine.low %v703_v38, %v711_v34  ;;  %v8841_v46 = vcombine.high %v687_v35, %v695_v37  ;;  %v8840_v11 = vcombine.low %v687_v35, %v695_v37 }
 0x344   :  { %v951_v39 = vld [vmem:[#allocation2 + $0x1778] sm:$0xff] }
 0x345   :  { %5717 = vmatpush1.bf16.msra.mxu0 %v8680_v48  ;;  %v9097_v16 = vcombine.high %v943_v44, %v951_v39  ;;  %v671_v48 = vld [vmem:[#allocation2 + $0xeb8] sm:$0xff]  ;;  %v9096_v52 = vcombine.low %v943_v44, %v951_v39 }
 0x346   :  { %5758 = vmatpush1.bf16.msra.mxu1 %v8936_v63  ;;  %5718 = vmatprep.subr.bf16.mxu0 %v8665_v49  ;;  %v679_v63 = vld [vmem:[#allocation2 + $0xef8] sm:$0xff]  ;;  %v5818_v49 = vpop.xlane.xlu1 %5817 }
 0x347   :  { %5759 = vmatprep.subr.bf16.mxu1 %v8921_v53  ;;  %v927_v53 = vld [vmem:[#allocation2 + $0x16b8] sm:$0xff] }
 0x348   :  { %v663_v59 = vld [vmem:[#allocation2 + $0xe78] sm:$0xff] }
 0x349   :  { %5719 = vmatpush1.bf16.msra.mxu0 %v8664_v20  ;;  %v8825_v20 = vcombine.high %v671_v48, %v679_v63  ;;  %v911_v60 = vld [vmem:[#allocation2 + $0x1638] sm:$0xff] }
 0x34a   :  { %5760 = vmatpush1.bf16.msra.mxu1 %v8920_v54  ;;  %5720 = vmatprep.subr.bf16.mxu0 %v8649_v55  ;;  %v5830_v54 = vadd.f32 1e-06, %v5827_v47  ;;  %v5825_v55 = vmul.f32 0.0625, %v5818_v49  ;;  %v919_v61 = vld [vmem:[#allocation2 + $0x1678] sm:$0xff] }
 0x34b   :  { %5761 = vmatprep.subr.bf16.mxu1 %v8905_v56  ;;  %v9081_v56 = vcombine.high %v927_v53, %v935_v50  ;;  %v9065_v6 = vcombine.high %v911_v60, %v919_v61  ;;  %v639_v7 = vld [vmem:[#allocation2 + $0xdb8] sm:$0xff] }
 0x34c   :  { %9686 = vrsqrt.f32 %v5830_v54  ;;  %v5828_v4 = vadd.f32 1e-06, %v5825_v55  ;;  %v647_v8 = vld [vmem:[#allocation2 + $0xdf8] sm:$0xff] }
 0x34d   :  { %5721 = vmatpush1.bf16.msra.mxu0 %v8648_v62  ;;  %v5829_v62 = vadd.f32 1e-06, %v5826_v51  ;;  %v8793_v38 = vcombine.high %v639_v7, %v647_v8  ;;  %v623_v23 = vld [vmem:[#allocation2 + $0xd38] sm:$0xff] }
 0x34e   :  { %5762 = vmatpush1.bf16.msra.mxu1 %v8904_v0  ;;  %5722 = vmatprep.subr.bf16.mxu0 %v8633_v1  ;;  %v8824_v0 = vcombine.low %v671_v48, %v679_v63  ;;  %v9080_v1 = vcombine.low %v927_v53, %v935_v50  ;;  %v631_v24 = vld [vmem:[#allocation2 + $0xd78] sm:$0xff] }
 0x34f   :  { %5763 = vmatprep.subr.bf16.mxu1 %v8889_v2  ;;  %v8809_v2 = vcombine.high %v655_v57, %v663_v59  ;;  %9688 = vrsqrt.f32 %v5829_v62  ;;  %v8777_v35 = vcombine.high %v623_v23, %v631_v24  ;;  %v607_v32 = vld [vmem:[#allocation2 + $0xcb8] sm:$0xff]  ;;  %v8776_v41 = vcombine.low %v623_v23, %v631_v24 }
 0x350   :  { %9690 = vrsqrt.f32 %v5828_v4  ;;  %v615_v44 = vld [vmem:[#allocation2 + $0xcf8] sm:$0xff] }
 0x351   :  { %5723 = vmatpush1.bf16.msra.mxu0 %v8632_v14  ;;  %v895_v14 = vld [vmem:[#allocation2 + $0x15b8] sm:$0xff]  ;;  %v8760_v50 = vcombine.low %v607_v32, %v615_v44 }
 0x352   :  { %5764 = vmatpush1.bf16.msra.mxu1 %v8888_v27  ;;  %5724 = vmatprep.subr.bf16.mxu0 %v8617_v17  ;;  %v903_v27 = vld [vmem:[#allocation2 + $0x15f8] sm:$0xff]  ;;  %v8808_v17 = vcombine.low %v655_v57, %v663_v59 }
 0x353   :  { %5765 = vmatprep.subr.bf16.mxu1 %v8873_v25  ;;  %v9064_v25 = vcombine.low %v911_v60, %v919_v61  ;;  %v9049_v34 = vcombine.high %v895_v14, %v903_v27  ;;  %v863_v39 = vld [vmem:[#allocation2 + $0x14b8] sm:$0xff] }
 0x354   :  { %v599_v48 = vld [vmem:[#allocation2 + $0xc78] sm:$0xff] }
 0x355   :  { %5725 = vmatpush1.bf16.msra.mxu0 %v8616_v42  ;;  %v879_v42 = vld [vmem:[#allocation2 + $0x1538] sm:$0xff] }
 0x356   :  { %5766 = vmatpush1.bf16.msra.mxu1 %v8872_v28  ;;  %5726 = vmatprep.subr.bf16.mxu0 %v8857_v26  ;;  %v887_v28 = vld [vmem:[#allocation2 + $0x1578] sm:$0xff]  ;;  %v8792_v26 = vcombine.low %v639_v7, %v647_v8 }
 0x357   :  { %5767 = vmatprep.subr.bf16.mxu1 %v9113_v33  ;;  %v9048_v33 = vcombine.low %v895_v14, %v903_v27  ;;  %v9033_v37 = vcombine.high %v879_v42, %v887_v28  ;;  %v847_v49 = vld [vmem:[#allocation2 + $0x1438] sm:$0xff] }
 0x358   :  { %v855_v53 = vld [vmem:[#allocation2 + $0x1478] sm:$0xff] }
 0x359   :  { %5727 = vmatpush2.bf16.msra.mxu0 %v8856_v5  ;;  %v871_v5 = vld [vmem:[#allocation2 + $0x14f8] sm:$0xff]  ;;  %v9687_v63 = vpop.eup %9686  ;;  %v9001_v54 = vcombine.high %v847_v49, %v855_v53  ;;  %v9000_v60 = vcombine.low %v847_v49, %v855_v53 }
 0x35a   :  { %5768 = vmatpush2.bf16.msra.mxu1 %v9112_v45  ;;  %5728 = vmatprep.subr.bf16.mxu0 %v8841_v46  ;;  %v9032_v45 = vcombine.low %v879_v42, %v887_v28  ;;  %v8761_v46 = vcombine.high %v607_v32, %v615_v44  ;;  %v9017_v47 = vcombine.high %v863_v39, %v871_v5  ;;  %v5939_v49 = vld [vmem:[#allocation8 + $0x10] sm:$0xff] }
 0x35b   :  { %5769 = vmatprep.subr.bf16.mxu1 %v9097_v16  ;;  %v591_v16 = vld [vmem:[#allocation2 + $0xc38] sm:$0xff] }
 0x35c   :  { %v9689_v51 = vpop.eup %9688  ;;  %v8744_v57 = vcombine.low %v591_v16, %v599_v48  ;;  %v5947_v53 = vld [vmem:[#allocation8 + $0x50] sm:$0xff] }
 0x35d   :  { %5729 = vmatpush2.bf16.msra.mxu0 %v8840_v11  ;;  %v9016_v11 = vcombine.low %v863_v39, %v871_v5  ;;  %v9691_v55 = vpop.eup %9690  ;;  %v5835_v59 = vmul.f32 %v9689_v51, %v10129_v10  ;;  %v9122_v51 = vcombine.low %v5939_v49, %v5947_v53 }
 0x35e   :  { %5770 = vmatpush2.bf16.msra.mxu1 %v9096_v52  ;;  %5730 = vmatprep.subr.bf16.mxu0 %v8825_v20  ;;  %v8745_v52 = vcombine.high %v591_v16, %v599_v48  ;;  %v5836_v20 = vmul.f32 %v9687_v63, %v10123_v58  ;;  %v5834_v62 = vmul.f32 %v9691_v55, %v10138_v15  ;;  %v9929_v58 = vmov 0.0  }
 0x35f   :  { %5771 = vmatprep.subr.bf16.mxu1 %v9081_v56  ;;  %v9114_v56 = vld [vmem:[#allocation5] ss:$0 sm:$0xff]  ;;  %v9931_v63 = vmov 0  }
 0x360   :  { %v5846_v61 = vmul.f32 %v9114_v56, %v5836_v20  ;;  %v5844_v4 = vmul.f32 %v9114_v56, %v5834_v62 }
 0x361   :  { %5731 = vmatpush2.bf16.msra.mxu0 %v8824_v0  ;;  %v9115_v0 = vld [vmem:[#allocation7] ss:$0 sm:$0xff] }
 0x362   :  { %5772 = vmatpush2.bf16.msra.mxu1 %v9080_v1  ;;  %5732 = vmatprep.subr.bf16.mxu0 %v8809_v2  ;;  %v5845_v1 = vmul.f32 %v9114_v56, %v5835_v59  ;;  %v5856_v2 = vadd.f32 %v9115_v0, %v5846_v61 }
 0x363   :  { %5773 = vmatprep.subr.bf16.mxu1 %v9065_v6 }
 0x364   :  { %v5855_v15 = vadd.f32 %v9115_v0, %v5845_v1 }
 0x365   :  { %5733 = vmatpush2.bf16.msra.mxu0 %v8808_v17  ;;  %v5854_v17 = vadd.f32 %v9115_v0, %v5844_v4 }
 0x366   :  { %5774 = vmatpush2.bf16.msra.mxu1 %v9064_v25  ;;  %5734 = vmatprep.subr.bf16.mxu0 %v8793_v38 }
 0x367   :  { %5775 = vmatprep.subr.bf16.mxu1 %v9049_v34 }
 0x369   :  { %5735 = vmatpush2.bf16.msra.mxu0 %v8792_v26 }
 0x36a   :  { %5776 = vmatpush2.bf16.msra.mxu1 %v9048_v33  ;;  %5736 = vmatprep.subr.bf16.mxu0 %v8777_v35  ;;  %v5937_v33 = vld [vmem:[#allocation8] sm:$0xff] }
 0x36b   :  { %5777 = vmatprep.subr.bf16.mxu1 %v9033_v37  ;;  %v5945_v35 = vld [vmem:[#allocation8 + $0x40] sm:$0xff] }
 0x36c   :  { %v9118_v44 = vcombine.low %v5937_v33, %v5945_v35  ;;  %v9119_v39 = vcombine.high %v5937_v33, %v5945_v35 }
 0x36d   :  { %5737 = vmatpush2.bf16.msra.mxu0 %v8776_v41  ;;  %v5938_v41 = vld [vmem:[#allocation8 + $0x8] sm:$0xff] }
 0x36e   :  { %5778 = vmatpush2.bf16.msra.mxu1 %v9032_v45  ;;  %5738 = vmatprep.subr.bf16.mxu0 %v8761_v46  ;;  %v5946_v45 = vld [vmem:[#allocation8 + $0x48] sm:$0xff] }
 0x36f   :  { %5779 = vmatprep.subr.bf16.mxu1 %v9017_v47  ;;  %v9120_v47 = vcombine.low %v5938_v41, %v5946_v45  ;;  %v9121_v16 = vcombine.high %v5938_v41, %v5946_v45 }
 0x371   :  { %5739 = vmatpush2.bf16.msra.mxu0 %v8760_v50  ;;  %v5940_v50 = vld [vmem:[#allocation8 + $0x18] sm:$0xff] }
 0x372   :  { %5780 = vmatpush2.bf16.msra.mxu1 %v9016_v11  ;;  %5740 = vmatprep.subr.bf16.mxu0 %v8745_v52  ;;  %v9123_v11 = vcombine.high %v5939_v49, %v5947_v53  ;;  %v5948_v52 = vld [vmem:[#allocation8 + $0x58] sm:$0xff] }
 0x373   :  { %5781 = vmatprep.subr.bf16.mxu1 %v9001_v54  ;;  %v9124_v20 = vcombine.low %v5940_v50, %v5948_v52  ;;  %v9125_v54 = vcombine.high %v5940_v50, %v5948_v52  ;;  %v9551_v49 = vld [vmem:[%s10762_s7 + $0xf8] sm:$0xff]   ;;  %v9557_v52 = vld [vmem:[%s10762_s7 + $0xb0] sm:$0xff]  }
 0x374   :  { %v9552_v53 = vld [vmem:[%s10762_s7 + $0x38] sm:$0xff]  }
 0x375   :  { %5741 = vmatpush2.bf16.msra.mxu0 %v8744_v57  ;;  %v9553_v50 = vld [vmem:[%s10762_s7 + $0xb8] sm:$0xff]  }
 0x376   :  { %5782 = vmatpush2.bf16.msra.mxu1 %v9000_v60  ;;  %9485 = vmatprep.subr.mxu0 %v9929_v58 }
 0x377   :  { %6050 = vmatprep.subr.bf16.mxu1 %v9119_v39  ;;  %v5952_v39 = vld [vmem:[#allocation8 + $0x78] sm:$0xff] }
 0x378   :  { %v5498_v6 = vpop.f32.mrf.mxu0  ;;  %5743 = vmatmul.mubr.bf16.vlgmr.msra.gmra.mxu0 %v10073_v31 }
 0x379   :  { %v5499_v10 = vadd.f32 %v5498_v6, %v10209_v18  ;;  %9486 = vmatpush3.msk.msra.mxu0 %vm5862_vm2, %v5856_v2  ;;  %v5539_v7 = vpop.f32.mrf.mxu1  ;;  %5784 = vmatmul.mubr.bf16.vlgmr.msra.gmra.mxu1 %v10083_v43  ;;  %v5857_v43 = vld [vmem:[%s10757_s2] sm:$0x3] }
 0x37a   :  { %v5500_v8 = vpop.f32.mrf.mxu0  ;;  %9487 = vmatprep.subr.mxu0 %v9929_v58  ;;  %9491 = vmatprep.mubr.msk.f32.mxu0 %vm9930_vm3, %v9929_v58 }
 0x37b   :  { %v5501_v14 = vadd.f32 %v5500_v8, %v10214_v19  ;;  %v10229_v27 = vadd.f32 %v5539_v7, %v5499_v10  ;;  %9488 = vmatpush3.msra.mxu0 %v5855_v15  ;;  %v5541_v31 = vpop.f32.mrf.mxu1  ;;  %6051 = vmatpush1.bf16.msra.mxu1 %v9118_v44  ;;  %v5944_v44 = vld [vmem:[#allocation8 + $0x38] sm:$0xff] }
 0x37c   :  { %v5502_v18 = vpop.f32.mrf.mxu0  ;;  %9489 = vmatprep.subr.mxu0 %v9929_v58  ;;  %6068 = vmatprep.mubr.bf16.mxu1 %v9931_v63 }
 0x37d   :  { %v10232_v25 = vadd.f32 %v5541_v31, %v5501_v14  ;;  %9490 = vmatpush3.msra.mxu0 %v5854_v17  ;;  %v5543_v38 = vpop.f32.mrf.mxu1  ;;  %6132 = vmatprep.subr.bf16.mxu1 %v9123_v11  ;;  %v9555_v11 = vld [vmem:[%s10762_s7 + $0xf0] sm:$0xff]  }
 0x37e   :  { %v5503_v34 = vpop.f32.mrf.mxu0  ;;  %6091 = vmatprep.subr.bf16.mxu0 %v9121_v16  ;;  %v5941_v38 = vld [vmem:[#allocation8 + $0x20] sm:$0xff]  ;;  %v9132_v16 = vcombine.low %v5944_v44, %v5952_v39 }
 0x37f   :  { %v5544_v23 = vpop.f32.mrf.mxu1  ;;  %v5949_v34 = vld [vmem:[#allocation8 + $0x60] sm:$0xff] }
 0x380   :  { %9492 = vmatmul.mubr.msk.f32.vlgmr.msra.gmra.mxu0 %vm5858_vm4, %v5857_v43  ;;  %v5942_v23 = vld [vmem:[#allocation8 + $0x28] sm:$0xff]  ;;  %v9127_v33 = vcombine.high %v5941_v38, %v5949_v34 }
 0x381   :  { %6092 = vmatpush1.bf16.msra.mxu0 %v9120_v47  ;;  %6109 = vmatprep.mubr.bf16.mxu0 %v9931_v63 }
 0x382   :  { %6173 = vmatprep.subr.bf16.mxu0 %v9125_v54  ;;  %v9559_v54 = vld [vmem:[%s10762_s7 + $0xe8] sm:$0xff]  }
 0x3b8   :  { %v5580_v19 = vpop.f32.mrf.mxu0 }
 0x3b9   :  { %v5621_v24 = vpop.f32.mrf.mxu1 }
 0x3ba   :  { %v5622_v42 = vadd.f32 %v5621_v24, %v5580_v19  ;;  %v5582_v28 = vpop.f32.mrf.mxu0  ;;  %v5950_v19 = vld [vmem:[#allocation8 + $0x68] sm:$0xff] }
 0x3bb   :  { %v5623_v26 = vpop.f32.mrf.mxu1  ;;  %v9129_v35 = vcombine.high %v5942_v23, %v5950_v19  ;;  %v9128_v41 = vcombine.low %v5942_v23, %v5950_v19  ;;  %v9579_v23 = vld [vmem:[%s10762_s7 + $0xc0] sm:$0xff]  }
 0x3bc   :  { %v5624_v37 = vadd.f32 %v5623_v26, %v5582_v28  ;;  %v5584_v32 = vpop.f32.mrf.mxu0  ;;  %v9580_v19 = vld [vmem:[%s10762_s7] sm:$0xff]  }
 0x3bd   :  { %v5625_v5 = vpop.f32.mrf.mxu1  ;;  %v5951_v32 = vld [vmem:[#allocation8 + $0x70] sm:$0xff] }
 0x3be   :  { %v5585_v46 = vpop.f32.mrf.mxu0  ;;  %v9126_v5 = vcombine.low %v5941_v38, %v5949_v34  ;;  %v9577_v38 = vld [vmem:[%s10762_s7 + $0x88] sm:$0xff]   ;;  %v9578_v34 = vld [vmem:[%s10762_s7 + $0x40] sm:$0xff]  }
 0x3bf   :  { %v5626_v48 = vpop.f32.mrf.mxu1  ;;  %v9133_v46 = vcombine.high %v5944_v44, %v5952_v39 }
 0x3c0   :  { %v9550_v48 = vld [vmem:[%s10762_s7 + $0x78] sm:$0xff]  }
 0x3f8   :  { %v5662_v55 = vpop.f32.mrf.mxu0 }
 0x3f9   :  { %v10239_v56 = vadd.f32 %v5662_v55, %v5622_v42  ;;  %v5703_v57 = vpop.f32.mrf.mxu1  ;;  %v9560_v55 = vld [vmem:[%s10762_s7 + $0x28] sm:$0xff]  }
 0x3fa   :  { %v5664_v59 = vpop.f32.mrf.mxu0 }
 0x3fb   :  { %v10241_v60 = vadd.f32 %v5664_v59, %v5624_v37  ;;  %v5705_v61 = vpop.f32.mrf.mxu1  ;;  %v5943_v37 = vld [vmem:[#allocation8 + $0x30] sm:$0xff]  ;;  %v9562_v59 = vld [vmem:[%s10762_s7 + $0x60] sm:$0xff]  }
 0x3fc   :  { %v5666_v62 = vpop.f32.mrf.mxu0  ;;  %v9131_v45 = vcombine.high %v5943_v37, %v5951_v32  ;;  %v9130_v47 = vcombine.low %v5943_v37, %v5951_v32 }
 0x3fd   :  { %v5707_v0 = vpop.f32.mrf.mxu1  ;;  %v9564_v62 = vld [vmem:[%s10762_s7 + $0x20] sm:$0xff]  }
 0x3fe   :  { %v5667_v1 = vpop.f32.mrf.mxu0  ;;  %v9565_v0 = vld [vmem:[%s10762_s7 + $0xa0] sm:$0xff]  }
 0x3ff   :  { %v5708_v2 = vpop.f32.mrf.mxu1  ;;  %v9566_v1 = vld [vmem:[%s10762_s7 + $0x58] sm:$0xff]  }
 0x400   :  { %v9567_v2 = vld [vmem:[%s10762_s7 + $0xd8] sm:$0xff]  }
 0x438   :  { %v5744_v4 = vpop.f32.mrf.mxu0 }
 0x439   :  { %v5745_v6 = vadd.f32 %v5744_v4, %v5703_v57  ;;  %v5785_v10 = vpop.f32.mrf.mxu1  ;;  %v9561_v57 = vld [vmem:[%s10762_s7 + $0xa8] sm:$0xff]   ;;  %v9568_v4 = vld [vmem:[%s10762_s7 + $0x18] sm:$0xff]  }
 0x43a   :  { %v5746_v7 = vpop.f32.mrf.mxu0 }
 0x43b   :  { %v5747_v15 = vadd.f32 %v5746_v7, %v5705_v61  ;;  %v10243_v8 = vadd.f32 %v5785_v10, %v5745_v6  ;;  %v5787_v14 = vpop.f32.mrf.mxu1  ;;  %v9563_v61 = vld [vmem:[%s10762_s7 + $0xe0] sm:$0xff]   ;;  %v9569_v6 = vld [vmem:[%s10762_s7 + $0x98] sm:$0xff]   ;;  %v9570_v10 = vld [vmem:[%s10762_s7 + $0x50] sm:$0xff]  }
 0x43c   :  { %v5748_v31 = vpop.f32.mrf.mxu0  ;;  %v9571_v7 = vld [vmem:[%s10762_s7 + $0xd0] sm:$0xff]  }
 0x43d   :  { %v10245_v17 = vadd.f32 %v5787_v14, %v5747_v15  ;;  %v5789_v18 = vpop.f32.mrf.mxu1  ;;  %v9572_v15 = vld [vmem:[%s10762_s7 + $0x10] sm:$0xff]   ;;  %v9574_v31 = vld [vmem:[%s10762_s7 + $0x48] sm:$0xff]  }
 0x43e   :  { %v5749_v43 = vpop.f32.mrf.mxu0  ;;  %v9573_v14 = vld [vmem:[%s10762_s7 + $0x90] sm:$0xff]   ;;  %v9575_v18 = vld [vmem:[%s10762_s7 + $0xc8] sm:$0xff]  }
 0x43f   :  { %v5790_v24 = vpop.f32.mrf.mxu1  ;;  %v9576_v43 = vld [vmem:[%s10762_s7 + $0x8] sm:$0xff]  }
 0x440   :  { %v5932_v42 = vpop.f32.mrf.mxu0  ;;  %v9581_v24 = vld [vmem:[%s10762_s7 + $0x80] sm:$0xff]  }
 0x441   :  { %v5936_v28 = vpack.c.bf16 %v5932_v42, %v5932_v42  ;;  %v9582_v42 = vld [vmem:[%s10762_s7 + $0x178] sm:$0xff]  }
 0x442   :  { %v9493_v26 = vpop.f32.mrf.mxu0 }
 0x443   :  { %9134 = vmatmul.mubr.msk.bf16.vlgmr.msra.gmra.mxu1 %vm5795_vm1, %v5936_v28  ;;  %9135 = vmatmul.mubr.msk.bf16.vlgmr.msra.gmra.mxu0 %vm5795_vm1, %v5936_v28 }
 0x444   :  { %6133 = vmatpush1.bf16.msra.mxu1 %v9122_v51  ;;  %6174 = vmatpush1.bf16.msra.mxu0 %v9124_v20  ;;  %v9554_v51 = vld [vmem:[%s10762_s7 + $0x70] sm:$0xff]   ;;  %v9558_v20 = vld [vmem:[%s10762_s7 + $0x68] sm:$0xff]  }
 0x445   :  { %6150 = vmatprep.mubr.bf16.mxu1 %v9931_v63  ;;  %6191 = vmatprep.mubr.bf16.mxu0 %v9931_v63 }
 0x446   :  { %6214 = vmatprep.subr.bf16.mxu1 %v9127_v33  ;;  %6255 = vmatprep.subr.bf16.mxu0 %v9129_v35 }
 0x44b   :  { %9136 = vmatmul.mubr.msk.bf16.vlgmr.msra.gmra.mxu1 %vm5795_vm1, %v5936_v28  ;;  %9137 = vmatmul.mubr.msk.bf16.vlgmr.msra.gmra.mxu0 %vm5795_vm1, %v5936_v28 }
 0x44c   :  { %6215 = vmatpush1.bf16.msra.mxu1 %v9126_v5  ;;  %6256 = vmatpush1.bf16.msra.mxu0 %v9128_v41 }
 0x44d   :  { %6232 = vmatprep.mubr.bf16.mxu1 %v9931_v63  ;;  %6273 = vmatprep.mubr.bf16.mxu0 %v9931_v63 }
 0x44e   :  { %6296 = vmatprep.subr.bf16.mxu1 %v9131_v45  ;;  %6337 = vmatprep.subr.bf16.mxu0 %v9133_v46 }
 0x453   :  { %9138 = vmatmul.mubr.msk.bf16.vlgmr.msra.gmra.mxu1 %vm5795_vm1, %v5936_v28  ;;  %9139 = vmatmul.mubr.msk.bf16.vlgmr.msra.gmra.mxu0 %vm5795_vm1, %v5936_v28 }
 0x454   :  { %6297 = vmatpush1.bf16.msra.mxu1 %v9130_v47  ;;  %6338 = vmatpush1.bf16.msra.mxu0 %v9132_v16 }
 0x455   :  { %6314 = vmatprep.mubr.bf16.mxu1 %v9931_v63  ;;  %6355 = vmatprep.mubr.bf16.mxu0 %v9931_v63  ;;  %v9556_v63 = vld [vmem:[%s10762_s7 + $0x30] sm:$0xff]  }
 0x456   :  { %9294 = vmatprep.subr.bf16.mxu1 %v9550_v48  ;;  %9316 = vmatprep.subr.bf16.mxu0 %v9551_v49 }
 0x45b   :  { %9140 = vmatmul.mubr.msk.bf16.vlgmr.msra.gmra.mxu1 %vm5795_vm1, %v5936_v28  ;;  %9141 = vmatmul.mubr.msk.bf16.vlgmr.msra.gmra.mxu0 %vm5795_vm1, %v5936_v28  ;;  %v9583_v28 = vld [vmem:[%s10762_s7 + $0x1f8] sm:$0xff]  }
 0x45c   :  { %9295 = vmatpush3.bf16.msra.mxu1 %v9552_v53  ;;  %9317 = vmatpush3.bf16.msra.mxu0 %v9553_v50 }
 0x45d   :  { %9296 = vmatprep.subr.bf16.mxu1 %v9554_v51  ;;  %9318 = vmatprep.subr.bf16.mxu0 %v9555_v11  ;;  %v9584_v11 = vld [vmem:[%s10762_s7 + $0x138] sm:$0xff]  }
 0x460   :  { %9297 = vmatpush3.bf16.msra.mxu1 %v9556_v63  ;;  %9319 = vmatpush3.bf16.msra.mxu0 %v9557_v52 }
 0x461   :  { %9298 = vmatprep.subr.bf16.mxu1 %v9558_v20  ;;  %9320 = vmatprep.subr.bf16.mxu0 %v9559_v54 }
 0x464   :  { %9299 = vmatpush3.bf16.msra.mxu1 %v9560_v55  ;;  %9321 = vmatpush3.bf16.msra.mxu0 %v9561_v57  ;;  %v9588_v57 = vld [vmem:[%s10762_s7 + $0x130] sm:$0xff]  }
 0x465   :  { %9300 = vmatprep.subr.bf16.mxu1 %v9562_v59  ;;  %9322 = vmatprep.subr.bf16.mxu0 %v9563_v61  ;;  %v9589_v59 = vld [vmem:[%s10762_s7 + $0x1b0] sm:$0xff]  }
 0x468   :  { %9301 = vmatpush3.bf16.msra.mxu1 %v9564_v62  ;;  %9323 = vmatpush3.bf16.msra.mxu0 %v9565_v0  ;;  %v9590_v0 = vld [vmem:[%s10762_s7 + $0x168] sm:$0xff]  }
 0x469   :  { %9302 = vmatprep.subr.bf16.mxu1 %v9566_v1  ;;  %9324 = vmatprep.subr.bf16.mxu0 %v9567_v2  ;;  %v9591_v1 = vld [vmem:[%s10762_s7 + $0x1e8] sm:$0xff]  }
 0x46c   :  { %9303 = vmatpush3.bf16.msra.mxu1 %v9568_v4  ;;  %9325 = vmatpush3.bf16.msra.mxu0 %v9569_v6 }
 0x46d   :  { %9304 = vmatprep.subr.bf16.mxu1 %v9570_v10  ;;  %9326 = vmatprep.subr.bf16.mxu0 %v9571_v7 }
 0x470   :  { %9305 = vmatpush3.bf16.msra.mxu1 %v9572_v15  ;;  %9327 = vmatpush3.bf16.msra.mxu0 %v9573_v14 }
 0x471   :  { %9306 = vmatprep.subr.bf16.mxu1 %v9574_v31  ;;  %9328 = vmatprep.subr.bf16.mxu0 %v9575_v18  ;;  %v9592_v18 = vld [vmem:[%s10762_s7 + $0x128] sm:$0xff]  }
 0x474   :  { %9307 = vmatpush3.bf16.msra.mxu1 %v9576_v43  ;;  %9329 = vmatpush3.bf16.msra.mxu0 %v9577_v38  ;;  %v9593_v43 = vld [vmem:[%s10762_s7 + $0x1a8] sm:$0xff]  }
 0x475   :  { %9308 = vmatprep.subr.bf16.mxu1 %v9578_v34  ;;  %9330 = vmatprep.subr.bf16.mxu0 %v9579_v23 }
 0x478   :  { %9309 = vmatpush3.bf16.msra.mxu1 %v9580_v19  ;;  %9331 = vmatpush3.bf16.msra.mxu0 %v9581_v24  ;;  %v9596_v24 = vld [vmem:[%s10762_s7 + $0x120] sm:$0xff]  }
 0x479   :  { %9338 = vmatprep.subr.bf16.mxu1 %v9582_v42  ;;  %9360 = vmatprep.subr.bf16.mxu0 %v9583_v28  ;;  %v9597_v42 = vld [vmem:[%s10762_s7 + $0x1a0] sm:$0xff]   ;;  %v9598_v28 = vld [vmem:[%s10762_s7 + $0x158] sm:$0xff]  }
 0x503   :  { %v6070_v26 = vpop.f32.mrf.mxu1  ;;  %v6111_v33 = vpop.f32.mrf.mxu0 }
 0x504   :  { %v6380_v35 = vrot.slane %v6070_v26, 6  ;;  %v6382_v37 = vrot.slane %v6111_v33, 6  ;;  %v9599_v26 = vld [vmem:[%s10762_s7 + $0x1d8] sm:$0xff]  }
 0x505   :  { %v6072_v32 = vpop.f32.mrf.mxu1  ;;  %v6113_v44 = vpop.f32.mrf.mxu0 }
 0x506   :  { %v6381_v39 = vrot.slane %v6072_v32, 6  ;;  %v6383_v5 = vrot.slane %v6113_v44, 6  ;;  %v6413_v41 = vsel %vm6412_vm5, %v10132_v12, %v6380_v35  ;;  %v6415_v45 = vsel %vm6412_vm5, %v10158_v3, %v6382_v37  ;;  %v9585_v12 = vld [vmem:[%s10762_s7 + $0x1b8] sm:$0xff]  }
 0x507   :  { %v6074_v46 = vpop.f32.mrf.mxu1  ;;  %v6115_v47 = vpop.f32.mrf.mxu0  ;;  %v6429_v3 = vpack.c.bf16 %v6413_v41, %v6413_v41  ;;  %v6431_v63 = vpack.c.bf16 %v6415_v45, %v6415_v45  ;;  %v9600_v44 = vld [vmem:[%s10762_s7 + $0x118] sm:$0xff]   ;;  %v9603_v41 = vld [vmem:[%s10762_s7 + $0x1d0] sm:$0xff]  }
 0x508   :  { %v6414_v16 = vsel %vm6412_vm5, %v10144_v21, %v6381_v39  ;;  %v6416_v48 = vsel %vm6412_vm5, %v10162_v13, %v6383_v5  ;;  %v9586_v21 = vld [vmem:[%s10762_s7 + $0x170] sm:$0xff]   ;;  %v9601_v39 = vld [vmem:[%s10762_s7 + $0x198] sm:$0xff]  }
 0x509   :  { %v6075_v49 = vpop.f32.mrf.mxu1  ;;  %v6116_v53 = vpop.f32.mrf.mxu0  ;;  %v6430_v50 = vpack.c.bf16 %v6414_v16, %v6414_v16  ;;  %v6432_v51 = vpack.c.bf16 %v6416_v48, %v6416_v48  ;;  %v9587_v13 = vld [vmem:[%s10762_s7 + $0x1f0] sm:$0xff]  }
 0x50a   :  { %v9602_v5 = vld [vmem:[%s10762_s7 + $0x150] sm:$0xff]  }
 0x50b   :  { %v10383_v52 = vpop.f32.mrf.mxu1  ;;  %v10385_v20 = vpop.f32.mrf.mxu0  ;;  %7501 = vmatprep.mubr.bf16.mxu1 %v6430_v50  ;;  %7541 = vmatprep.mubr.bf16.mxu0 %v6432_v51  ;;  %v9604_v53 = vld [vmem:[%s10762_s7 + $0x110] sm:$0xff]  }
 0x50c   :  { %7502 = vmatmul.mubr.bf16.vlgmr.msra.gmra.mxu1 %v6429_v3  ;;  %7542 = vmatmul.mubr.bf16.vlgmr.msra.gmra.mxu0 %v6431_v63  ;;  %v9605_v50 = vld [vmem:[%s10762_s7 + $0x190] sm:$0xff]   ;;  %v9607_v3 = vld [vmem:[%s10762_s7 + $0x1c8] sm:$0xff]  }
 0x50d   :  { %9339 = vmatpush3.bf16.msra.mxu1 %v9584_v11  ;;  %9361 = vmatpush3.bf16.msra.mxu0 %v9585_v12  ;;  %v6154_v54 = vpop.f32.mrf.mxu1  ;;  %v6195_v55 = vpop.f32.mrf.mxu0  ;;  %v9606_v12 = vld [vmem:[%s10762_s7 + $0x148] sm:$0xff]  }
 0x50e   :  { %v6385_v61 = vrot.slane %v6154_v54, 6  ;;  %v6387_v62 = vrot.slane %v6195_v55, 6  ;;  %9340 = vmatprep.subr.bf16.mxu1 %v9586_v21  ;;  %9362 = vmatprep.subr.bf16.mxu0 %v9587_v13  ;;  %v9609_v54 = vld [vmem:[%s10762_s7 + $0x188] sm:$0xff]   ;;  %v9610_v55 = vld [vmem:[%s10762_s7 + $0x140] sm:$0xff]  }
 0x50f   :  { %v6156_v2 = vpop.f32.mrf.mxu1  ;;  %v6197_v4 = vpop.f32.mrf.mxu0 }
 0x510   :  { %v6418_v6 = vsel %vm6412_vm5, %v10180_v36, %v6385_v61  ;;  %v6420_v10 = vsel %vm6412_vm5, %v10194_v40, %v6387_v62  ;;  %v9594_v36 = vld [vmem:[%s10762_s7 + $0x160] sm:$0xff]   ;;  %v6386_v61 = vrot.slane %v10385_v20, 6  ;;  %v9615_v20 = vld [vmem:[%s10762_s7 + $0x2f8] sm:$0xff]  }
 0x511   :  { %9341 = vmatpush3.bf16.msra.mxu1 %v9588_v57  ;;  %9363 = vmatpush3.bf16.msra.mxu0 %v9589_v59  ;;  %v6157_v7 = vpop.f32.mrf.mxu1  ;;  %v6198_v15 = vpop.f32.mrf.mxu0  ;;  %v6434_v14 = vpack.c.bf16 %v6418_v6, %v6418_v6  ;;  %v6436_v31 = vpack.c.bf16 %v6420_v10, %v6420_v10  ;;  %v9595_v40 = vld [vmem:[%s10762_s7 + $0x1e0] sm:$0xff]   ;;  %v6384_v59 = vrot.slane %v10383_v52, 6  ;;  %v9614_v52 = vld [vmem:[%s10762_s7 + $0x278] sm:$0xff]  }
 0x512   :  { %9342 = vmatprep.subr.bf16.mxu1 %v9590_v0  ;;  %9364 = vmatprep.subr.bf16.mxu0 %v9591_v1  ;;  %v9611_v57 = vld [vmem:[%s10762_s7 + $0x1c0] sm:$0xff]   ;;  %v6419_v6 = vsel %vm6412_vm5, %v10190_v30, %v6386_v61  ;;  %v9616_v7 = vld [vmem:[%s10762_s7 + $0x238] sm:$0xff]  }
 0x513   :  { %v10415_v38 = vpop.f32.mrf.mxu1  ;;  %v10417_v34 = vpop.f32.mrf.mxu0  ;;  %7581 = vmatprep.mubr.bf16.mxu1 %v6434_v14  ;;  %7621 = vmatprep.mubr.bf16.mxu0 %v6436_v31  ;;  %v9612_v1 = vld [vmem:[%s10762_s7 + $0x100] sm:$0xff]   ;;  %v6417_v4 = vsel %vm6412_vm5, %v10174_v29, %v6384_v59  ;;  %v6435_v31 = vpack.c.bf16 %v6419_v6, %v6419_v6  ;;  %v9617_v29 = vld [vmem:[%s10762_s7 + $0x2b8] sm:$0xff]  }
 0x514   :  { %v9613_v2 = vld [vmem:[%s10762_s7 + $0x180] sm:$0xff]   ;;  %v6433_v14 = vpack.c.bf16 %v6417_v4, %v6417_v4  ;;  %v9657_v4 = vld [vmem:[%s10762_s7 + $0x3a8] sm:$0xff]  }
 0x515   :  { %9343 = vmatpush3.bf16.msra.mxu1 %v9592_v18  ;;  %9365 = vmatpush3.bf16.msra.mxu0 %v9593_v43  ;;  %v10419_v23 = vpop.f32.mrf.mxu1  ;;  %v10421_v19 = vpop.f32.mrf.mxu0  ;;  %v9619_v18 = vld [vmem:[%s10762_s7 + $0x2f0] sm:$0xff]   ;;  %v9658_v6 = vld [vmem:[%s10762_s7 + $0x360] sm:$0xff]  }
 0x516   :  { %9344 = vmatprep.subr.bf16.mxu1 %v9594_v36  ;;  %9366 = vmatprep.subr.bf16.mxu0 %v9595_v40  ;;  %v6389_v62 = vrot.slane %v10419_v23, 6  ;;  %v6391_v0 = vrot.slane %v10421_v19, 6  ;;  %v9620_v43 = vld [vmem:[%s10762_s7 + $0x230] sm:$0xff]   ;;  %v9622_v40 = vld [vmem:[%s10762_s7 + $0x268] sm:$0xff]  }
 0x517   :  { %v6238_v33 = vpop.f32.mrf.mxu1  ;;  %v6279_v35 = vpop.f32.mrf.mxu0  ;;  %v9621_v36 = vld [vmem:[%s10762_s7 + $0x2b0] sm:$0xff]   ;;  %v9623_v23 = vld [vmem:[%s10762_s7 + $0x2e8] sm:$0xff]  }
 0x518   :  { %v6422_v10 = vsel %vm6412_vm5, %v10212_v22, %v6389_v62  ;;  %v6424_v15 = vsel %vm6412_vm5, %v10232_v25, %v6391_v0  ;;  %v9618_v22 = vld [vmem:[%s10762_s7 + $0x270] sm:$0xff]   ;;  %v9624_v19 = vld [vmem:[%s10762_s7 + $0x228] sm:$0xff]   ;;  %v9629_v33 = vld [vmem:[%s10762_s7 + $0x2a0] sm:$0xff]  }
 0x519   :  { %9345 = vmatpush3.bf16.msra.mxu1 %v9596_v24  ;;  %9367 = vmatpush3.bf16.msra.mxu0 %v9597_v42  ;;  %v6239_v37 = vpop.f32.mrf.mxu1  ;;  %v6280_v32 = vpop.f32.mrf.mxu0  ;;  %v6438_v30 = vpack.c.bf16 %v6422_v10, %v6422_v10  ;;  %v6440_v25 = vpack.c.bf16 %v6424_v15, %v6424_v15  ;;  %v9625_v24 = vld [vmem:[%s10762_s7 + $0x2a8] sm:$0xff]   ;;  %v9626_v42 = vld [vmem:[%s10762_s7 + $0x260] sm:$0xff]   ;;  %v9630_v35 = vld [vmem:[%s10762_s7 + $0x258] sm:$0xff]  }
 0x51a   :  { %9346 = vmatprep.subr.bf16.mxu1 %v9598_v28  ;;  %9368 = vmatprep.subr.bf16.mxu0 %v9599_v26  ;;  %v9627_v28 = vld [vmem:[%s10762_s7 + $0x2e0] sm:$0xff]   ;;  %v9631_v37 = vld [vmem:[%s10762_s7 + $0x2d8] sm:$0xff]  }
 0x51b   :  { %v6316_v45 = vpop.f32.mrf.mxu1  ;;  %v6357_v46 = vpop.f32.mrf.mxu0  ;;  %v9628_v26 = vld [vmem:[%s10762_s7 + $0x220] sm:$0xff]   ;;  %v9632_v32 = vld [vmem:[%s10762_s7 + $0x218] sm:$0xff]  }
 0x51c   :  { %v6392_v47 = vrot.slane %v6316_v45, 6  ;;  %v6394_v16 = vrot.slane %v6357_v46, 6  ;;  %v9637_v45 = vld [vmem:[%s10762_s7 + $0x290] sm:$0xff]   ;;  %v9638_v46 = vld [vmem:[%s10762_s7 + $0x248] sm:$0xff]   ;;  %v9659_v10 = vld [vmem:[%s10762_s7 + $0x3e0] sm:$0xff]  }
 0x51d   :  { %9347 = vmatpush3.bf16.msra.mxu1 %v9600_v44  ;;  %9369 = vmatpush3.bf16.msra.mxu0 %v9601_v39  ;;  %v10447_v48 = vpop.f32.mrf.mxu1  ;;  %v10449_v49 = vpop.f32.mrf.mxu0  ;;  %v9633_v44 = vld [vmem:[%s10762_s7 + $0x298] sm:$0xff]   ;;  %v9634_v39 = vld [vmem:[%s10762_s7 + $0x250] sm:$0xff]   ;;  %v9661_v15 = vld [vmem:[%s10762_s7 + $0x3a0] sm:$0xff]  }
 0x51e   :  { %v10459_v51 = vsel %vm6412_vm5, %v10239_v56, %v6392_v47  ;;  %v10463_v11 = vsel %vm6412_vm5, %v10243_v8, %v6394_v16  ;;  %9348 = vmatprep.subr.bf16.mxu1 %v9602_v5  ;;  %9370 = vmatprep.subr.bf16.mxu0 %v9603_v41  ;;  %v9608_v8 = vld [vmem:[%s10762_s7 + $0x108] sm:$0xff]   ;;  %v9635_v5 = vld [vmem:[%s10762_s7 + $0x2d0] sm:$0xff]  }
 0x51f   :  { %v6320_v63 = vpop.f32.mrf.mxu1  ;;  %v6361_v21 = vpop.f32.mrf.mxu0  ;;  %v9636_v41 = vld [vmem:[%s10762_s7 + $0x210] sm:$0xff]   ;;  %v9639_v47 = vld [vmem:[%s10762_s7 + $0x2c8] sm:$0xff]  }
 0x520   :  { %v9640_v16 = vld [vmem:[%s10762_s7 + $0x208] sm:$0xff]   ;;  %v6390_v63 = vrot.slane %v10417_v34, 6  ;;  %v6393_v21 = vrot.slane %v10447_v48, 6  ;;  %v9647_v48 = vld [vmem:[%s10762_s7 + $0x3f8] sm:$0xff]  }
 0x521   :  { %9349 = vmatpush3.bf16.msra.mxu1 %v9604_v53  ;;  %9371 = vmatpush3.bf16.msra.mxu0 %v9605_v50  ;;  %v6321_v56 = vpop.f32.mrf.mxu1  ;;  %v6362_v13 = vpop.f32.mrf.mxu0  ;;  %v9641_v53 = vld [vmem:[%s10762_s7 + $0x288] sm:$0xff]   ;;  %v9642_v50 = vld [vmem:[%s10762_s7 + $0x240] sm:$0xff]  }
 0x522   :  { %9350 = vmatprep.subr.bf16.mxu1 %v9606_v12  ;;  %9372 = vmatprep.subr.bf16.mxu0 %v9607_v3  ;;  %v6388_v12 = vrot.slane %v10415_v38, 6  ;;  %v9643_v3 = vld [vmem:[%s10762_s7 + $0x2c0] sm:$0xff]   ;;  %v6395_v13 = vrot.slane %v10449_v49, 6  ;;  %v6423_v49 = vsel %vm6412_vm5, %v10229_v27, %v6390_v63  ;;  %v9650_v27 = vld [vmem:[%s10762_s7 + $0x370] sm:$0xff]  }
 0x523   :  { %v9644_v56 = vld [vmem:[%s10762_s7 + $0x200] sm:$0xff]   ;;  %v6439_v61 = vpack.c.bf16 %v6423_v49, %v6423_v49 }
 0x524   :  { %v9645_v38 = vld [vmem:[%s10762_s7 + $0x280] sm:$0xff]   ;;  %v6421_v34 = vsel %vm6412_vm5, %v10206_v9, %v6388_v12  ;;  %v9649_v9 = vld [vmem:[%s10762_s7 + $0x3b8] sm:$0xff]   ;;  %v6428_v59 = vsel %vm6412_vm5, %v10245_v17, %v6395_v13  ;;  %v9653_v17 = vld [vmem:[%s10762_s7 + $0x3b0] sm:$0xff]  }
 0x525   :  { %9351 = vmatpush3.bf16.msra.mxu1 %v9608_v8  ;;  %9373 = vmatpush3.bf16.msra.mxu0 %v9609_v54  ;;  %v9646_v8 = vld [vmem:[%s10762_s7 + $0x378] sm:$0xff]   ;;  %v6444_v0 = vpack.c.bf16 %v6428_v59, %v6428_v59 }
 0x526   :  { %9352 = vmatprep.subr.bf16.mxu1 %v9610_v55  ;;  %9374 = vmatprep.subr.bf16.mxu0 %v9611_v57  ;;  %v9648_v54 = vld [vmem:[%s10762_s7 + $0x338] sm:$0xff]   ;;  %v6426_v55 = vsel %vm6412_vm5, %v10241_v60, %v6393_v21  ;;  %v6437_v57 = vpack.c.bf16 %v6421_v34, %v6421_v34  ;;  %v9651_v60 = vld [vmem:[%s10762_s7 + $0x3f0] sm:$0xff]  }
 0x527   :  { %v6442_v62 = vpack.c.bf16 %v6426_v55, %v6426_v55 }
 0x529   :  { %9353 = vmatpush3.bf16.msra.mxu1 %v9612_v1  ;;  %9375 = vmatpush3.bf16.msra.mxu0 %v9613_v2  ;;  %v9652_v1 = vld [vmem:[%s10762_s7 + $0x330] sm:$0xff]   ;;  %v9654_v2 = vld [vmem:[%s10762_s7 + $0x368] sm:$0xff]  }
 0x52a   :  { %9382 = vmatprep.subr.bf16.mxu1 %v9614_v52  ;;  %9404 = vmatprep.subr.bf16.mxu0 %v9615_v20  ;;  %v9655_v52 = vld [vmem:[%s10762_s7 + $0x3e8] sm:$0xff]  }
 0x52b   :  { %v9656_v20 = vld [vmem:[%s10762_s7 + $0x328] sm:$0xff]  }
 0x52c   :  { %7582 = vmatmul.mubr.bf16.vlgmr.msra.gmra.mxu1 %v6433_v14  ;;  %7622 = vmatmul.mubr.bf16.vlgmr.msra.gmra.mxu0 %v6435_v31  ;;  %v9662_v14 = vld [vmem:[%s10762_s7 + $0x358] sm:$0xff]  }
 0x52d   :  { %9383 = vmatpush3.bf16.msra.mxu1 %v9616_v7  ;;  %7661 = vmatprep.mubr.bf16.mxu1 %v6438_v30  ;;  %v9660_v7 = vld [vmem:[%s10762_s7 + $0x320] sm:$0xff]   ;;  %v9663_v31 = vld [vmem:[%s10762_s7 + $0x3d8] sm:$0xff]  }
 0x52e   :  { %9405 = vmatpush3.bf16.msra.mxu0 %v9617_v29  ;;  %7701 = vmatprep.mubr.bf16.mxu0 %v6440_v25  ;;  %v9664_v29 = vld [vmem:[%s10762_s7 + $0x318] sm:$0xff]   ;;  %v9668_v25 = vld [vmem:[%s10762_s7 + $0x310] sm:$0xff]  }
 0x52f   :  { %9384 = vmatprep.subr.bf16.mxu1 %v9618_v22  ;;  %9406 = vmatprep.subr.bf16.mxu0 %v9619_v18  ;;  %v9665_v30 = vld [vmem:[%s10762_s7 + $0x398] sm:$0xff]   ;;  %v9666_v22 = vld [vmem:[%s10762_s7 + $0x350] sm:$0xff]  }
 0x530   :  { %v9667_v18 = vld [vmem:[%s10762_s7 + $0x3d0] sm:$0xff]  }
 0x531   :  { %9385 = vmatpush3.bf16.msra.mxu1 %v9620_v43  ;;  %v9669_v43 = vld [vmem:[%s10762_s7 + $0x390] sm:$0xff]  }
 0x532   :  { %9407 = vmatpush3.bf16.msra.mxu0 %v9621_v36  ;;  %9386 = vmatprep.subr.bf16.mxu1 %v9622_v40  ;;  %v9670_v36 = vld [vmem:[%s10762_s7 + $0x348] sm:$0xff]  }
 0x533   :  { %9408 = vmatprep.subr.bf16.mxu0 %v9623_v23  ;;  %v9671_v40 = vld [vmem:[%s10762_s7 + $0x3c8] sm:$0xff]  }
 0x534   :  { %v9672_v23 = vld [vmem:[%s10762_s7 + $0x308] sm:$0xff]  }
 0x535   :  { %9387 = vmatpush3.bf16.msra.mxu1 %v9624_v19  ;;  %v9673_v19 = vld [vmem:[%s10762_s7 + $0x388] sm:$0xff]  }
 0x536   :  { %9409 = vmatpush3.bf16.msra.mxu0 %v9625_v24  ;;  %9388 = vmatprep.subr.bf16.mxu1 %v9626_v42  ;;  %v9674_v24 = vld [vmem:[%s10762_s7 + $0x340] sm:$0xff]  }
 0x537   :  { %9410 = vmatprep.subr.bf16.mxu0 %v9627_v28  ;;  %v9675_v42 = vld [vmem:[%s10762_s7 + $0x3c0] sm:$0xff]  }
 0x538   :  { %v9676_v28 = vld [vmem:[%s10762_s7 + $0x300] sm:$0xff]  }
 0x539   :  { %9389 = vmatpush3.bf16.msra.mxu1 %v9628_v26  ;;  %v9677_v26 = vld [vmem:[%s10762_s7 + $0x380] sm:$0xff]  }
 0x53a   :  { %9411 = vmatpush3.bf16.msra.mxu0 %v9629_v33  ;;  %9390 = vmatprep.subr.bf16.mxu1 %v9630_v35  ;;  %v6441_v33 = vpack.c.bf16 %v10459_v51, %v10459_v51  ;;  %v6443_v35 = vpack.c.bf16 %v10463_v11, %v10463_v11 }
 0x53b   :  { %9412 = vmatprep.subr.bf16.mxu0 %v9631_v37 }
 0x53d   :  { %9391 = vmatpush3.bf16.msra.mxu1 %v9632_v32 }
 0x53e   :  { %9413 = vmatpush3.bf16.msra.mxu0 %v9633_v44  ;;  %9392 = vmatprep.subr.bf16.mxu1 %v9634_v39 }
 0x53f   :  { %9414 = vmatprep.subr.bf16.mxu0 %v9635_v5 }
 0x541   :  { %9393 = vmatpush3.bf16.msra.mxu1 %v9636_v41 }
 0x542   :  { %9415 = vmatpush3.bf16.msra.mxu0 %v9637_v45  ;;  %9394 = vmatprep.subr.bf16.mxu1 %v9638_v46 }
 0x543   :  { %9416 = vmatprep.subr.bf16.mxu0 %v9639_v47 }
 0x545   :  { %9395 = vmatpush3.bf16.msra.mxu1 %v9640_v16  ;;  %v9678_v16 = vld [vmem:[#allocation13 + $0x18] sm:$0xff]  }
 0x546   :  { %9417 = vmatpush3.bf16.msra.mxu0 %v9641_v53  ;;  %9396 = vmatprep.subr.bf16.mxu1 %v9642_v50  ;;  %v9679_v53 = vld [vmem:[#allocation13 + $0x10] sm:$0xff]  }
 0x547   :  { %9418 = vmatprep.subr.bf16.mxu0 %v9643_v3  ;;  %v9680_v3 = vld [vmem:[#allocation13 + $0x8] sm:$0xff]  }
 0x549   :  { %9397 = vmatpush3.bf16.msra.mxu1 %v9644_v56 }
 0x54a   :  { %9419 = vmatpush3.bf16.msra.mxu0 %v9645_v38  ;;  %9426 = vmatprep.subr.bf16.mxu1 %v9646_v8  ;;  %v9681_v38 = vld [vmem:[#allocation13] sm:$0xff]  }
 0x54b   :  { %9448 = vmatprep.subr.bf16.mxu0 %v9647_v48 }
 0x54c   :  { %7662 = vmatmul.mubr.bf16.vlgmr.msra.gmra.mxu1 %v6437_v57 }
 0x54d   :  { %7702 = vmatmul.mubr.bf16.vlgmr.msra.gmra.mxu0 %v6439_v61  ;;  %9427 = vmatpush3.bf16.msra.mxu1 %v9648_v54 }
 0x54e   :  { %7741 = vmatprep.mubr.bf16.mxu1 %v6442_v62  ;;  %9449 = vmatpush3.bf16.msra.mxu0 %v9649_v9 }
 0x54f   :  { %7781 = vmatprep.mubr.bf16.mxu0 %v6444_v0  ;;  %9428 = vmatprep.subr.bf16.mxu1 %v9650_v27 }
 0x550   :  { %9450 = vmatprep.subr.bf16.mxu0 %v9651_v60 }
 0x551   :  { %9429 = vmatpush3.bf16.msra.mxu1 %v9652_v1 }
 0x552   :  { %9451 = vmatpush3.bf16.msra.mxu0 %v9653_v17  ;;  %9430 = vmatprep.subr.bf16.mxu1 %v9654_v2 }
 0x553   :  { %9452 = vmatprep.subr.bf16.mxu0 %v9655_v52 }
 0x555   :  { %9431 = vmatpush3.bf16.msra.mxu1 %v9656_v20 }
 0x556   :  { %9453 = vmatpush3.bf16.msra.mxu0 %v9657_v4  ;;  %9432 = vmatprep.subr.bf16.mxu1 %v9658_v6 }
 0x557   :  { %9454 = vmatprep.subr.bf16.mxu0 %v9659_v10 }
 0x559   :  { %9433 = vmatpush3.bf16.msra.mxu1 %v9660_v7 }
 0x55a   :  { %9455 = vmatpush3.bf16.msra.mxu0 %v9661_v15  ;;  %9434 = vmatprep.subr.bf16.mxu1 %v9662_v14 }
 0x55b   :  { %9456 = vmatprep.subr.bf16.mxu0 %v9663_v31 }
 0x55d   :  { %9435 = vmatpush3.bf16.msra.mxu1 %v9664_v29 }
 0x55e   :  { %9457 = vmatpush3.bf16.msra.mxu0 %v9665_v30  ;;  %9436 = vmatprep.subr.bf16.mxu1 %v9666_v22 }
 0x55f   :  { %9458 = vmatprep.subr.bf16.mxu0 %v9667_v18 }
 0x561   :  { %9437 = vmatpush3.bf16.msra.mxu1 %v9668_v25 }
 0x562   :  { %9459 = vmatpush3.bf16.msra.mxu0 %v9669_v43  ;;  %9438 = vmatprep.subr.bf16.mxu1 %v9670_v36 }
 0x563   :  { %9460 = vmatprep.subr.bf16.mxu0 %v9671_v40 }
 0x565   :  { %9439 = vmatpush3.bf16.msra.mxu1 %v9672_v23 }
 0x566   :  { %9461 = vmatpush3.bf16.msra.mxu0 %v9673_v19  ;;  %9440 = vmatprep.subr.bf16.mxu1 %v9674_v24 }
 0x567   :  { %9462 = vmatprep.subr.bf16.mxu0 %v9675_v42 }
 0x569   :  { %9441 = vmatpush3.bf16.msra.mxu1 %v9676_v28 }
 0x56a   :  { %9463 = vmatpush3.bf16.msra.mxu0 %v9677_v26  ;;  %9494 = vmatprep.subr.bf16.mxu1 %v9929_v58 }
 0x56b   :  { %9506 = vmatprep.subr.bf16.mxu0 %v9929_v58 }
 0x56c   :  { %7742 = vmatmul.mubr.bf16.vlgmr.msra.gmra.mxu1 %v6441_v33 }
 0x56d   :  { %7782 = vmatmul.mubr.bf16.vlgmr.msra.gmra.mxu0 %v6443_v35  ;;  %9502 = vmatprep.mubr.msk.bf16.mxu1 %vm9930_vm3, %v9929_v58 }
 0x56e   :  { %9514 = vmatprep.mubr.msk.bf16.mxu0 %vm9930_vm3, %v9929_v58  ;;  %9495 = vmatpush3.bf16.msra.mxu1 %v9678_v16 }
 0x56f   :  { %9496 = vmatprep.subr.bf16.mxu1 %v9929_v58 }
 0x572   :  { %9497 = vmatpush3.bf16.msra.mxu1 %v9679_v53 }
 0x573   :  { %9498 = vmatprep.subr.bf16.mxu1 %v9929_v58 }
 0x576   :  { %9499 = vmatpush3.bf16.msra.mxu1 %v9680_v3 }
 0x577   :  { %9500 = vmatprep.subr.bf16.mxu1 %v9929_v58 }
 0x57a   :  { %9501 = vmatpush3.bf16.msra.mxu1 %v9681_v38 }
 0x5cc   :  { %v9310_v37 = vpop.f32.mrf.mxu1  ;;  %v9332_v32 = vpop.f32.mrf.mxu0 }
 0x5ce   :  { %v9311_v44 = vpop.f32.mrf.mxu1  ;;  %v9333_v51 = vpop.f32.mrf.mxu0 }
 0x5cf   :  { %v9312_v39 = vadd.f32 %v9311_v44, %v9310_v37  ;;  %v9334_v5 = vadd.f32 %v9333_v51, %v9332_v32 }
 0x5d0   :  { %v9313_v41 = vpop.f32.mrf.mxu1  ;;  %v9335_v45 = vpop.f32.mrf.mxu0 }
 0x5d1   :  { %v7544_v46 = vadd.f32 %v9334_v5, %v9312_v39 }
 0x5d2   :  { %v9314_v11 = vpop.f32.mrf.mxu1  ;;  %v9336_v47 = vpop.f32.mrf.mxu0 }
 0x5ec   :  { %v9354_v50 = vpop.f32.mrf.mxu1  ;;  %v9376_v12 = vpop.f32.mrf.mxu0 }
 0x5ee   :  { %v9355_v63 = vpop.f32.mrf.mxu1  ;;  %v9377_v21 = vpop.f32.mrf.mxu0 }
 0x5ef   :  { %v9356_v27 = vadd.f32 %v9355_v63, %v9354_v50  ;;  %v9378_v60 = vadd.f32 %v9377_v21, %v9376_v12 }
 0x5f0   :  { %v9357_v56 = vpop.f32.mrf.mxu1  ;;  %v9379_v13 = vpop.f32.mrf.mxu0 }
 0x5f1   :  { %v7584_v62 = vadd.f32 %v9356_v27, %v7544_v46 }
 0x5f2   :  { %v9358_v8 = vpop.f32.mrf.mxu1  ;;  %v9380_v34 = vpop.f32.mrf.mxu0 }
 0x5f3   :  { %v7624_v1 = vadd.f32 %v9378_v60, %v7584_v62  ;;  %v9270_v62 = vld [vmem:[#allocation10] ss:$0 sm:$0xff] }
 0x60c   :  { %v9398_v48 = vpop.f32.mrf.mxu1 }
 0x60d   :  { %v9420_v49 = vpop.f32.mrf.mxu0 }
 0x60e   :  { %v9399_v54 = vpop.f32.mrf.mxu1 }
 0x60f   :  { %v9421_v55 = vpop.f32.mrf.mxu0  ;;  %v9400_v0 = vadd.f32 %v9399_v54, %v9398_v48 }
 0x610   :  { %v9401_v57 = vpop.f32.mrf.mxu1  ;;  %v9422_v52 = vadd.f32 %v9421_v55, %v9420_v49 }
 0x611   :  { %v9423_v9 = vpop.f32.mrf.mxu0  ;;  %v7664_v17 = vadd.f32 %v9400_v0, %v7624_v1  ;;  %v9271_v0 = vld [vmem:[#allocation11] ss:$0 sm:$0xff] }
 0x612   :  { %v9402_v59 = vpop.f32.mrf.mxu1 }
 0x613   :  { %v9424_v61 = vpop.f32.mrf.mxu0  ;;  %v7704_v6 = vadd.f32 %v9422_v52, %v7664_v17 }
 0x62c   :  { %v9442_v2 = vpop.f32.mrf.mxu1 }
 0x62d   :  { %v9464_v20 = vpop.f32.mrf.mxu0 }
 0x62e   :  { %v9443_v4 = vpop.f32.mrf.mxu1 }
 0x62f   :  { %v9444_v10 = vadd.f32 %v9443_v4, %v9442_v2  ;;  %v9465_v7 = vpop.f32.mrf.mxu0  ;;  %v9683_v4 = vld [vmem:[%s10768_s13 + $0x10] sm:$0xff]  }
 0x630   :  { %v9445_v15 = vpop.f32.mrf.mxu1  ;;  %v9466_v31 = vadd.f32 %v9465_v7, %v9464_v20  ;;  %v9682_v20 = vld [vmem:[%s10768_s13 + $0x18] sm:$0xff]  }
 0x631   :  { %v7744_v14 = vadd.f32 %v9444_v10, %v7704_v6  ;;  %v9467_v29 = vpop.f32.mrf.mxu0  ;;  %9507 = vmatpush3.bf16.msra.mxu0 %v9682_v20  ;;  %v9684_v6 = vld [vmem:[%s10768_s13 + $0x8] sm:$0xff]   ;;  %v9685_v10 = vld [vmem:[%s10768_s13] sm:$0xff]  }
 0x632   :  { %v9446_v30 = vpop.f32.mrf.mxu1  ;;  %9508 = vmatprep.subr.bf16.mxu0 %v9929_v58 }
 0x633   :  { %v7784_v22 = vadd.f32 %v9466_v31, %v7744_v14  ;;  %v9468_v18 = vpop.f32.mrf.mxu0 }
 0x635   :  { %v7790_v25 = vsel %vm7789_vm6, %v7784_v22, 0.0  ;;  %v7813_v43 = vrot.slane %v7784_v22, 2  ;;  %9509 = vmatpush3.bf16.msra.mxu0 %v9683_v4 }
 0x636   :  { %v7791_v36 = vrot.slane %v7790_v25, 4  ;;  %9510 = vmatprep.subr.bf16.mxu0 %v9929_v58 }
 0x637   :  { %v7815_v40 = vsel %vm7789_vm6, %v7813_v43, 0.0 }
 0x638   :  { %v7792_v23 = vadd.f32 %v7791_v36, %v7790_v25  ;;  %v7816_v19 = vrot.slane %v7815_v40, 4 }
 0x639   :  { %9511 = vmatpush3.bf16.msra.mxu0 %v9684_v6 }
 0x63a   :  { %v7793_v24 = vrot.slane %v7792_v23, 2  ;;  %v7817_v42 = vadd.f32 %v7816_v19, %v7815_v40  ;;  %9512 = vmatprep.subr.bf16.mxu0 %v9929_v58 }
 0x63c   :  { %v7794_v28 = vadd.f32 %v7793_v24, %v7792_v23  ;;  %v7818_v26 = vrot.slane %v7817_v42, 2 }
 0x63d   :  { %9513 = vmatpush3.bf16.msra.mxu0 %v9685_v10 }
 0x63e   :  { %v7795_v33 = vrot.slane %v7794_v28, 1  ;;  %v7819_v35 = vadd.f32 %v7818_v26, %v7817_v42 }
 0x640   :  { %v7796_v37 = vadd.f32 %v7795_v33, %v7794_v28  ;;  %v7820_v32 = vrot.slane %v7819_v35, 1 }
 0x642   :  { %v7798_v44 = vmul.f32 0.5, %v7796_v37  ;;  %v7821_v51 = vadd.f32 %v7820_v32, %v7819_v35 }
 0x644   :  { %v7799_v39 = vsub.f32 %v7784_v22, %v7798_v44  ;;  %v7822_v5 = vmul.f32 0.5, %v7821_v51 }
 0x646   :  { %v7800_v41 = vmul.f32 %v7799_v39, %v7799_v39  ;;  %v7823_v45 = vsub.f32 %v7784_v22, %v7822_v5 }
 0x648   :  { %v7801_v46 = vsel %vm7789_vm6, %v7800_v41, 0.0  ;;  %v7824_v11 = vmul.f32 %v7823_v45, %v7823_v45 }
 0x649   :  { %v7802_v47 = vrot.slane %v7801_v46, 4 }
 0x64a   :  { %v7826_v16 = vrot.slane %v7824_v11, 2 }
 0x64b   :  { %v7803_v53 = vadd.f32 %v7802_v47, %v7801_v46 }
 0x64c   :  { %v7828_v50 = vsel %vm7789_vm6, %v7826_v16, 0.0 }
 0x64d   :  { %v7804_v12 = vrot.slane %v7803_v53, 2  ;;  %v7829_v3 = vrot.slane %v7828_v50, 4 }
 0x64f   :  { %v7805_v63 = vadd.f32 %v7804_v12, %v7803_v53  ;;  %v7830_v21 = vadd.f32 %v7829_v3, %v7828_v50 }
 0x651   :  { %v7806_v56 = vrot.slane %v7805_v63, 1  ;;  %v7831_v13 = vrot.slane %v7830_v21, 2 }
 0x653   :  { %v7807_v38 = vadd.f32 %v7806_v56, %v7805_v63  ;;  %v7832_v8 = vadd.f32 %v7831_v13, %v7830_v21 }
 0x655   :  { %v7808_v34 = vmul.f32 0.5, %v7807_v38  ;;  %v7833_v48 = vrot.slane %v7832_v8, 1 }
 0x657   :  { %v7809_v49 = vadd.f32 1e-05, %v7808_v34  ;;  %v7834_v54 = vadd.f32 %v7833_v48, %v7832_v8 }
 0x659   :  { %v7835_v55 = vmul.f32 0.5, %v7834_v54  ;;  %9692 = vrsqrt.f32 %v7809_v49 }
 0x65b   :  { %v7836_v57 = vadd.f32 1e-05, %v7835_v55 }
 0x65d   :  { %9694 = vrsqrt.f32 %v7836_v57  ;;  %v9277_v57 = vld [vmem:[#allocation14] ss:$0 sm:$0xff] }
 0x666   :  { %v9693_v9 = vpop.eup %9692 }
 0x667   :  { %v7811_v61 = vmul.f32 %v9693_v9, %v7799_v39 }
 0x66a   :  { %v9695_v59 = vpop.eup %9694 }
 0x66b   :  { %v7838_v27 = vmul.f32 %v9695_v59, %v7823_v45  ;;  %v9278_v59 = vld [vmem:[#allocation16] ss:$0 sm:$0xff] }
 0x66d   :  { %v7839_v60 = vsel %vm6412_vm5, %v7811_v61, %v7838_v27 }
 0x66e   :  { %v7847_v1 = vmul.f32 %v9270_v62, %v7839_v60 }
 0x670   :  { %v7855_v17 = vadd.f32 %v9271_v0, %v7847_v1 }
 0x672   :  { %v7856_v2 = vmax.f32 %v7855_v17, 0.0 }
 0x674   :  { %v7857_v52 = vpack.c.bf16 %v7856_v2, %v7856_v2 }
 0x676   :  { %9503 = vmatmul.mubr.msk.bf16.vlgmr.msra.gmra.mxu1 %vm7890_vm7, %v7857_v52 }
 0x736   :  { %v7928_v7 = vpop.f32.mrf.mxu1 }
 0x737   :  { %v7934_v15 = vsel %vm7789_vm6, %v7928_v7, 0.0  ;;  %v7956_v14 = vrot.slane %v7928_v7, 2 }
 0x738   :  { %v7935_v31 = vrot.slane %v7934_v15, 4  ;;  %v9504_v29 = vpop.f32.mrf.mxu1 }
 0x739   :  { %v7958_v30 = vsel %vm7789_vm6, %v7956_v14, 0.0 }
 0x73a   :  { %v7936_v22 = vadd.f32 %v7935_v31, %v7934_v15  ;;  %v7959_v18 = vrot.slane %v7958_v30, 4  ;;  %v7931_v25 = vpop.f32.mrf.mxu1 }
 0x73c   :  { %v7937_v43 = vrot.slane %v7936_v22, 2  ;;  %v7960_v36 = vadd.f32 %v7959_v18, %v7958_v30  ;;  %v9505_v40 = vpop.f32.mrf.mxu1 }
 0x73e   :  { %v7938_v23 = vadd.f32 %v7937_v43, %v7936_v22  ;;  %v7961_v19 = vrot.slane %v7960_v36, 2 }
 0x740   :  { %v7939_v24 = vrot.slane %v7938_v23, 1  ;;  %v7962_v42 = vadd.f32 %v7961_v19, %v7960_v36 }
 0x742   :  { %v7940_v58 = vadd.f32 %v7939_v24, %v7938_v23  ;;  %v7963_v28 = vrot.slane %v7962_v42, 1 }
 0x744   :  { %v7941_v26 = vmul.f32 0.5, %v7940_v58  ;;  %v7964_v33 = vadd.f32 %v7963_v28, %v7962_v42 }
 0x746   :  { %v7942_v35 = vsub.f32 %v7928_v7, %v7941_v26  ;;  %v7965_v37 = vmul.f32 0.5, %v7964_v33 }
 0x748   :  { %v7943_v32 = vmul.f32 %v7942_v35, %v7942_v35  ;;  %v7966_v44 = vsub.f32 %v7928_v7, %v7965_v37 }
 0x74a   :  { %v7944_v51 = vsel %vm7789_vm6, %v7943_v32, 0.0  ;;  %v7967_v39 = vmul.f32 %v7966_v44, %v7966_v44 }
 0x74b   :  { %v7945_v5 = vrot.slane %v7944_v51, 4 }
 0x74c   :  { %v7969_v41 = vrot.slane %v7967_v39, 2 }
 0x74d   :  { %v7946_v45 = vadd.f32 %v7945_v5, %v7944_v51 }
 0x74e   :  { %v7971_v46 = vsel %vm7789_vm6, %v7969_v41, 0.0 }
 0x74f   :  { %v7947_v11 = vrot.slane %v7946_v45, 2  ;;  %v7972_v47 = vrot.slane %v7971_v46, 4 }
 0x751   :  { %v7948_v16 = vadd.f32 %v7947_v11, %v7946_v45  ;;  %v7973_v53 = vadd.f32 %v7972_v47, %v7971_v46 }
 0x753   :  { %v7949_v50 = vrot.slane %v7948_v16, 1  ;;  %v7974_v12 = vrot.slane %v7973_v53, 2 }
 0x755   :  { %v7950_v3 = vadd.f32 %v7949_v50, %v7948_v16  ;;  %v7975_v63 = vadd.f32 %v7974_v12, %v7973_v53 }
 0x757   :  { %v7951_v21 = vmul.f32 0.5, %v7950_v3  ;;  %v7976_v56 = vrot.slane %v7975_v63, 1 }
 0x759   :  { %v7952_v13 = vadd.f32 1e-05, %v7951_v21  ;;  %v7977_v38 = vadd.f32 %v7976_v56, %v7975_v63 }
 0x75b   :  { %v7978_v8 = vmul.f32 0.5, %v7977_v38  ;;  %9696 = vrsqrt.f32 %v7952_v13 }
 0x75d   :  { %v7979_v34 = vadd.f32 1e-05, %v7978_v8 }
 0x75f   :  { %9698 = vrsqrt.f32 %v7979_v34 }
 0x768   :  { %v9697_v48 = vpop.eup %9696 }
 0x769   :  { %v7954_v54 = vmul.f32 %v9697_v48, %v7942_v35 }
 0x76c   :  { %v9699_v49 = vpop.eup %9698 }
 0x76d   :  { %v7981_v55 = vmul.f32 %v9699_v49, %v7966_v44 }
 0x76f   :  { %v7982_v9 = vsel %vm6412_vm5, %v7954_v54, %v7981_v55 }
 0x770   :  { %v7990_v61 = vmul.f32 %v9277_v57, %v7982_v9 }
 0x772   :  { %v7998_v27 = vadd.f32 %v9278_v59, %v7990_v61 }
 0x774   :  { %v7999_v62 = vmax.f32 %v7998_v27, 0.0 }
 0x776   :  { %v8000_v60 = vpack.c.bf16 %v7999_v62, %v7999_v62 }
 0x778   :  { %9515 = vmatmul.mubr.msk.bf16.vlgmr.msra.gmra.mxu0 %vm7890_vm7, %v8000_v60 }
 0x838   :  { %v8070_v0 = vpop.f32.mrf.mxu0 }
 0x839   :  { %v8077_v1 = vsel %vm8076_vm8, %v8070_v0, 0.0  ;;  %v8099_v17 = vrot.slane %v8070_v0, 2 }
 0x83a   :  { %v8078_v2 = vrot.slane %v8077_v1, 4  ;;  %v9516_v52 = vpop.f32.mrf.mxu0 }
 0x83b   :  { %v8101_v20 = vsel %vm8076_vm8, %v8099_v17, 0.0 }
 0x83c   :  { %v8079_v4 = vadd.f32 %v8078_v2, %v8077_v1  ;;  %v8102_v6 = vrot.slane %v8101_v20, 4  ;;  %v8073_v10 = vpop.f32.mrf.mxu0 }
 0x83e   :  { %v8080_v7 = vrot.slane %v8079_v4, 2  ;;  %v8103_v15 = vadd.f32 %v8102_v6, %v8101_v20  ;;  %v9517_v14 = vpop.f32.mrf.mxu0 }
 0x840   :  { %v8104_v31 = vrot.slane %v8103_v15, 2  ;;  %v8081_v29 = vadd.f32 %v8080_v7, %v8079_v4 }
 0x842   :  { %v8105_v30 = vadd.f32 %v8104_v31, %v8103_v15  ;;  %v8082_v22 = vrot.slane %v8081_v29, 1 }
 0x844   :  { %v8106_v18 = vrot.slane %v8105_v30, 1  ;;  %v8083_v25 = vadd.f32 %v8082_v22, %v8081_v29 }
 0x846   :  { %v8107_v43 = vadd.f32 %v8106_v18, %v8105_v30  ;;  %v8084_v36 = vmul.f32 0.5, %v8083_v25 }
 0x848   :  { %v8108_v40 = vmul.f32 0.5, %v8107_v43  ;;  %v8085_v23 = vsub.f32 %v8070_v0, %v8084_v36 }
 0x84a   :  { %v8109_v19 = vsub.f32 %v8070_v0, %v8108_v40  ;;  %v8086_v24 = vmul.f32 %v8085_v23, %v8085_v23 }
 0x84c   :  { %v8110_v42 = vmul.f32 %v8109_v19, %v8109_v19  ;;  %v8087_v58 = vsel %vm8076_vm8, %v8086_v24, 0.0 }
 0x84d   :  { %v8088_v28 = vrot.slane %v8087_v58, 4 }
 0x84e   :  { %v8112_v26 = vrot.slane %v8110_v42, 2 }
 0x84f   :  { %v8089_v33 = vadd.f32 %v8088_v28, %v8087_v58 }
 0x850   :  { %v8114_v35 = vsel %vm8076_vm8, %v8112_v26, 0.0 }
 0x851   :  { %v8115_v37 = vrot.slane %v8114_v35, 4  ;;  %v8090_v32 = vrot.slane %v8089_v33, 2 }
 0x853   :  { %v8116_v44 = vadd.f32 %v8115_v37, %v8114_v35  ;;  %v8091_v51 = vadd.f32 %v8090_v32, %v8089_v33 }
 0x855   :  { %v8117_v39 = vrot.slane %v8116_v44, 2  ;;  %v8092_v5 = vrot.slane %v8091_v51, 1 }
 0x857   :  { %v8118_v41 = vadd.f32 %v8117_v39, %v8116_v44  ;;  %v8093_v45 = vadd.f32 %v8092_v5, %v8091_v51 }
 0x859   :  { %v8119_v46 = vrot.slane %v8118_v41, 1  ;;  %v8094_v11 = vmul.f32 0.5, %v8093_v45 }
 0x85b   :  { %v8120_v47 = vadd.f32 %v8119_v46, %v8118_v41  ;;  %v8095_v16 = vadd.f32 1e-05, %v8094_v11 }
 0x85d   :  { %v8121_v53 = vmul.f32 0.5, %v8120_v47  ;;  %9700 = vrsqrt.f32 %v8095_v16 }
 0x85f   :  { %v8122_v50 = vadd.f32 1e-05, %v8121_v53 }
 0x861   :  { %9702 = vrsqrt.f32 %v8122_v50 }
 0x86a   :  { %v9701_v12 = vpop.eup %9700 }
 0x86b   :  { %v8097_v3 = vmul.f32 %v9701_v12, %v8085_v23 }
 0x86d   :  { %8125 = vxpose.xlu0.b32.start.end [1/1] (short) (narrow) %v8097_v3, 32 }
 0x86e   :  { %v9703_v63 = vpop.eup %9702 }
 0x86f   :  { %v8124_v21 = vmul.f32 %v9703_v63, %v8109_v19 }
 0x871   :  { %v8158_v56 = vrot.slane %v8124_v21, 2 }
 0x873   :  { %v8264_v13 = vmul.f32 %v8158_v56, %v8097_v3  ;;  %9518 = vmatprep.subr.msk.mxu1 %vm6412_vm5, %v8158_v56 }
 0x874   :  { %9519 = vmatpush3.msk.msra.mxu1 %vm6412_vm5, %v8158_v56 }
 0x875   :  { %v8265_v38 = vsel %vm8076_vm8, %v8264_v13, 0.0 }
 0x876   :  { %v8266_v8 = vrot.slane %v8265_v38, 4 }
 0x878   :  { %v8267_v34 = vadd.f32 %v8266_v8, %v8265_v38 }
 0x87a   :  { %v8268_v48 = vrot.slane %v8267_v34, 2 }
 0x87c   :  { %v8269_v49 = vadd.f32 %v8268_v48, %v8267_v34 }
 0x87e   :  { %v8270_v54 = vrot.slane %v8269_v49, 1 }
 0x880   :  { %v8271_v55 = vadd.f32 %v8270_v54, %v8269_v49 }
 0x882   :  { %v8272_v57 = vmul.f32 0.5, %v8271_v55 }
 0x884   :  { %v9289_v9 = vadd.f32 -1.0, %v8272_v57  ;;  %v8309_v59 = vmul.f32 %v8272_v57, %v8272_v57 }
 0x886   :  { %v8274_v61 = vmul.f32 %v9289_v9, %v9289_v9  ;;  %v8310_v27 = vsel %vm8275_vm9, %v8309_v59, 0.0 }
 0x888   :  { %v8276_v62 = vsel %vm8275_vm9, %v8274_v61, 0.0 }
 0x889   :  { %8277 = vadd.xlane.f32.xlu1 %v8276_v62 }
 0x8e9   :  { %v8141_v60 = vpop.trf.xlu0 }
 0x8ea   :  { %9520 = vmatprep.mubr.msk.f32.mxu1 %vm8159_vm10, %v8141_v60 }
 0x8ed   :  { %v8142_v0 = vpop.trf.xlu0 }
 0x8ee   :  { %9521 = vmatmul.mubr.msk.f32.vlgmr.msra.gmra.mxu1 %vm8159_vm10, %v8142_v0 }
 0x8f1   :  { %v8143_v1 = vpop.trf.xlu0 }
 0x8f2   :  { %9523 = vmatprep.mubr.msk.f32.mxu1 %vm8159_vm10, %v8143_v1 }
 0x8f5   :  { %v8144_v17 = vpop.trf.xlu0 }
 0x8f6   :  { %9524 = vmatmul.mubr.msk.f32.gmra.mxu1 %vm8159_vm10, %v8144_v17 }
 0x912   :  { %v8278_v2 = vpop.xlane.xlu1 %8277 }
 0x913   :  { %v8279_v52 = vrot.slane %v8278_v2, 4 }
 0x915   :  { %v8280_v20 = vadd.f32 %v8279_v52, %v8278_v2 }
 0x917   :  { %v8281_v4 = vrot.slane %v8280_v20, 2 }
 0x919   :  { %v8282_v6 = vadd.f32 %v8281_v4, %v8280_v20 }
 0x91b   :  { %v8283_v10 = vrot.slane %v8282_v6, 1 }
 0x91d   :  { %v8284_v7 = vadd.f32 %v8283_v10, %v8282_v6 }
 0x91f   :  { %9526 = vpush %v8284_v7 }
 0x950   :  { %s9527_s13 = spop %9526 }
 0x951   :  { %v8286_v21 = vstv %s9527_s13 }
 0x9ae   :  { %v9522_v15 = vpop.f32.mrf.mxu1 }
 0x9af   :  { %v8260_v29 = vmul.f32 0.5, %v9522_v15 }
 0x9b0   :  { %v8240_v14 = vpop.f32.mrf.mxu1 }
 0x9b1   :  { %v8259_v31 = vmul.f32 0.5, %v8240_v14  ;;  %v8288_v18 = vmul.f32 %v8260_v29, %v8260_v29 }
 0x9b3   :  { %v8287_v30 = vmul.f32 %v8259_v31, %v8259_v31  ;;  %v8293_v23 = vsel %vm8291_vm11, %v8288_v18, 0.0 }
 0x9b5   :  { %v8292_v36 = vsel %vm8291_vm11, %v8287_v30, 0.0 }
 0x9b6   :  { %v9525_v22 = vpop.f32.mrf.mxu1  ;;  %v8294_v42 = vadd.f32 %v8293_v23, %v8292_v36 }
 0x9b7   :  { %v8262_v25 = vmul.f32 0.5, %v9525_v22 }
 0x9b8   :  { %v8250_v43 = vpop.f32.mrf.mxu1 }
 0x9b9   :  { %v8261_v40 = vmul.f32 0.5, %v8250_v43  ;;  %v8290_v19 = vmul.f32 %v8262_v25, %v8262_v25 }
 0x9bb   :  { %v8289_v24 = vmul.f32 %v8261_v40, %v8261_v40  ;;  %v8297_v26 = vsel %vm8291_vm11, %v8290_v19, 0.0 }
 0x9bd   :  { %v8295_v58 = vsel %vm8291_vm11, %v8289_v24, 0.0 }
 0x9be   :  { %v8296_v28 = vadd.f32 %v8295_v58, %v8294_v42 }
 0x9c0   :  { %v8298_v33 = vadd.f32 %v8297_v26, %v8296_v28 }
 0x9c2   :  { %8299 = vadd.xlane.f32.xlu1 %v8298_v33 }
 0x9c6   :  { %8311 = vadd.xlane.f32.xlu1 %v8310_v27 }
 0xa4b   :  { %v8300_v35 = vpop.xlane.xlu1 %8299 }
 0xa4c   :  { %v8301_v37 = vrot.slane %v8300_v35, 4 }
 0xa4e   :  { %v8302_v32 = vadd.f32 %v8301_v37, %v8300_v35 }
 0xa4f   :  { %v8312_v44 = vpop.xlane.xlu1 %8311 }
 0xa50   :  { %v8303_v51 = vrot.slane %v8302_v32, 2  ;;  %v8313_v39 = vrot.slane %v8312_v44, 4 }
 0xa52   :  { %v8314_v5 = vadd.f32 %v8313_v39, %v8312_v44  ;;  %v8304_v41 = vadd.f32 %v8303_v51, %v8302_v32 }
 0xa54   :  { %v8315_v45 = vrot.slane %v8314_v5, 2  ;;  %v8305_v46 = vrot.slane %v8304_v41, 1 }
 0xa56   :  { %v8316_v11 = vadd.f32 %v8315_v45, %v8314_v5  ;;  %v8306_v47 = vadd.f32 %v8305_v46, %v8304_v41 }
 0xa58   :  { %9528 = vpush %v8306_v47  ;;  %v8317_v16 = vrot.slane %v8316_v11, 1 }
 0xa5a   :  { %v8318_v53 = vadd.f32 %v8317_v16, %v8316_v11 }
 0xa5c   :  { %9530 = vpush %v8318_v53 }
 0xa89   :  { %s9529_s9 = spop %9528 }
 0xa8a   :  { %v8308_v50 = vstv %s9529_s9 }
 0xa8d   :  { %s9531_s8 = spop %9530 }
 0xa8e   :  { %v8320_v12 = vstv %s9531_s8 }
 0xa8f   :  { %v8321_v3 = vsub.f32 %v8308_v50, %v8320_v12 }
 0xa91   :  { %v8322_v63 = vmul.f32 0.0051, %v8321_v3 }
 0xa93   :  { %v8323_v56 = vadd.f32 %v8322_v63, %v8286_v21 }
 0xa95   :  { %8325 = vst.msk [vmem:[#allocation17] sm:$0x1] %vm8324_vm12, %v8323_v56 }
 0xa96   :  { %9895 = shalt.err (!%p9892_p7)
}
 0xa97   :  { %8335 = dma.vmem_to_hbm [thread:$0]  %s8333_s26, 16, %s10769_s14, [#allocation4]  }
 0xa98   :  { %9914 = dma.done.wait [#allocation4], 16  }
 0xa99   :  { %9915 = vsyncadd [#allocation4], 4294967280 }
 0xa9a   :  { %8339 = vsyncpa [#allocation3], 1 }
 0xa9b   :  { %8340 = vsyncpa [#allocation6], 1 }
 0xa9c   :  { %8341 = vsyncpa [#allocation9], 1 }
 0xa9d   :  { %8342 = vsyncpa [#allocation12], 1 }
 0xa9e   :  { %8343 = vsyncpa [#allocation15], 1 }
 0xa9f   :  { %8344 = vsyncpa [#allocation4], 1 }

</bundles_post_ra>
